<compile_context>
chip_gen: v6e
topology: v6e:2x2x1
jax: 0.10.0
libtpu: 0.0.40
codegen_flags: <defaults>
</compile_context>

<pallas_src>
import functools

import jax
import jax.numpy as jnp
import numpy as np
from jax.experimental import pallas as pl
from jax.experimental.pallas import tpu as pltpu


_COMPUTE_DTYPE = jnp.bfloat16   # MXU-native inputs; accumulation stays fp32.


def _fold_weights(w_taps, upsample):
    """Fold (nearest-2x upsample ∘ 3x3 conv) into per-phase KxK convs.

    w_taps: (3, 3, Cin, Cout) float32, indexed [dy, dx, cin, cout].
    Returns (wf, P, K) with wf of shape (P*P, K*K*Cin, Cout) such that
      out[P*i+a, P*j+b] = sum_{ry,rx,ci} x_pad[i+a+ry, j+b+rx, ci]
                                          * wf[a*P+b, (ry*K+rx)*Cin+ci]
    where x_pad is the 1-zero-padded ORIGINAL-resolution frame.  The K*K taps
    are stacked on the contraction axis so each phase is a single matmul.
    """
    cin, cout = w_taps.shape[2], w_taps.shape[3]
    if not upsample:
        return w_taps.reshape(1, 3 * 3 * cin, cout), 1, 3
    # fold[a, r, dy] = 1 iff upsampled-space tap dy of output phase a reads
    # padded original row (i + a + r); derived from U_pad[I] == x_pad[(I+1)//2].
    fold = jnp.array(
        [[[1.0, 0.0, 0.0], [0.0, 1.0, 1.0]],
         [[1.0, 1.0, 0.0], [0.0, 0.0, 1.0]]], w_taps.dtype)        # (2, 2, 3)
    wf = jnp.einsum("ard,bse,deio->abrsio", fold, fold, w_taps)     # (2,2,2,2,Cin,Cout)
    return wf.reshape(2 * 2, 2 * 2 * cin, cout), 2, 2


def _vmem_budgets():
    """Per-generation VMEM numbers: 64 MiB/TC on v7x, 128 MiB on v5e/v6e."""
    cap = 64 * 1024 * 1024                      # conservative fallback (v7x)
    try:
        cap = int(getattr(pltpu.get_tpu_info(), "vmem_capacity_bytes", cap))
    except Exception:
        pass
    cap = max(32 * 1024 * 1024, min(cap, 256 * 1024 * 1024))
    tile_budget = int(cap * 0.30)               # ~19 MiB v7x, ~38 MiB v5e/v6e
    vmem_limit = int(cap * 0.72)                # ~46 MiB v7x, ~92 MiB v5e/v6e
    return tile_budget, vmem_limit


@functools.partial(jax.jit, static_argnames=("unup",))
def spatial_upsample2x(x, weight, bias, *, unup=False):
    """SpatialUpsample2x.forward.

    x      : (B, Cin, T, H, W)
    weight : (Cout, Cin, 1, 3, 3)   (CausalConv3d(Cin, Cout, (1,3,3)) weight)
    bias   : (Cout,)
    returns: (B, Cout, T, 2H, 2W)   (or (B, Cout, T, H, W) if unup)
    """
    B, Cin, T, H, W = x.shape
    Cout = weight.shape[0]
    N = B * T
    out_dtype = x.dtype           # keep module semantics; bf16 output would
                                  # halve writeback HBM traffic if tolerated.
    out_isize = jnp.dtype(out_dtype).itemsize
    bf = jnp.dtype(_COMPUTE_DTYPE).itemsize

    # ---- weights: fold upsample+conv, stack taps on the contraction axis --
    w_taps = jnp.transpose(weight[:, :, 0].astype(jnp.float32), (2, 3, 1, 0))  # (3,3,Cin,Cout)
    wf, P, K = _fold_weights(w_taps, upsample=not unup)
    wf = wf.astype(_COMPUTE_DTYPE)              # (P*P, K*K*Cin, Cout)
    bk = bias.astype(jnp.float32).reshape(1, Cout)
    PP, KKC = P * P, K * K * Cin

    # ---- tile selection ----------------------------------------------------
    tile_budget, vmem_limit = _vmem_budgets()
    # Cout tile: full Cout, or 128 lanes when Cout is large.  128 (not 256)
    # matches v5e's 128-wide MXUs and frees VMEM for a larger frame tile,
    # which is the bigger lever on every generation.
    tc = Cout if (Cout <= 256 or Cout % 128 != 0) else 128
    # W padded to a sublane multiple so in-kernel reshapes stay metadata-only.
    Wp = -(-W // 8) * 8

    # Per-frame VMEM estimate: dbl-buffered input block + its load, P channel-
    # stacked window buffers, one materialized matmul operand, fp32 result +
    # cast, dbl-buffered output block.
    in_frame = (H + 2) * (Wp + 2) * Cin * bf
    big_frames = P * (H + P - 1) * Wp * KKC * bf
    opr_frame = H * Wp * KKC * bf
    acc_frame = H * Wp * tc * 4
    out_frame = PP * H * Wp * tc * out_isize
    per_frame = 3 * in_frame + big_frames + opr_frame + 2 * acc_frame + 2 * out_frame
    # Grid-invariant weights can stay single-buffered when they are big.
    w_bytes = PP * KKC * tc * bf
    w_single = (tc == Cout) and (2 * w_bytes > (2 << 20))
    w_buffers = 1 if w_single else 2
    fixed = w_buffers * w_bytes + 2 * Cout * 4
    tn = max(1, min(N, (tile_budget - fixed) // max(per_frame, 1)))
    # Keep >=2 grid steps along a parallel axis so both of v7x's TensorCores
    # (and the software pipeline) have work.
    if Cout // tc < 2 and N >= 2:
        tn = min(tn, -(-N // 2))
    # Do NOT force tn | N: round N up with zero frames and balance tn so an
    # awkward B*T never collapses the tile to 1-2 frames.
    steps = -(-N // tn)
    tn = -(-N // steps)
    N_pad = steps * tn
    # TODO(synk): frames so large that per_frame > tile_budget even at tn=1
    # would additionally need H/W halo tiling; not implemented here.

    # ---- input prep: ONE pass over the original-resolution input ----------
    xs = jnp.transpose(x, (0, 2, 3, 4, 1)).reshape(N, H, W, Cin)
    xp = jnp.pad(xs, ((0, N_pad - N), (1, 1), (1, 1 + (Wp - W)), (0, 0)))
    xp = xp.astype(_COMPUTE_DTYPE)              # (N_pad, H+2, Wp+2, Cin)
    # TODO(synk): CompilerParams(allow_input_fusion=...) could fuse this
    # transpose/pad/cast into the kernel's input DMA (saves one HBM round
    # trip, biggest win on v5e); left off to keep the lowering conservative.

    m = tn * H * Wp

    def kernel(x_ref, w_ref, b_ref, o_ref):
        # x_ref: (tn, H+2, Wp+2, Cin) bf16   w_ref: (PP, K*K*Cin, tc) bf16
        # b_ref: (1, tc) f32                 o_ref: (tn, PP*H, Wp, tc)
        x_blk = x_ref[...]
        bias_v = b_ref[...]                                  # (1, tc) fp32
        for pb in range(P):
            # Stack the K*K taps of this column phase along the lane
            # (contraction) axis: one copy pass, then ONE MXU matmul per
            # phase with contraction K*K*Cin -- no per-tap fp32 adds.
            parts = [x_blk[:, ry:ry + H + P - 1, pb + rx:pb + rx + Wp, :]
                     for ry in range(K) for rx in range(K)]
            big = jnp.concatenate(parts, axis=-1)            # (tn, H+P-1, Wp, KKC)
            for pa in range(P):
                ph = pa * P + pb
                operand = big[:, pa:pa + H].reshape(m, KKC)  # vreg-granular row slice
                res = jnp.dot(operand, w_ref[ph],
                              preferred_element_type=jnp.float32) + bias_v
                o_ref[:, ph * H:(ph + 1) * H, :, :] = (
                    res.reshape(tn, H, Wp, tc).astype(o_ref.dtype))

    grid = (N_pad // tn, Cout // tc)
    if w_single:
        w_spec = pl.BlockSpec((PP, KKC, tc), lambda i, j: (0, 0, j),
                              pipeline_mode=pl.Buffered(1))
    else:
        w_spec = pl.BlockSpec((PP, KKC, tc), lambda i, j: (0, 0, j))

    flops = 2 * N_pad * PP * H * Wp * KKC * Cout
    bytes_accessed = (xp.size * bf
                      + N_pad * PP * H * Wp * Cout * out_isize
                      + wf.size * bf * (grid[0] if grid[1] > 1 else 1)
                      + Cout * 4)

    out4 = pl.pallas_call(
        kernel,
        out_shape=jax.ShapeDtypeStruct((N_pad, PP * H, Wp, Cout), out_dtype),
        grid=grid,
        in_specs=[
            pl.BlockSpec((tn, H + 2, Wp + 2, Cin), lambda i, j: (i, 0, 0, 0)),
            w_spec,
            pl.BlockSpec((1, tc), lambda i, j: (0, j)),
        ],
        out_specs=pl.BlockSpec((tn, PP * H, Wp, tc), lambda i, j: (i, 0, 0, j)),
        compiler_params=pltpu.CompilerParams(
            dimension_semantics=("parallel", "parallel"),
            vmem_limit_bytes=vmem_limit),
        cost_estimate=pl.CostEstimate(flops=flops, transcendentals=0,
                                      bytes_accessed=bytes_accessed),
    )(xp, wf, bk)

    # Drop the frame/column padding; interleave the P*P phase slabs back into
    # NCTHW in the single transpose that is needed anyway (the (H,P)/(W,P)
    # merges are metadata-only reshapes).
    out = out4[:N, :, :W, :].reshape(B, T, P, P, H, W, Cout)
    out = jnp.transpose(out, (0, 6, 1, 4, 2, 5, 3))
    return out.reshape(B, Cout, T, P * H, P * W)


def _reference(x, weight, bias, unup=False):
    """Plain-JAX fp32 reference mirroring the PyTorch forward."""
    B, Cin, T, H, W = x.shape
    Cout = weight.shape[0]
    if not unup:
        x = jnp.repeat(jnp.repeat(x, 2, axis=3), 2, axis=4)
    H2, W2 = x.shape[3], x.shape[4]
    x2 = x.transpose(0, 2, 1, 3, 4).reshape(B * T, Cin, H2, W2)
    y = jax.lax.conv_general_dilated(
        x2, weight[:, :, 0],
        window_strides=(1, 1), padding=((1, 1), (1, 1)),
        dimension_numbers=("NCHW", "OIHW", "NCHW"),
        precision=jax.lax.Precision.HIGHEST)
    y = y + bias[None, :, None, None]
    return y.reshape(B, T, Cout, H2, W2).transpose(0, 2, 1, 3, 4)


if __name__ == "__main__":
    root = jax.random.PRNGKey(0)

    def _run_case(idx, B, Cin, Cout, T, H, W, unup):
        kx, kw, kb = jax.random.split(jax.random.fold_in(root, idx), 3)
        x = jax.random.normal(kx, (B, Cin, T, H, W), jnp.float32)
        # Shapes from CausalConv3d(Cin, Cout, (1, 3, 3)).
        weight = 0.1 * jax.random.normal(kw, (Cout, Cin, 1, 3, 3), jnp.float32)
        bias = 0.1 * jax.random.normal(kb, (Cout,), jnp.float32)
        y = jax.block_until_ready(spatial_upsample2x(x, weight, bias, unup=unup))
        s = 1 if unup else 2
        assert y.shape == (B, Cout, T, s * H, s * W), y.shape
        y_ref = _reference(x, weight, bias, unup=unup)
        np.testing.assert_allclose(np.asarray(y), np.asarray(y_ref),
                                   rtol=2e-2, atol=2e-2)

    # default (upsample) path and unup (conv-only) path
    _run_case(0, B=2, Cin=4, Cout=8, T=4, H=8, W=8, unup=False)
    _run_case(1, B=2, Cin=4, Cout=8, T=4, H=8, W=8, unup=True)
    # awkward shapes: exercises W sublane padding and the N=B*T round-up path
    _run_case(2, B=1, Cin=4, Cout=8, T=3, H=5, W=6, unup=False)
    print("KERNEL_OK")
</pallas_src>

<mosaic_0001>
module attributes {stable_mosaic.version = 11 : i64} {
  func.func @kernel(%arg0: i32, %arg1: i32, %arg2: memref<4x10x10x4xbf16, #tpu.memory_space<vmem>>, %arg3: memref<4x16x8xbf16, #tpu.memory_space<vmem>>, %arg4: memref<1x8xf32, #tpu.memory_space<vmem>>, %arg5: memref<4x32x8x8xf32, #tpu.memory_space<vmem>>) attributes {dimension_semantics = [#tpu.dimension_semantics<parallel>, #tpu.dimension_semantics<parallel>], iteration_bounds = array<i64: 2, 1>, scalar_prefetch = 0 : i64, scratch_operands = 0 : i64, tpu.core_type = #tpu.core_type<tc>, window_params = [{transform_indices = @transform_0, window_bounds = array<i64: 4, 10, 10, 4>}, {transform_indices = @transform_1, window_bounds = array<i64: 4, 16, 8>}, {transform_indices = @transform_2, window_bounds = array<i64: 1, 8>}, {transform_indices = @transform_3, window_bounds = array<i64: 4, 32, 8, 8>}]} {
    %c0 = arith.constant 0 : index
    %c0_0 = arith.constant 0 : index
    %c0_1 = arith.constant 0 : index
    %c0_2 = arith.constant 0 : index
    %0 = vector.load %arg2[%c0, %c0_0, %c0_1, %c0_2] : memref<4x10x10x4xbf16, #tpu.memory_space<vmem>>, vector<4x10x10x4xbf16>
    %c0_3 = arith.constant 0 : index
    %c0_4 = arith.constant 0 : index
    %1 = vector.load %arg4[%c0_3, %c0_4] : memref<1x8xf32, #tpu.memory_space<vmem>>, vector<1x8xf32>
    %2 = vector.extract_strided_slice %0 {offsets = [0, 0, 0, 0], sizes = [4, 9, 8, 4], strides = [1, 1, 1, 1]} : vector<4x10x10x4xbf16> to vector<4x9x8x4xbf16>
    %3 = vector.extract_strided_slice %0 {offsets = [0, 0, 1, 0], sizes = [4, 9, 8, 4], strides = [1, 1, 1, 1]} : vector<4x10x10x4xbf16> to vector<4x9x8x4xbf16>
    %4 = vector.extract_strided_slice %0 {offsets = [0, 1, 0, 0], sizes = [4, 9, 8, 4], strides = [1, 1, 1, 1]} : vector<4x10x10x4xbf16> to vector<4x9x8x4xbf16>
    %5 = vector.extract_strided_slice %0 {offsets = [0, 1, 1, 0], sizes = [4, 9, 8, 4], strides = [1, 1, 1, 1]} : vector<4x10x10x4xbf16> to vector<4x9x8x4xbf16>
    %6 = tpu.concatenate %2, %3, %4, %5 in 3 : vector<4x9x8x4xbf16>, vector<4x9x8x4xbf16>, vector<4x9x8x4xbf16>, vector<4x9x8x4xbf16> -> vector<4x9x8x16xbf16>
    %7 = vector.extract_strided_slice %6 {offsets = [0, 0, 0, 0], sizes = [4, 8, 8, 16], strides = [1, 1, 1, 1]} : vector<4x9x8x16xbf16> to vector<4x8x8x16xbf16>
    %8 = vector.shape_cast %7 : vector<4x8x8x16xbf16> to vector<256x16xbf16>
    %c0_5 = arith.constant 0 : index
    %c0_6 = arith.constant 0 : index
    %c0_7 = arith.constant 0 : index
    %9 = vector.load %arg3[%c0_5, %c0_6, %c0_7] : memref<4x16x8xbf16, #tpu.memory_space<vmem>>, vector<1x16x8xbf16>
    %10 = vector.shape_cast %9 : vector<1x16x8xbf16> to vector<16x8xbf16>
    %cst = arith.constant dense<0.000000e+00> : vector<256x8xf32>
    %11 = tpu.matmul %8, %10, %cst {dimension_numbers = #tpu.dot_dimension_numbers<[1], [0], [0], [1], [0, 0, 1, 1], [], []>} : vector<256x16xbf16>, vector<16x8xbf16>, vector<256x8xf32> -> vector<256x8xf32>
    %12 = vector.broadcast %1 : vector<1x8xf32> to vector<256x8xf32>
    %13 = arith.addf %11, %12 : vector<256x8xf32>
    %14 = vector.shape_cast %13 : vector<256x8xf32> to vector<4x8x8x8xf32>
    %c0_8 = arith.constant 0 : index
    %c0_9 = arith.constant 0 : index
    %c0_10 = arith.constant 0 : index
    %c0_11 = arith.constant 0 : index
    %15 = vector.load %arg5[%c0_8, %c0_9, %c0_10, %c0_11] : memref<4x32x8x8xf32, #tpu.memory_space<vmem>>, vector<4x8x8x8xf32>
    tpu.vector_store %arg5[%c0_8, %c0_9, %c0_10, %c0_11], %14 {strides = array<i32>} : memref<4x32x8x8xf32, #tpu.memory_space<vmem>>, vector<4x8x8x8xf32>,
    %16 = vector.extract_strided_slice %6 {offsets = [0, 1, 0, 0], sizes = [4, 8, 8, 16], strides = [1, 1, 1, 1]} : vector<4x9x8x16xbf16> to vector<4x8x8x16xbf16>
    %17 = vector.shape_cast %16 : vector<4x8x8x16xbf16> to vector<256x16xbf16>
    %c2 = arith.constant 2 : index
    %c0_12 = arith.constant 0 : index
    %c0_13 = arith.constant 0 : index
    %18 = vector.load %arg3[%c2, %c0_12, %c0_13] : memref<4x16x8xbf16, #tpu.memory_space<vmem>>, vector<1x16x8xbf16>
    %19 = vector.shape_cast %18 : vector<1x16x8xbf16> to vector<16x8xbf16>
    %cst_14 = arith.constant dense<0.000000e+00> : vector<256x8xf32>
    %20 = tpu.matmul %17, %19, %cst_14 {dimension_numbers = #tpu.dot_dimension_numbers<[1], [0], [0], [1], [0, 0, 1, 1], [], []>} : vector<256x16xbf16>, vector<16x8xbf16>, vector<256x8xf32> -> vector<256x8xf32>
    %21 = vector.broadcast %1 : vector<1x8xf32> to vector<256x8xf32>
    %22 = arith.addf %20, %21 : vector<256x8xf32>
    %23 = vector.shape_cast %22 : vector<256x8xf32> to vector<4x8x8x8xf32>
    %c0_15 = arith.constant 0 : index
    %c16 = arith.constant 16 : index
    %c0_16 = arith.constant 0 : index
    %c0_17 = arith.constant 0 : index
    %24 = vector.load %arg5[%c0_15, %c16, %c0_16, %c0_17] : memref<4x32x8x8xf32, #tpu.memory_space<vmem>>, vector<4x8x8x8xf32>
    tpu.vector_store %arg5[%c0_15, %c16, %c0_16, %c0_17], %23 {strides = array<i32>} : memref<4x32x8x8xf32, #tpu.memory_space<vmem>>, vector<4x8x8x8xf32>,
    %25 = vector.extract_strided_slice %0 {offsets = [0, 0, 1, 0], sizes = [4, 9, 8, 4], strides = [1, 1, 1, 1]} : vector<4x10x10x4xbf16> to vector<4x9x8x4xbf16>
    %26 = vector.extract_strided_slice %0 {offsets = [0, 0, 2, 0], sizes = [4, 9, 8, 4], strides = [1, 1, 1, 1]} : vector<4x10x10x4xbf16> to vector<4x9x8x4xbf16>
    %27 = vector.extract_strided_slice %0 {offsets = [0, 1, 1, 0], sizes = [4, 9, 8, 4], strides = [1, 1, 1, 1]} : vector<4x10x10x4xbf16> to vector<4x9x8x4xbf16>
    %28 = vector.extract_strided_slice %0 {offsets = [0, 1, 2, 0], sizes = [4, 9, 8, 4], strides = [1, 1, 1, 1]} : vector<4x10x10x4xbf16> to vector<4x9x8x4xbf16>
    %29 = tpu.concatenate %25, %26, %27, %28 in 3 : vector<4x9x8x4xbf16>, vector<4x9x8x4xbf16>, vector<4x9x8x4xbf16>, vector<4x9x8x4xbf16> -> vector<4x9x8x16xbf16>
    %30 = vector.extract_strided_slice %29 {offsets = [0, 0, 0, 0], sizes = [4, 8, 8, 16], strides = [1, 1, 1, 1]} : vector<4x9x8x16xbf16> to vector<4x8x8x16xbf16>
    %31 = vector.shape_cast %30 : vector<4x8x8x16xbf16> to vector<256x16xbf16>
    %c1 = arith.constant 1 : index
    %c0_18 = arith.constant 0 : index
    %c0_19 = arith.constant 0 : index
    %32 = vector.load %arg3[%c1, %c0_18, %c0_19] : memref<4x16x8xbf16, #tpu.memory_space<vmem>>, vector<1x16x8xbf16>
    %33 = vector.shape_cast %32 : vector<1x16x8xbf16> to vector<16x8xbf16>
    %cst_20 = arith.constant dense<0.000000e+00> : vector<256x8xf32>
    %34 = tpu.matmul %31, %33, %cst_20 {dimension_numbers = #tpu.dot_dimension_numbers<[1], [0], [0], [1], [0, 0, 1, 1], [], []>} : vector<256x16xbf16>, vector<16x8xbf16>, vector<256x8xf32> -> vector<256x8xf32>
    %35 = vector.broadcast %1 : vector<1x8xf32> to vector<256x8xf32>
    %36 = arith.addf %34, %35 : vector<256x8xf32>
    %37 = vector.shape_cast %36 : vector<256x8xf32> to vector<4x8x8x8xf32>
    %c0_21 = arith.constant 0 : index
    %c8 = arith.constant 8 : index
    %c0_22 = arith.constant 0 : index
    %c0_23 = arith.constant 0 : index
    %38 = vector.load %arg5[%c0_21, %c8, %c0_22, %c0_23] : memref<4x32x8x8xf32, #tpu.memory_space<vmem>>, vector<4x8x8x8xf32>
    tpu.vector_store %arg5[%c0_21, %c8, %c0_22, %c0_23], %37 {strides = array<i32>} : memref<4x32x8x8xf32, #tpu.memory_space<vmem>>, vector<4x8x8x8xf32>,
    %39 = vector.extract_strided_slice %29 {offsets = [0, 1, 0, 0], sizes = [4, 8, 8, 16], strides = [1, 1, 1, 1]} : vector<4x9x8x16xbf16> to vector<4x8x8x16xbf16>
    %40 = vector.shape_cast %39 : vector<4x8x8x16xbf16> to vector<256x16xbf16>
    %c3 = arith.constant 3 : index
    %c0_24 = arith.constant 0 : index
    %c0_25 = arith.constant 0 : index
    %41 = vector.load %arg3[%c3, %c0_24, %c0_25] : memref<4x16x8xbf16, #tpu.memory_space<vmem>>, vector<1x16x8xbf16>
    %42 = vector.shape_cast %41 : vector<1x16x8xbf16> to vector<16x8xbf16>
    %cst_26 = arith.constant dense<0.000000e+00> : vector<256x8xf32>
    %43 = tpu.matmul %40, %42, %cst_26 {dimension_numbers = #tpu.dot_dimension_numbers<[1], [0], [0], [1], [0, 0, 1, 1], [], []>} : vector<256x16xbf16>, vector<16x8xbf16>, vector<256x8xf32> -> vector<256x8xf32>
    %44 = vector.broadcast %1 : vector<1x8xf32> to vector<256x8xf32>
    %45 = arith.addf %43, %44 : vector<256x8xf32>
    %46 = vector.shape_cast %45 : vector<256x8xf32> to vector<4x8x8x8xf32>
    %c0_27 = arith.constant 0 : index
    %c24 = arith.constant 24 : index
    %c0_28 = arith.constant 0 : index
    %c0_29 = arith.constant 0 : index
    %47 = vector.load %arg5[%c0_27, %c24, %c0_28, %c0_29] : memref<4x32x8x8xf32, #tpu.memory_space<vmem>>, vector<4x8x8x8xf32>
    tpu.vector_store %arg5[%c0_27, %c24, %c0_28, %c0_29], %46 {strides = array<i32>} : memref<4x32x8x8xf32, #tpu.memory_space<vmem>>, vector<4x8x8x8xf32>,
    return
  }
  func.func @transform_0(%arg0: i32, %arg1: i32) -> (i32, i32, i32, i32) {
    %c0_i32 = arith.constant 0 : i32
    %c0_i32_0 = arith.constant 0 : i32
    %c0_i32_1 = arith.constant 0 : i32
    %c0_i32_2 = arith.constant 0 : i32
    return %arg0, %c0_i32, %c0_i32_0, %c0_i32_1 : i32, i32, i32, i32
  }
  func.func @transform_1(%arg0: i32, %arg1: i32) -> (i32, i32, i32) {
    %c0_i32 = arith.constant 0 : i32
    %c0_i32_0 = arith.constant 0 : i32
    %c0_i32_1 = arith.constant 0 : i32
    return %c0_i32, %c0_i32_0, %arg1 : i32, i32, i32
  }
  func.func @transform_2(%arg0: i32, %arg1: i32) -> (i32, i32) {
    %c0_i32 = arith.constant 0 : i32
    %c0_i32_0 = arith.constant 0 : i32
    return %c0_i32, %arg1 : i32, i32
  }
  func.func @transform_3(%arg0: i32, %arg1: i32) -> (i32, i32, i32, i32) {
    %c0_i32 = arith.constant 0 : i32
    %c0_i32_0 = arith.constant 0 : i32
    %c0_i32_1 = arith.constant 0 : i32
    return %arg0, %c0_i32, %c0_i32_0, %arg1 : i32, i32, i32, i32
  }
}

</mosaic_0001>

<bundles_post_ra>
// kernel: spatial_upsample2x.1
= control target key start
LH: loop header
LB: loop body
LE: loop exit
PB: predicated region body
PF: predicated region fallthrough
CT: control target
= control target key end

     0   :  { %s4249_s12 = smov 0   ;;  %s4251_s13 = smov 0   ;;  %s6417_s0 = inlined_call_operand.vmem [shape: bf16[8,10,10,4], index: 0, kind: input, shape index: {}]   ;;  %s6418_s1 = inlined_call_operand.vmem [shape: bf16[4,16,8], index: 1, kind: input, shape index: {}]   ;;  %s6419_s2 = inlined_call_operand.vmem [shape: f32[1,8], index: 2, kind: input, shape index: {}]   ;;  %s6420_s3 = inlined_call_operand.vmem [shape: f32[8,32,8,8], index: 3, kind: output, shape index: {}]  }
   0x1   :  { %s4253_s14 = smov 0  }
   0x2 LB: > { %s25_s15 = sadd.s32 1, %s4220_s13  ;;  %p3497_p0 = scmp.ge.s32.totalorder %s4224_s14, 1  ;;  %s4224_s14 = sphi %s4253_s14, %s13_s14   ;;  %s4220_s13 = sphi %s4251_s13, %s6671_s13   ;;  %s4216_s12 = sphi %s4249_s12, %s6670_s12  }
   0x3   : > { %p27_p1 = scmp.ge.s32.totalorder %s25_s15, 2  ;;  %p170_p2 = scmp.lt.s32.totalorder %s4224_s14, 3 }
   0x5   : > { %s6673_s15 = smov (%p27_p1, %s25_s15), 0  ;;  %p171_p3 = pnand %p3497_p0, %p170_p2 }
   0x7   : > { %174 = sbr.rel (%p171_p3) target bundleno = 688 (0x2b0), region = 32 }
   0xc   : > { %s3498_s16 = sshll.u32 %s4216_s12, 2  ;;  %s4226_s21 = smov 8   ;;  %v4170_v40 = vld [vmem:[%s6418_s1] sm:$0xff]   ;;  %v4173_v46 = vld [vmem:[%s6418_s1 + $0x10] sm:$0xff]   ;;  %vm1044_vm0 = vcmask 31744   ;;  %vm1226_vm1 = vcmask 97280  }
   0xd   : > { %p207_p4 = scmp.lt.s32.totalorder %s3498_s16, 7  ;;  %s4227_s22 = smov 4   ;;  %3957 = vmatprep.subr.bf16.mxu0 %v4170_v40  ;;  %3991 = vmatprep.subr.bf16.mxu1 %v4173_v46  ;;  %vm1153_vm2 = vcmask 64512   ;;  %vm1393_vm3 = vcmask 130048   ;;  %vm2286_vm4 = vsmask.f32 3328 }
   0xe   : > { %3958 = vmatpush3.bf16.msra.mxu0 %v4170_v40  ;;  %3992 = vmatpush3.bf16.msra.mxu1 %v4173_v46  ;;  %s4228_s27 = smov 12   ;;  %vm2287_vm5 = vsmask.f32 7440 }
   0xf   : > { %s6675_s16 = smov (!%p207_p4, %s3498_s16), 7  ;;  %vm5466_vm6 = vmor %vm2286_vm4, %vm2287_vm5 }
  0x10   : > { %s4093_s17 = smul.u32 80, %s6675_s16  ;;  %s3888_s5 = sshll.u32 %s6675_s16, 8 }
  0x11   : > { %s5489_s10 = scalar_lea.vmem %s6420_s3, %s3888_s5 }
  0x12   : > { %s4273_s20 = scalar_lea.vmem %s6417_s0, %s4093_s17 }
  0x13   : > { %v4276_v0 = vld [vmem:[%s4273_s20 + $0x10] sm:$0xf]  ;;  %v236_v1 = vld [vmem:[%s4273_s20 + $0x14] sm:$0x1]  ;;  %v4280_v2 = vld [vmem:[%s4273_s20 + $0x8] sm:$0xf] }
  0x14   : > { %v3540_v3 = vcombine.low %v4276_v0, %v4276_v0  ;;  %v4285_v4 = vcombine.low %v4276_v0, %v236_v1  ;;  %v234_v5 = vld [vmem:[%s4273_s20 + $0xc] sm:$0x1]  ;;  %v3539_v6 = vcombine.low %v4280_v2, %v4280_v2  ;;  %v4291_v7 = vld [vmem:[%s4273_s20 + $0x20] sm:$0xf]  ;;  %v240_v9 = vld [vmem:[%s4273_s20 + $0x24] sm:$0x1] }
  0x15   : > { %v4294_v8 = vcombine.low %v4280_v2, %v234_v5  ;;  %v4298_v10 = vld [vmem:[%s4273_s20 + $0x18] sm:$0xf]  ;;  %v238_v11 = vld [vmem:[%s4273_s20 + $0x1c] sm:$0x1]  ;;  %v3542_v12 = vcombine.low %v4291_v7, %v4291_v7  ;;  %v4311_v15 = vld [vmem:[%s4273_s20 + $0x28] sm:$0xf]  ;;  %v4319_v19 = vcombine.low %v4291_v7, %v240_v9 }
  0x16   : > { %862 = vrot.lane.b32.xlu0 %v3540_v3, %s4226_s21  ;;  %860 = vrot.lane.b32.xlu1 %v3539_v6, %s4226_s21  ;;  %v4306_v13 = vcombine.low %v4298_v10, %v238_v11  ;;  %v3541_v14 = vcombine.low %v4298_v10, %v4298_v10  ;;  %v4314_v16 = vld [vmem:[%s4273_s20] sm:$0xf]  ;;  %v232_v17 = vld [vmem:[%s4273_s20 + $0x4] sm:$0x1]  ;;  %v509_v18 = vshll.u32 %v4285_v4, 16  ;;  %v3543_v22 = vcombine.low %v4311_v15, %v4311_v15 }
  0x17   : > { %v4322_v20 = vcombine.low %v4314_v16, %v232_v17  ;;  %v502_v21 = vshll.u32 %v4294_v8, 16  ;;  %v507_v23 = vshrl.u32 %v4285_v4, 16  ;;  %v500_v29 = vshrl.u32 %v4294_v8, 16  ;;  %v242_v36 = vld [vmem:[%s4273_s20 + $0x2c] sm:$0x1] }
  0x18   : > { %v511_v26 = vrot.slane %v509_v18, 1  ;;  %v516_v27 = vshll.u32 %v4306_v13, 16  ;;  %v523_v31 = vshll.u32 %v4319_v19, 16  ;;  %v514_v34 = vshrl.u32 %v4306_v13, 16  ;;  %v4348_v43 = vld [vmem:[%s4273_s20 + $0x38] sm:$0xf] }
  0x19   : > { %6507 = vst [vmem:[#allocation2_spill] sm:$0xff] %v4322_v20  ;;  %v493_v24 = vshrl.u32 %v4322_v20, 16  ;;  %v495_v25 = vshll.u32 %v4322_v20, 16  ;;  %v504_v30 = vrot.slane %v502_v21, 1  ;;  %v521_v38 = vshrl.u32 %v4319_v19, 16 }
  0x1a   : > { %866 = vrot.lane.b32.xlu0 %v3542_v12, %s4226_s21  ;;  %864 = vrot.lane.b32.xlu1 %v3541_v14, %s4226_s21  ;;  %v512_v33 = vor.u32 %v511_v26, %v507_v23  ;;  %v518_v35 = vrot.slane %v516_v27, 1  ;;  %v525_v39 = vrot.slane %v523_v31, 1  ;;  %v4344_v41 = vcombine.low %v4311_v15, %v242_v36  ;;  %v246_v44 = vld [vmem:[%s4273_s20 + $0x3c] sm:$0x1]  ;;  %v4356_v47 = vld [vmem:[%s4273_s20 + $0x30] sm:$0xf] }
  0x1b   : > { %v497_v28 = vrot.slane %v495_v25, 1  ;;  %v505_v37 = vor.u32 %v504_v30, %v500_v29  ;;  %v244_v48 = vld [vmem:[%s4273_s20 + $0x34] sm:$0x1]  ;;  %v4362_v50 = vcombine.low %v4348_v43, %v246_v44  ;;  %v4369_v52 = vld [vmem:[%s4273_s20 + $0x40] sm:$0xf]  ;;  %v3544_v11 = vcombine.low %v4356_v47, %v4356_v47 }
  0x1c   : > { %v519_v42 = vor.u32 %v518_v35, %v514_v34  ;;  %v526_v45 = vor.u32 %v525_v39, %v521_v38  ;;  %v530_v49 = vshll.u32 %v4344_v41, 16  ;;  %v4366_v51 = vcombine.low %v4356_v47, %v244_v48  ;;  %v248_v53 = vld [vmem:[%s4273_s20 + $0x44] sm:$0x1]  ;;  %v4392_v12 = vld [vmem:[%s4273_s20 + $0x50] sm:$0xf] }
  0x1d   : > { %v498_v32 = vor.u32 %v497_v28, %v493_v24  ;;  %v528_v54 = vshrl.u32 %v4344_v41, 16  ;;  %v544_v56 = vshll.u32 %v4362_v50, 16  ;;  %v4378_v58 = vcombine.low %v4369_v52, %v248_v53  ;;  %v252_v14 = vld [vmem:[%s4273_s20 + $0x54] sm:$0x1]  ;;  %v250_v18 = vld [vmem:[%s4273_s20 + $0x4c] sm:$0x1] }
  0x1e   : > { %868 = vrot.lane.b32.xlu1 %v3543_v22, %s4226_s21  ;;  %v532_v55 = vrot.slane %v530_v49, 1  ;;  %v537_v57 = vshll.u32 %v4366_v51, 16  ;;  %v542_v60 = vshrl.u32 %v4362_v50, 16  ;;  %v535_v62 = vshrl.u32 %v4366_v51, 16  ;;  %v249_v23 = vld [vmem:[%s4273_s20 + $0x48] sm:$0xf] }
  0x1f   : > { %744 = vrot.lane.b32.xlu0 %v498_v32, %s4227_s22  ;;  %v546_v61 = vrot.slane %v544_v56, 1  ;;  %v551_v1 = vshll.u32 %v4378_v58, 16  ;;  %v549_v6 = vshrl.u32 %v4378_v58, 16  ;;  %v3546_v21 = vcombine.low %v4369_v52, %v4369_v52  ;;  %v4405_v24 = vld [vmem:[%s4273_s20 + $0x60] sm:$0xf] }
  0x20   : > { %v533_v59 = vor.u32 %v532_v55, %v528_v54  ;;  %v539_v63 = vrot.slane %v537_v57, 1  ;;  %v4401_v22 = vcombine.low %v4392_v12, %v252_v14  ;;  %v256_v25 = vld [vmem:[%s4273_s20 + $0x64] sm:$0x1]  ;;  %v3545_v26 = vcombine.low %v4348_v43, %v4348_v43  ;;  %v4414_v28 = vld [vmem:[%s4273_s20 + $0x58] sm:$0xf] }
  0x21   : > { %v547_v3 = vor.u32 %v546_v61, %v542_v60  ;;  %v553_v9 = vrot.slane %v551_v1, 1  ;;  %v4411_v27 = vcombine.low %v249_v23, %v250_v18  ;;  %v254_v29 = vld [vmem:[%s4273_s20 + $0x5c] sm:$0x1]  ;;  %v4420_v31 = vcombine.low %v4405_v24, %v256_v25  ;;  %v4423_v32 = vld [vmem:[%s4273_s20 + $0x70] sm:$0xf] }
  0x22   : > { %748 = vrot.lane.b32.xlu1 %v512_v33, %s4227_s22  ;;  %v540_v5 = vor.u32 %v539_v63, %v535_v62  ;;  %6508 = vst [vmem:[#allocation3_spill] sm:$0xff] %v4401_v22  ;;  %v558_v30 = vshll.u32 %v4401_v22, 16  ;;  %v3547_v34 = vcombine.low %v249_v23, %v249_v23  ;;  %v4429_v36 = vcombine.low %v4414_v28, %v254_v29  ;;  %v258_v38 = vld [vmem:[%s4273_s20 + $0x6c] sm:$0x1]  ;;  %v264_v29 = vld [vmem:[%s4273_s20 + $0x84] sm:$0x1] }
  0x23   : > { %746 = vrot.lane.b32.xlu0 %v505_v37, %s4227_s22  ;;  %v554_v17 = vor.u32 %v553_v9, %v549_v6  ;;  %v947_v35 = vshll.u32 %v4411_v27, 16  ;;  %v556_v39 = vshrl.u32 %v4401_v22, 16  ;;  %v570_v54 = vshrl.u32 %v4420_v31, 16  ;;  %v4620_v20 = vld [vmem:[%s4273_s20 + $0xd0] sm:$0xf] }
  0x24   : > { %v560_v40 = vrot.slane %v558_v30, 1  ;;  %v565_v48 = vshll.u32 %v4429_v36, 16  ;;  %v3549_v14 = vcombine.low %v4405_v24, %v4405_v24  ;;  %v3548_v18 = vcombine.low %v4414_v28, %v4414_v28  ;;  %6523 = vst [vmem:[#allocation18_spill] sm:$0xff] %v4620_v20 }
  0x25   : > { %v949_v46 = vrot.slane %v947_v35, 1  ;;  %v3551_v23 = vcombine.low %v4423_v32, %v4423_v32  ;;  %v4488_v35 = vld [vmem:[%s4273_s20 + $0x90] sm:$0xf] }
  0x26   : > { %750 = vrot.lane.b32.xlu1 %v519_v42, %s4227_s22  ;;  %v561_v53 = vor.u32 %v560_v40, %v556_v39  ;;  %v567_v60 = vrot.slane %v565_v48, 1  ;;  %v4495_v40 = vld [vmem:[%s4273_s20 + $0x88] sm:$0xf] }
  0x27   : > { %752 = vrot.lane.b32.xlu0 %v526_v45, %s4227_s22 }
  0x2a   : > { %974 = vrot.lane.b32.xlu1 %v512_v33, %s4228_s27  ;;  %v260_v33 = vld [vmem:[%s4273_s20 + $0x74] sm:$0x1] }
  0x2b   : > { %972 = vrot.lane.b32.xlu0 %v505_v37, %s4228_s27  ;;  %v4432_v37 = vld [vmem:[%s4273_s20 + $0x68] sm:$0xf]  ;;  %v4439_v44 = vcombine.low %v4423_v32, %v260_v33 }
  0x2c   : > { %v4445_v49 = vcombine.low %v4432_v37, %v258_v38  ;;  %v3550_v30 = vcombine.low %v4432_v37, %v4432_v37  ;;  %v268_v38 = vld [vmem:[%s4273_s20 + $0x94] sm:$0x1] }
  0x2d   : > { %v586_v56 = vshll.u32 %v4439_v44, 16  ;;  %v584_v63 = vshrl.u32 %v4439_v44, 16 }
  0x2e   : > { %978 = vrot.lane.b32.xlu1 %v526_v45, %s4228_s27  ;;  %v945_v45 = vshrl.u32 %v4411_v27, 16  ;;  %v579_v61 = vshll.u32 %v4445_v49, 16 }
  0x2f   : > { %976 = vrot.lane.b32.xlu0 %v519_v42, %s4228_s27  ;;  %v572_v42 = vshll.u32 %v4420_v31, 16  ;;  %v588_v1 = vrot.slane %v586_v56, 1 }
  0x30   : > { %v950_v57 = vor.u32 %v949_v46, %v945_v45  ;;  %v581_v6 = vrot.slane %v579_v61, 1 }
  0x31   : > { %v574_v55 = vrot.slane %v572_v42, 1  ;;  %v589_v9 = vor.u32 %v588_v1, %v584_v63  ;;  %v266_v42 = vld [vmem:[%s4273_s20 + $0x8c] sm:$0x1] }
  0x32   : > { %754 = vrot.lane.b32.xlu1 %v533_v59, %s4227_s22 }
  0x33   : > { %980 = vrot.lane.b32.xlu0 %v533_v59, %s4228_s27  ;;  %v563_v59 = vshrl.u32 %v4429_v36, 16  ;;  %v575_v62 = vor.u32 %v574_v55, %v570_v54  ;;  %v4506_v54 = vcombine.low %v4495_v40, %v266_v42 }
  0x35   : > { %6511 = vst [vmem:[#allocation6_spill] sm:$0xff] %v4506_v54 }
  0x36   : > { %758 = vrot.lane.b32.xlu1 %v547_v3, %s4227_s22 }
  0x37   : > { %756 = vrot.lane.b32.xlu0 %v540_v5, %s4227_s22 }
  0x3a   : > { %870 = vrot.lane.b32.xlu1 %v3544_v11, %s4226_s21 }
  0x3b   : > { %760 = vrot.lane.b32.xlu0 %v554_v17, %s4227_s22 }
  0x3e   : > { %874 = vrot.lane.b32.xlu1 %v3546_v21, %s4226_s21  ;;  %v4467_v21 = vld [vmem:[%s4273_s20 + $0x78] sm:$0xf] }
  0x3f   : > { %872 = vrot.lane.b32.xlu0 %v3545_v26, %s4226_s21  ;;  %v4476_v26 = vld [vmem:[%s4273_s20 + $0x80] sm:$0xf]  ;;  %v3552_v39 = vcombine.low %v4467_v21, %v4467_v21 }
  0x42   : > { %982 = vrot.lane.b32.xlu1 %v540_v5, %s4228_s27  ;;  %v568_v5 = vor.u32 %v567_v60, %v563_v59  ;;  %v607_v60 = vshll.u32 %v4506_v54, 16 }
  0x43   : > { %876 = vrot.lane.b32.xlu0 %v3547_v34, %s4226_s21  ;;  %v4485_v34 = vcombine.low %v4476_v26, %v264_v29  ;;  %v3553_v29 = vcombine.low %v4476_v26, %v4476_v26 }
  0x45   : > { %6509 = vst [vmem:[#allocation4_spill] sm:$0xff] %v4485_v34  ;;  %v600_v48 = vshll.u32 %v4485_v34, 16  ;;  %v598_v56 = vshrl.u32 %v4485_v34, 16 }
  0x46   : > { %986 = vrot.lane.b32.xlu1 %v554_v17, %s4228_s27  ;;  %v262_v17 = vld [vmem:[%s4273_s20 + $0x7c] sm:$0x1] }
  0x47   : > { %984 = vrot.lane.b32.xlu0 %v547_v3, %s4228_s27  ;;  %v577_v3 = vshrl.u32 %v4445_v49, 16  ;;  %v4473_v25 = vcombine.low %v4467_v21, %v262_v17 }
  0x49   : > { %v582_v11 = vor.u32 %v581_v6, %v577_v3  ;;  %v593_v33 = vshll.u32 %v4473_v25, 16  ;;  %v591_v45 = vshrl.u32 %v4473_v25, 16  ;;  %v609_v3 = vrot.slane %v607_v60, 1  ;;  %v270_v6 = vld [vmem:[%s4273_s20 + $0x9c] sm:$0x1] }
  0x4a   : > { %762 = vrot.lane.b32.xlu1 %v561_v53, %s4227_s22  ;;  %v4502_v53 = vcombine.low %v4488_v35, %v268_v38 }
  0x4b   : > { %988 = vrot.lane.b32.xlu0 %v950_v57, %s4228_s27  ;;  %v595_v46 = vrot.slane %v593_v33, 1  ;;  %v602_v57 = vrot.slane %v600_v48, 1  ;;  %v272_v33 = vld [vmem:[%s4273_s20 + $0xa4] sm:$0x1]  ;;  %v3555_v48 = vcombine.low %v4488_v35, %v4488_v35 }
  0x4c   : > { %6510 = vst [vmem:[#allocation5_spill] sm:$0xff] %v4502_v53  ;;  %v614_v59 = vshll.u32 %v4502_v53, 16  ;;  %v612_v63 = vshrl.u32 %v4502_v53, 16 }
  0x4d   : > { %v596_v55 = vor.u32 %v595_v46, %v591_v45  ;;  %v603_v61 = vor.u32 %v602_v57, %v598_v56  ;;  %v4543_v45 = vld [vmem:[%s4273_s20 + $0xb8] sm:$0xf]  ;;  %v278_v46 = vld [vmem:[%s4273_s20 + $0xbc] sm:$0x1]  ;;  %v4553_v56 = vld [vmem:[%s4273_s20 + $0xb0] sm:$0xf] }
  0x4e   : > { %766 = vrot.lane.b32.xlu1 %v575_v62, %s4227_s22  ;;  %v616_v1 = vrot.slane %v614_v59, 1  ;;  %6515 = vst [vmem:[#allocation10_spill] sm:$0xff] %v4553_v56  ;;  %v276_v57 = vld [vmem:[%s4273_s20 + $0xb4] sm:$0x1] }
  0x4f   : > { %764 = vrot.lane.b32.xlu0 %v568_v5, %s4227_s22 }
  0x52   : > { %770 = vrot.lane.b32.xlu1 %v589_v9, %s4227_s22 }
  0x53   : > { %768 = vrot.lane.b32.xlu0 %v582_v11, %s4227_s22 }
  0x56   : > { %880 = vrot.lane.b32.xlu1 %v3549_v14, %s4226_s21  ;;  %v269_v14 = vld [vmem:[%s4273_s20 + $0x98] sm:$0xf] }
  0x57   : > { %878 = vrot.lane.b32.xlu0 %v3548_v18, %s4226_s21  ;;  %v4524_v17 = vcombine.low %v269_v14, %v270_v6  ;;  %v4527_v18 = vld [vmem:[%s4273_s20 + $0xa8] sm:$0xf]  ;;  %v3556_v38 = vcombine.low %v269_v14, %v269_v14  ;;  %v4568_v6 = vld [vmem:[%s4273_s20 + $0xc0] sm:$0xf]  ;;  %v280_v14 = vld [vmem:[%s4273_s20 + $0xc4] sm:$0x1] }
  0x58   : > { %6518 = vst [vmem:[#allocation13_spill] sm:$0xff] %v4568_v6  ;;  %v3560_v22 = vcombine.low %v4568_v6, %v4568_v6 }
  0x59   : > { %6512 = vst [vmem:[#allocation7_spill] sm:$0xff] %v4524_v17  ;;  %v952_v59 = vshrl.u32 %v4524_v17, 16 }
  0x5a   : > { %884 = vrot.lane.b32.xlu1 %v3551_v23, %s4226_s21  ;;  %v274_v23 = vld [vmem:[%s4273_s20 + $0xac] sm:$0x1] }
  0x5b   : > { %882 = vrot.lane.b32.xlu0 %v3550_v30, %s4226_s21  ;;  %v4534_v30 = vld [vmem:[%s4273_s20 + $0xa0] sm:$0xf]  ;;  %v4540_v42 = vcombine.low %v4527_v18, %v274_v23 }
  0x5d   : > { %6513 = vst [vmem:[#allocation8_spill] sm:$0xff] %v4540_v42  ;;  %v626_v23 = vshrl.u32 %v4540_v42, 16 }
  0x5e   : > { %990 = vrot.lane.b32.xlu1 %v568_v5, %s4228_s27  ;;  %v605_v5 = vshrl.u32 %v4506_v54, 16 }
  0x5f   : > { %886 = vrot.lane.b32.xlu0 %v3552_v39, %s4226_s21  ;;  %v954_v39 = vshll.u32 %v4524_v17, 16 }
  0x61   : > { %v956_v60 = vrot.slane %v954_v39, 1 }
  0x62   : > { %994 = vrot.lane.b32.xlu1 %v582_v11, %s4228_s27  ;;  %v610_v11 = vor.u32 %v609_v3, %v605_v5  ;;  %v4565_v3 = vcombine.low %v4553_v56, %v276_v57 }
  0x63   : > { %992 = vrot.lane.b32.xlu0 %v575_v62, %s4228_s27  ;;  %v617_v62 = vor.u32 %v616_v1, %v612_v63  ;;  %v628_v63 = vshll.u32 %v4540_v42, 16  ;;  %v4560_v1 = vcombine.low %v4543_v45, %v278_v46  ;;  %v4637_v42 = vld [vmem:[%s4273_s20 + $0xe0] sm:$0xf] }
  0x64   : > { %6517 = vst [vmem:[#allocation12_spill] sm:$0xff] %v4565_v3  ;;  %v635_v46 = vshll.u32 %v4565_v3, 16  ;;  %6528 = vst [vmem:[#allocation23_spill] sm:$0xff] %v4637_v42 }
  0x65   : > { %6516 = vst [vmem:[#allocation11_spill] sm:$0xff] %v4560_v1 }
  0x66   : > { %998 = vrot.lane.b32.xlu1 %v596_v55, %s4228_s27 }
  0x67   : > { %996 = vrot.lane.b32.xlu0 %v589_v9, %s4228_s27  ;;  %v3554_v9 = vcombine.low %v4495_v40, %v4495_v40 }
  0x6a   : > { %774 = vrot.lane.b32.xlu1 %v603_v61, %s4227_s22 }
  0x6b   : > { %772 = vrot.lane.b32.xlu0 %v596_v55, %s4227_s22  ;;  %v4550_v55 = vcombine.low %v4534_v30, %v272_v33  ;;  %v642_v33 = vshll.u32 %v4560_v1, 16 }
  0x6d   : > { %6514 = vst [vmem:[#allocation9_spill] sm:$0xff] %v4550_v55  ;;  %v621_v5 = vshll.u32 %v4550_v55, 16 }
  0x6e   : > { %778 = vrot.lane.b32.xlu1 %v617_v62, %s4227_s22 }
  0x6f   : > { %776 = vrot.lane.b32.xlu0 %v610_v11, %s4227_s22  ;;  %v623_v39 = vrot.slane %v621_v5, 1 }
  0x72   : > { %890 = vrot.lane.b32.xlu1 %v3554_v9, %s4226_s21  ;;  %v957_v9 = vor.u32 %v956_v60, %v952_v59  ;;  %v644_v59 = vrot.slane %v642_v33, 1 }
  0x73   : > { %888 = vrot.lane.b32.xlu0 %v3553_v29, %s4226_s21  ;;  %v630_v29 = vrot.slane %v628_v63, 1  ;;  %v633_v63 = vshrl.u32 %v4565_v3, 16  ;;  %v288_v3 = vld [vmem:[%s4273_s20 + $0xe4] sm:$0x1] }
  0x74   : > { %v4650_v17 = vcombine.low %v4637_v42, %v288_v3 }
  0x75   : > { %v631_v57 = vor.u32 %v630_v29, %v626_v23 }
  0x76   : > { %894 = vrot.lane.b32.xlu1 %v3556_v38, %s4226_s21  ;;  %v619_v38 = vshrl.u32 %v4550_v55, 16  ;;  %6531 = vst [vmem:[#allocation26_spill] sm:$0xff] %v4650_v17 }
  0x77   : > { %892 = vrot.lane.b32.xlu0 %v3555_v48, %s4226_s21  ;;  %v4578_v48 = vcombine.low %v4568_v6, %v280_v14 }
  0x78   : > { %v624_v60 = vor.u32 %v623_v39, %v619_v38 }
  0x79   : > { %6519 = vst [vmem:[#allocation14_spill] sm:$0xff] %v4578_v48  ;;  %v649_v5 = vshll.u32 %v4578_v48, 16  ;;  %v647_v23 = vshrl.u32 %v4578_v48, 16 }
  0x7a   : > { %1002 = vrot.lane.b32.xlu1 %v610_v11, %s4228_s27  ;;  %v640_v11 = vshrl.u32 %v4560_v1, 16 }
  0x7b   : > { %1000 = vrot.lane.b32.xlu0 %v603_v61, %s4228_s27  ;;  %v637_v61 = vrot.slane %v635_v46, 1  ;;  %v651_v29 = vrot.slane %v649_v5, 1  ;;  %v3559_v46 = vcombine.low %v4543_v45, %v4543_v45 }
  0x7c   : > { %v645_v14 = vor.u32 %v644_v59, %v640_v11  ;;  %v4596_v11 = vld [vmem:[%s4273_s20 + $0xc8] sm:$0xf]  ;;  %v282_v59 = vld [vmem:[%s4273_s20 + $0xcc] sm:$0x1] }
  0x7d   : > { %v652_v39 = vor.u32 %v651_v29, %v647_v23  ;;  %6520 = vst [vmem:[#allocation15_spill] sm:$0xff] %v4596_v11  ;;  %v4606_v5 = vcombine.low %v4596_v11, %v282_v59  ;;  %v3561_v23 = vcombine.low %v4596_v11, %v4596_v11  ;;  %v4611_v29 = vld [vmem:[%s4273_s20 + $0xd8] sm:$0xf] }
  0x7e   : > { %1006 = vrot.lane.b32.xlu1 %v957_v9, %s4228_s27  ;;  %v638_v9 = vor.u32 %v637_v61, %v633_v63  ;;  %v3558_v61 = vcombine.low %v4553_v56, %v4553_v56  ;;  %6522 = vst [vmem:[#allocation17_spill] sm:$0xff] %v4611_v29 }
  0x7f   : > { %1004 = vrot.lane.b32.xlu0 %v617_v62, %s4228_s27  ;;  %v3557_v62 = vcombine.low %v4527_v18, %v4527_v18  ;;  %6521 = vst [vmem:[#allocation16_spill] sm:$0xff] %v4606_v5  ;;  %v656_v11 = vshll.u32 %v4606_v5, 16 }
  0x81   : > { %v658_v53 = vrot.slane %v656_v11, 1 }
  0x82   : > { %782 = vrot.lane.b32.xlu1 %v631_v57, %s4227_s22 }
  0x83   : > { %780 = vrot.lane.b32.xlu0 %v624_v60, %s4227_s22 }
  0x86   : > { %786 = vrot.lane.b32.xlu1 %v645_v14, %s4227_s22 }
  0x87   : > { %784 = vrot.lane.b32.xlu0 %v638_v9, %s4227_s22 }
  0x88   : > { %v863_v33 = vpop.permute.xlu0 %862  ;;  %v861_v38 = vpop.permute.xlu1 %860 }
  0x8a   : > { %896 = vrot.lane.b32.xlu1 %v3557_v62, %s4226_s21  ;;  %v286_v62 = vld [vmem:[%s4273_s20 + $0xdc] sm:$0x1] }
  0x8b   : > { %788 = vrot.lane.b32.xlu0 %v652_v39, %s4227_s22  ;;  %v4628_v1 = vcombine.low %v4611_v29, %v286_v62 }
  0x8c   : > { %v867_v60 = vpop.permute.xlu0 %866  ;;  %v4600_v63 = vpop.permute.xlu1 %864 }
  0x8d   : > { %6525 = vst [vmem:[#allocation20_spill] sm:$0xff] %v4628_v1  ;;  %v670_v62 = vshll.u32 %v4628_v1, 16 }
  0x8e   : > { %900 = vrot.lane.b32.xlu1 %v3559_v46, %s4226_s21  ;;  %v284_v46 = vld [vmem:[%s4273_s20 + $0xd4] sm:$0x1] }
  0x8f   : > { %898 = vrot.lane.b32.xlu0 %v3558_v61, %s4226_s21  ;;  %v4634_v48 = vcombine.low %v4620_v20, %v284_v46 }
  0x90   : > { %v4615_v55 = vpop.permute.xlu1 %868 }
  0x91   : > { %v4623_v59 = vpop.permute.xlu0 %744  ;;  %6527 = vst [vmem:[#allocation22_spill] sm:$0xff] %v4634_v48  ;;  %v663_v46 = vshll.u32 %v4634_v48, 16 }
  0x92   : > { %6524 = vst [vmem:[#allocation19_spill] sm:$0xff] %v4623_v59  ;;  %904 = vrot.lane.b32.xlu1 %v3561_v23, %s4226_s21  ;;  %v654_v23 = vshrl.u32 %v4606_v5, 16  ;;  %v668_v5 = vshrl.u32 %v4628_v1, 16  ;;  %v1047_v34 = vsel %vm1044_vm0, %v4314_v16, %v4623_v59 }
  0x93   : > { %902 = vrot.lane.b32.xlu0 %v3560_v22, %s4226_s21  ;;  %v665_v54 = vrot.slane %v663_v46, 1 }
  0x94   : > { %v4631_v61 = vpop.permute.xlu1 %748  ;;  %v659_v11 = vor.u32 %v658_v53, %v654_v23  ;;  %v677_v53 = vshll.u32 %v4650_v17, 16 }
  0x95   : > { %6526 = vst [vmem:[#allocation21_spill] sm:$0xff] %v4631_v61  ;;  %v4640_v6 = vpop.permute.xlu0 %746 }
  0x96   : > { %6529 = vst [vmem:[#allocation24_spill] sm:$0xff] %v4640_v6  ;;  %1010 = vrot.lane.b32.xlu1 %v638_v9, %s4228_s27  ;;  %v1050_v56 = vsel %vm1044_vm0, %v4280_v2, %v4640_v6  ;;  %v661_v6 = vshrl.u32 %v4634_v48, 16 }
  0x97   : > { %1008 = vrot.lane.b32.xlu0 %v631_v57, %s4228_s27  ;;  %v672_v57 = vrot.slane %v670_v62, 1  ;;  %v1157_v2 = vsel %vm1153_vm2, %v1050_v56, %v863_v33  ;;  %v1053_v56 = vsel %vm1044_vm0, %v4276_v0, %v4631_v61  ;;  %v4760_v61 = vld [vmem:[%s4273_s20 + $0x110] sm:$0xf] }
  0x98   : > { %v4646_v22 = vpop.permute.xlu1 %750 }
  0x99   : > { %6530 = vst [vmem:[#allocation25_spill] sm:$0xff] %v4646_v22  ;;  %v4655_v9 = vpop.permute.xlu0 %752  ;;  %v4677_v62 = vor.u32 %v672_v57, %v668_v5  ;;  %v1159_v5 = vsel %vm1153_vm2, %v1053_v56, %v4600_v63  ;;  %v290_v56 = vld [vmem:[%s4273_s20 + $0xec] sm:$0x1] }
  0x9a   : > { %6532 = vst [vmem:[#allocation27_spill] sm:$0xff] %v4655_v9  ;;  %1014 = vrot.lane.b32.xlu1 %v652_v39, %s4228_s27  ;;  %v1056_v39 = vsel %vm1044_vm0, %v4298_v10, %v4646_v22  ;;  %v675_v10 = vshrl.u32 %v4650_v17, 16 }
  0x9b   : > { %1012 = vrot.lane.b32.xlu0 %v645_v14, %s4228_s27  ;;  %v1155_v14 = vsel %vm1153_vm2, %v1047_v34, %v861_v38  ;;  %v1161_v46 = vsel %vm1153_vm2, %v1056_v39, %v867_v60  ;;  %v666_v34 = vor.u32 %v665_v54, %v661_v6  ;;  %v679_v38 = vrot.slane %v677_v53, 1  ;;  %v4709_v39 = vld [vmem:[%s4273_s20 + $0xf0] sm:$0xf] }
  0x9c   : > { %v4663_v3 = vpop.permute.xlu1 %974  ;;  %v1059_v54 = vsel %vm1044_vm0, %v4291_v7, %v4655_v9  ;;  %v3562_v60 = vcombine.low %v4620_v20, %v4620_v20  ;;  %6537 = vst [vmem:[#allocation32_spill] sm:$0xff] %v4709_v39 }
  0x9d   : > { %6533 = vst [vmem:[#allocation28_spill] sm:$0xff] %v4663_v3  ;;  %v1230_v23 = vsel %vm1226_vm1, %v1157_v2, %v4663_v3  ;;  %v4673_v16 = vpop.permute.xlu0 %972  ;;  %v680_v53 = vor.u32 %v679_v38, %v675_v10  ;;  %v1163_v7 = vsel %vm1153_vm2, %v1059_v54, %v4615_v55  ;;  %v3564_v10 = vcombine.low %v4637_v42, %v4637_v42 }
  0x9e   : > { %6534 = vst [vmem:[#allocation29_spill] sm:$0xff] %v4673_v16  ;;  %790 = vrot.lane.b32.xlu1 %v659_v11, %s4227_s22  ;;  %v1228_v33 = vsel %vm1226_vm1, %v1155_v14, %v4673_v16  ;;  %v292_v14 = vld [vmem:[%s4273_s20 + $0xf4] sm:$0x1]  ;;  %v3563_v54 = vcombine.low %v4611_v29, %v4611_v29  ;;  %v4764_v16 = vld [vmem:[%s4273_s20 + $0x108] sm:$0xf] }
  0x9f   : > { %1016 = vrot.lane.b32.xlu0 %v659_v11, %s4228_s27  ;;  %v3580_v3 = vcombine.low %v1228_v33, %v1230_v23  ;;  %v4728_v38 = vcombine.low %v4709_v39, %v292_v14  ;;  %v294_v14 = vld [vmem:[%s4273_s20 + $0xfc] sm:$0x1] }
  0xa0   : > { %v4687_v2 = vpop.permute.xlu1 %978 }
  0xa1   : > { %6535 = vst [vmem:[#allocation30_spill] sm:$0xff] %v4687_v2  ;;  %v1234_v0 = vsel %vm1226_vm1, %v1161_v46, %v4687_v2  ;;  %3959 = vmatprep.mubr.msk.bf16.mxu0 %vm1393_vm3, %v3580_v3  ;;  %v4694_v57 = vpop.permute.xlu0 %976  ;;  %v289_v46 = vld [vmem:[%s4273_s20 + $0xe8] sm:$0xf]  ;;  %6539 = vst [vmem:[#allocation34_spill] sm:$0xff] %v4728_v38 }
  0xa2   : > { %6536 = vst [vmem:[#allocation31_spill] sm:$0xff] %v4694_v57  ;;  %794 = vrot.lane.b32.xlu1 %v4677_v62, %s4227_s22  ;;  %v1232_v6 = vsel %vm1226_vm1, %v1159_v5, %v4694_v57  ;;  %v3565_v57 = vcombine.low %v289_v46, %v289_v46 }
  0xa3   : > { %v3581_v11 = vcombine.low %v1232_v6, %v1234_v0  ;;  %792 = vrot.lane.b32.xlu0 %v666_v34, %s4227_s22  ;;  %v3615_v3 = vcombine.low %v1230_v23, %v1232_v6  ;;  %v4736_v6 = vcombine.low %v289_v46, %v290_v56 }
  0xa4   : > { %v4706_v63 = vpop.permute.xlu1 %754 }
  0xa5   : > { %3960 = vmatmul.mubr.msk.bf16.vlgmr.msra.gmra.mxu0 %vm1393_vm3, %v3581_v11  ;;  %3993 = vmatprep.mubr.msk.bf16.mxu1 %vm1393_vm3, %v3615_v3  ;;  %v4717_v33 = vpop.permute.xlu0 %980  ;;  %6540 = vst [vmem:[#allocation35_spill] sm:$0xff] %v4736_v6  ;;  %v296_v11 = vld [vmem:[%s4273_s20 + $0x104] sm:$0x1]  ;;  %v4743_v3 = vld [vmem:[%s4273_s20 + $0xf8] sm:$0xf]  ;;  %v961_v2 = vshll.u32 %v4736_v6, 16 }
  0xa6   : > { %6538 = vst [vmem:[#allocation33_spill] sm:$0xff] %v4717_v33  ;;  %v4721_v23 = vsel %vm1226_vm1, %v1163_v7, %v4717_v33  ;;  %906 = vrot.lane.b32.xlu1 %v3562_v60, %s4226_s21  ;;  %v4739_v60 = vld [vmem:[%s4273_s20 + $0x100] sm:$0xf]  ;;  %v684_v7 = vshll.u32 %v4728_v38, 16  ;;  %v4757_v9 = vcombine.low %v4743_v3, %v294_v14  ;;  %v959_v39 = vshrl.u32 %v4736_v6, 16 }
  0xa7   : > { %v3616_v5 = vcombine.low %v1234_v0, %v4721_v23  ;;  %796 = vrot.lane.b32.xlu0 %v680_v53, %s4227_s22  ;;  %v4752_v56 = vcombine.low %v4739_v60, %v296_v11  ;;  %v682_v11 = vshrl.u32 %v4728_v38, 16  ;;  %v963_v42 = vrot.slane %v961_v2, 1 }
  0xa8   : > { %v4732_v55 = vpop.permute.xlu1 %758  ;;  %6542 = vst [vmem:[#allocation37_spill] sm:$0xff] %v4757_v9  ;;  %v691_v20 = vshll.u32 %v4757_v9, 16 }
  0xa9   : > { %3994 = vmatmul.mubr.msk.bf16.vlgmr.msra.gmra.mxu1 %vm1393_vm3, %v3616_v5  ;;  %v4747_v0 = vpop.permute.xlu0 %756  ;;  %6541 = vst [vmem:[#allocation36_spill] sm:$0xff] %v4752_v56  ;;  %v300_v5 = vld [vmem:[%s4273_s20 + $0x114] sm:$0x1]  ;;  %v698_v46 = vshll.u32 %v4752_v56, 16  ;;  %v696_v38 = vshrl.u32 %v4752_v56, 16  ;;  %v964_v56 = vor.u32 %v963_v42, %v959_v39 }
  0xaa   : > { %910 = vrot.lane.b32.xlu1 %v3564_v10, %s4226_s21  ;;  %v298_v10 = vld [vmem:[%s4273_s20 + $0x10c] sm:$0x1]  ;;  %v4773_v59 = vcombine.low %v4760_v61, %v300_v5  ;;  %v1062_v5 = vsel %vm1044_vm0, %v4311_v15, %v4706_v63  ;;  %v693_v17 = vrot.slane %v691_v20, 1 }
  0xab   : > { %908 = vrot.lane.b32.xlu0 %v3563_v54, %s4226_s21  ;;  %v686_v54 = vrot.slane %v684_v7, 1  ;;  %v4779_v29 = vcombine.low %v4764_v16, %v298_v10  ;;  %v689_v7 = vshrl.u32 %v4757_v9, 16  ;;  %v700_v1 = vrot.slane %v698_v46, 1 }
  0xac   : > { %v871_v33 = vpop.permute.xlu1 %870  ;;  %6543 = vst [vmem:[#allocation38_spill] sm:$0xff] %v4773_v59  ;;  %v712_v2 = vshll.u32 %v4773_v59, 16 }
  0xad   : > { %v4767_v22 = vpop.permute.xlu0 %760  ;;  %6544 = vst [vmem:[#allocation39_spill] sm:$0xff] %v4779_v29  ;;  %v1165_v6 = vsel %vm1153_vm2, %v1062_v5, %v871_v33  ;;  %v705_v9 = vshll.u32 %v4779_v29, 16  ;;  %v4801_v33 = vor.u32 %v700_v1, %v696_v38 }
  0xae   : > { %1018 = vrot.lane.b32.xlu1 %v666_v34, %s4228_s27  ;;  %v714_v42 = vrot.slane %v712_v2, 1  ;;  %v1071_v2 = vsel %vm1044_vm0, %v4369_v52, %v4767_v22 }
  0xaf   : > { %912 = vrot.lane.b32.xlu0 %v3565_v57, %s4226_s21  ;;  %v687_v57 = vor.u32 %v686_v54, %v682_v11  ;;  %v1068_v54 = vsel %vm1044_vm0, %v4348_v43, %v4732_v55  ;;  %v707_v46 = vrot.slane %v705_v9, 1  ;;  %v1065_v43 = vsel %vm1044_vm0, %v4356_v47, %v4747_v0  ;;  %v4199_v9 = vld [vmem:[%s6418_s1 + $0x8] sm:$0xff]   ;;  %v4200_v47 = vld [vmem:[%s6418_s1 + $0x18] sm:$0xff]  }
  0xb0   : > { %v875_v14 = vpop.permute.xlu1 %874  ;;  %4025 = vmatprep.subr.bf16.mxu0 %v4199_v9  ;;  %4059 = vmatprep.subr.bf16.mxu1 %v4200_v47 }
  0xb1   : > { %v873_v34 = vpop.permute.xlu0 %872  ;;  %v1169_v20 = vsel %vm1153_vm2, %v1068_v54, %v875_v14  ;;  %4026 = vmatpush3.bf16.msra.mxu0 %v4199_v9  ;;  %4060 = vmatpush3.bf16.msra.mxu1 %v4200_v47 }
  0xb2   : > { %1022 = vrot.lane.b32.xlu1 %v680_v53, %s4228_s27  ;;  %v1167_v38 = vsel %vm1153_vm2, %v1065_v43, %v873_v34  ;;  %v3569_v43 = vcombine.low %v4760_v61, %v4760_v61 }
  0xb3   : > { %1020 = vrot.lane.b32.xlu0 %v4677_v62, %s4228_s27  ;;  %v710_v62 = vshrl.u32 %v4773_v59, 16 }
  0xb4   : > { %v4791_v10 = vpop.permute.xlu1 %982 }
  0xb5   : > { %6545 = vst [vmem:[#allocation40_spill] sm:$0xff] %v4791_v10  ;;  %v1238_v15 = vsel %vm1226_vm1, %v1165_v6, %v4791_v10  ;;  %v877_v11 = vpop.permute.xlu0 %876  ;;  %v703_v6 = vshrl.u32 %v4779_v29, 16 }
  0xb6   : > { %v3582_v53 = vcombine.low %v4721_v23, %v1238_v15  ;;  %798 = vrot.lane.b32.xlu1 %v687_v57, %s4227_s22  ;;  %v694_v23 = vor.u32 %v693_v17, %v689_v7  ;;  %v715_v17 = vor.u32 %v714_v42, %v710_v62  ;;  %v3567_v62 = vcombine.low %v4739_v60, %v4739_v60 }
  0xb7   : > { %1024 = vrot.lane.b32.xlu0 %v964_v56, %s4228_s27  ;;  %v708_v57 = vor.u32 %v707_v46, %v703_v6  ;;  %v3566_v42 = vcombine.low %v4743_v3, %v4743_v3  ;;  %v4854_v46 = vld [vmem:[%s4273_s20 + $0x118] sm:$0xf] }
  0xb8   : > { %v4806_v39 = vpop.permute.xlu1 %986  ;;  %3963 = vmatprep.mubr.msk.bf16.mxu0 %vm1393_vm3, %v3582_v53  ;;  %v1171_v53 = vsel %vm1153_vm2, %v1071_v2, %v877_v11  ;;  %6549 = vst [vmem:[#allocation44_spill] sm:$0xff] %v4854_v46 }
  0xb9   : > { %6546 = vst [vmem:[#allocation41_spill] sm:$0xff] %v4806_v39  ;;  %v1242_v1 = vsel %vm1226_vm1, %v1169_v20, %v4806_v39  ;;  %v4816_v14 = vpop.permute.xlu0 %984  ;;  %v302_v20 = vld [vmem:[%s4273_s20 + $0x11c] sm:$0x1]  ;;  %v4913_v39 = vld [vmem:[%s4273_s20 + $0x130] sm:$0xf] }
  0xba   : > { %6547 = vst [vmem:[#allocation42_spill] sm:$0xff] %v4816_v14  ;;  %v1240_v56 = vsel %vm1226_vm1, %v1167_v38, %v4816_v14  ;;  %802 = vrot.lane.b32.xlu1 %v4801_v33, %s4227_s22  ;;  %6557 = vst [vmem:[#allocation52_spill] sm:$0xff] %v4913_v39 }
  0xbb   : > { %v3583_v7 = vcombine.low %v1240_v56, %v1242_v1  ;;  %v3617_v5 = vcombine.low %v1238_v15, %v1240_v56  ;;  %800 = vrot.lane.b32.xlu0 %v694_v23, %s4227_s22  ;;  %v3568_v56 = vcombine.low %v4764_v16, %v4764_v16 }
  0xbc   : > { %v4829_v34 = vpop.permute.xlu1 %762 }
  0xbd   : > { %3964 = vmatmul.mubr.msk.bf16.gmra.mxu0 %vm1393_vm3, %v3583_v7  ;;  %3997 = vmatprep.mubr.msk.bf16.mxu1 %vm1393_vm3, %v3617_v5  ;;  %v4837_v15 = vpop.permute.xlu0 %988  ;;  %v3570_v5 = vcombine.low %v4854_v46, %v4854_v46 }
  0xbe   : > { %6548 = vst [vmem:[#allocation43_spill] sm:$0xff] %v4837_v15  ;;  %v1244_v54 = vsel %vm1226_vm1, %v1171_v53, %v4837_v15  ;;  %806 = vrot.lane.b32.xlu1 %v715_v17, %s4227_s22 }
  0xbf   : > { %v3618_v52 = vcombine.low %v1242_v1, %v1244_v54  ;;  %804 = vrot.lane.b32.xlu0 %v708_v57, %s4227_s22  ;;  %v4860_v1 = vcombine.low %v4854_v46, %v302_v20  ;;  %v4879_v20 = vld [vmem:[%s4273_s20 + $0x128] sm:$0xf] }
  0xc0   : > { %v4845_v11 = vpop.permute.xlu1 %766  ;;  %6551 = vst [vmem:[#allocation46_spill] sm:$0xff] %v4879_v20 }
  0xc1   : > { %3998 = vmatmul.mubr.msk.bf16.gmra.mxu1 %vm1393_vm3, %v3618_v52  ;;  %v4851_v6 = vpop.permute.xlu0 %764  ;;  %6550 = vst [vmem:[#allocation45_spill] sm:$0xff] %v4860_v1  ;;  %v719_v47 = vshll.u32 %v4860_v1, 16  ;;  %v717_v53 = vshrl.u32 %v4860_v1, 16 }
  0xc2   : > { %916 = vrot.lane.b32.xlu1 %v3567_v62, %s4226_s21  ;;  %v1077_v14 = vsel %vm1044_vm0, %v4414_v28, %v4851_v6 }
  0xc3   : > { %914 = vrot.lane.b32.xlu0 %v3566_v42, %s4226_s21  ;;  %v721_v54 = vrot.slane %v719_v47, 1  ;;  %v304_v47 = vld [vmem:[%s4273_s20 + $0x124] sm:$0x1] }
  0xc4   : > { %v4863_v38 = vpop.permute.xlu1 %770 }
  0xc5   : > { %v4867_v9 = vpop.permute.xlu0 %768  ;;  %v722_v42 = vor.u32 %v721_v54, %v717_v53 }
  0xc6   : > { %920 = vrot.lane.b32.xlu1 %v3569_v43, %s4226_s21  ;;  %v306_v43 = vld [vmem:[%s4273_s20 + $0x12c] sm:$0x1] }
  0xc7   : > { %918 = vrot.lane.b32.xlu0 %v3568_v56, %s4226_s21 }
  0xc8   : > { %v881_v7 = vpop.permute.xlu1 %880 }
  0xc9   : > { %v879_v2 = vpop.permute.xlu0 %878 }
  0xca   : > { %1026 = vrot.lane.b32.xlu1 %v694_v23, %s4228_s27  ;;  %v4887_v23 = vld [vmem:[%s4273_s20 + $0x120] sm:$0xf] }
  0xcb   : > { %922 = vrot.lane.b32.xlu0 %v3570_v5, %s4226_s21  ;;  %6553 = vst [vmem:[#allocation48_spill] sm:$0xff] %v4887_v23  ;;  %v4891_v5 = vcombine.low %v4879_v20, %v306_v43  ;;  %v4898_v53 = vcombine.low %v4887_v23, %v304_v47  ;;  %v1074_v43 = vsel %vm1044_vm0, %v4392_v12, %v4829_v34  ;;  %v308_v47 = vld [vmem:[%s4273_s20 + $0x134] sm:$0x1] }
  0xcc   : > { %v885_v62 = vpop.permute.xlu1 %884  ;;  %v1086_v12 = vsel %vm1044_vm0, %v4423_v32, %v4863_v38  ;;  %v4937_v32 = vcombine.low %v4913_v39, %v308_v47 }
  0xcd   : > { %v883_v52 = vpop.permute.xlu0 %882  ;;  %6554 = vst [vmem:[#allocation49_spill] sm:$0xff] %v4891_v5  ;;  %6555 = vst [vmem:[#allocation50_spill] sm:$0xff] %v4898_v53  ;;  %v733_v10 = vshll.u32 %v4891_v5, 16 }
  0xce   : > { %1030 = vrot.lane.b32.xlu1 %v708_v57, %s4228_s27  ;;  %v1080_v57 = vsel %vm1044_vm0, %v4405_v24, %v4845_v11  ;;  %6560 = vst [vmem:[#allocation55_spill] sm:$0xff] %v4937_v32 }
  0xcf   : > { %1028 = vrot.lane.b32.xlu0 %v4801_v33, %s4228_s27  ;;  %v1177_v33 = vsel %vm1153_vm2, %v1080_v57, %v883_v52  ;;  %v1175_v52 = vsel %vm1153_vm2, %v1077_v14, %v881_v7  ;;  %v726_v14 = vshll.u32 %v4898_v53, 16 }
  0xd0   : > { %v4884_v56 = vpop.permute.xlu1 %990 }
  0xd1   : > { %6552 = vst [vmem:[#allocation47_spill] sm:$0xff] %v4884_v56  ;;  %v887_v15 = vpop.permute.xlu0 %886 }
  0xd2   : > { %1034 = vrot.lane.b32.xlu1 %v722_v42, %s4228_s27  ;;  %v1181_v7 = vsel %vm1153_vm2, %v1086_v12, %v887_v15 }
  0xd3   : > { %1032 = vrot.lane.b32.xlu0 %v715_v17, %s4228_s27  ;;  %v1173_v17 = vsel %vm1153_vm2, %v1074_v43, %v879_v2 }
  0xd4   : > { %v4902_v54 = vpop.permute.xlu1 %994  ;;  %v1246_v28 = vsel %vm1226_vm1, %v1173_v17, %v4884_v56 }
  0xd5   : > { %6556 = vst [vmem:[#allocation51_spill] sm:$0xff] %v4902_v54  ;;  %v1250_v24 = vsel %vm1226_vm1, %v1177_v33, %v4902_v54  ;;  %v4918_v57 = vpop.permute.xlu0 %992 }
  0xd6   : > { %6558 = vst [vmem:[#allocation53_spill] sm:$0xff] %v4918_v57  ;;  %v1248_v33 = vsel %vm1226_vm1, %v1175_v52, %v4918_v57  ;;  %1912 = vrot.lane.b32.xlu1 %v4285_v4, %s4226_s21  ;;  %v1083_v52 = vsel %vm1044_vm0, %v4432_v37, %v4867_v9  ;;  %v731_v37 = vshrl.u32 %v4891_v5, 16  ;;  %v3572_v57 = vcombine.low %v4879_v20, %v4879_v20 }
  0xd7   : > { %v3584_v2 = vcombine.low %v1246_v28, %v1248_v33  ;;  %v3619_v43 = vcombine.low %v1248_v33, %v1250_v24  ;;  %1910 = vrot.lane.b32.xlu0 %v4294_v8, %s4226_s21  ;;  %v1179_v15 = vsel %vm1153_vm2, %v1083_v52, %v885_v62  ;;  %v735_v28 = vrot.slane %v733_v10, 1 }
  0xd8   : > { %v4934_v54 = vpop.permute.xlu1 %998  ;;  %v724_v33 = vshrl.u32 %v4898_v53, 16  ;;  %v740_v52 = vshll.u32 %v4937_v32, 16 }
  0xd9   : > { %6559 = vst [vmem:[#allocation54_spill] sm:$0xff] %v4934_v54  ;;  %v4944_v17 = vsel %vm1226_vm1, %v1181_v7, %v4934_v54  ;;  %3967 = vmatprep.mubr.msk.bf16.mxu0 %vm1393_vm3, %v3584_v2  ;;  %4001 = vmatprep.mubr.msk.bf16.mxu1 %vm1393_vm3, %v3619_v43  ;;  %v4949_v12 = vpop.permute.xlu0 %996  ;;  %v728_v43 = vrot.slane %v726_v14, 1  ;;  %v736_v10 = vor.u32 %v735_v28, %v731_v37  ;;  %v738_v14 = vshrl.u32 %v4937_v32, 16  ;;  %v310_v28 = vld [vmem:[%s4273_s20 + $0x13c] sm:$0x1] }
  0xda   : > { %6561 = vst [vmem:[#allocation56_spill] sm:$0xff] %v4949_v12  ;;  %v1252_v47 = vsel %vm1226_vm1, %v1179_v15, %v4949_v12  ;;  %1916 = vrot.lane.b32.xlu1 %v4319_v19, %s4226_s21  ;;  %v742_v12 = vrot.slane %v740_v52, 1 }
  0xdb   : > { %v3585_v7 = vcombine.low %v1250_v24, %v1252_v47  ;;  %v3620_v62 = vcombine.low %v1252_v47, %v4944_v17  ;;  %1914 = vrot.lane.b32.xlu0 %v4306_v13, %s4226_s21  ;;  %v729_v47 = vor.u32 %v728_v43, %v724_v33  ;;  %v3573_v33 = vcombine.low %v4913_v39, %v4913_v39  ;;  %v309_v43 = vld [vmem:[%s4273_s20 + $0x138] sm:$0xf] }
  0xdc   : > { %v4960_v2 = vpop.permute.xlu1 %774  ;;  %v743_v37 = vor.u32 %v742_v12, %v738_v14  ;;  %v4987_v56 = vcombine.low %v309_v43, %v310_v28  ;;  %v3574_v39 = vcombine.low %v309_v43, %v309_v43 }
  0xdd   : > { %6562 = vst [vmem:[#allocation57_spill] sm:$0xff] %v4960_v2  ;;  %3968 = vmatmul.mubr.msk.bf16.gmra.mxu0 %vm1393_vm3, %v3585_v7  ;;  %4002 = vmatmul.mubr.msk.bf16.gmra.mxu1 %vm1393_vm3, %v3620_v62  ;;  %v4965_v15 = vpop.permute.xlu0 %772  ;;  %v3571_v7 = vcombine.low %v4887_v23, %v4887_v23  ;;  %v1092_v12 = vsel %vm1044_vm0, %v4476_v26, %v4960_v2 }
  0xde   : > { %808 = vrot.lane.b32.xlu1 %v722_v42, %s4227_s22  ;;  %v968_v46 = vshll.u32 %v4987_v56, 16  ;;  %v1089_v28 = vsel %vm1044_vm0, %v4467_v21, %v4965_v15 }
  0xdf   : > { %1918 = vrot.lane.b32.xlu0 %v4344_v41, %s4226_s21 }
  0xe0   : > { %v4970_v24 = vpop.permute.xlu1 %778 }
  0xe1   : > { %v4973_v54 = vpop.permute.xlu0 %776 }
  0xe2   : > { %812 = vrot.lane.b32.xlu1 %v736_v10, %s4227_s22 }
  0xe3   : > { %810 = vrot.lane.b32.xlu0 %v729_v47, %s4227_s22 }
  0xe4   : > { %v891_v42 = vpop.permute.xlu1 %890 }
  0xe5   : > { %v889_v62 = vpop.permute.xlu0 %888  ;;  %v1185_v14 = vsel %vm1153_vm2, %v1092_v12, %v891_v42 }
  0xe6   : > { %924 = vrot.lane.b32.xlu1 %v3571_v7, %s4226_s21  ;;  %v1183_v26 = vsel %vm1153_vm2, %v1089_v28, %v889_v62 }
  0xe7   : > { %814 = vrot.lane.b32.xlu0 %v743_v37, %s4227_s22 }
  0xe8   : > { %v895_v52 = vpop.permute.xlu1 %894 }
  0xe9   : > { %v893_v23 = vpop.permute.xlu0 %892 }
  0xea   : > { %928 = vrot.lane.b32.xlu1 %v3573_v33, %s4226_s21  ;;  %v966_v33 = vshrl.u32 %v4987_v56, 16 }
  0xeb   : > { %926 = vrot.lane.b32.xlu0 %v3572_v57, %s4226_s21  ;;  %v1098_v57 = vsel %vm1044_vm0, %v4488_v35, %v4970_v24  ;;  %v1095_v35 = vsel %vm1044_vm0, %v4495_v40, %v4973_v54 }
  0xec   : > { %v4995_v7 = vpop.permute.xlu1 %1002  ;;  %v1189_v21 = vsel %vm1153_vm2, %v1098_v57, %v895_v52 }
  0xed   : > { %6563 = vst [vmem:[#allocation58_spill] sm:$0xff] %v4995_v7  ;;  %v1258_v20 = vsel %vm1226_vm1, %v1185_v14, %v4995_v7  ;;  %v5004_v2 = vpop.permute.xlu0 %1000  ;;  %v970_v14 = vrot.slane %v968_v46, 1 }
  0xee   : > { %6564 = vst [vmem:[#allocation59_spill] sm:$0xff] %v5004_v2  ;;  %v1256_v42 = vsel %vm1226_vm1, %v1183_v26, %v5004_v2  ;;  %1036 = vrot.lane.b32.xlu1 %v729_v47, %s4228_s27  ;;  %v1187_v47 = vsel %vm1153_vm2, %v1095_v35, %v893_v23 }
  0xef   : > { %v3586_v43 = vcombine.low %v4944_v17, %v1256_v42  ;;  %v3621_v12 = vcombine.low %v1256_v42, %v1258_v20  ;;  %930 = vrot.lane.b32.xlu0 %v3574_v39, %s4226_s21  ;;  %v971_v26 = vor.u32 %v970_v14, %v966_v33 }
  0xf0   : > { %v5016_v62 = vpop.permute.xlu1 %1006 }
  0xf1   : > { %6565 = vst [vmem:[#allocation60_spill] sm:$0xff] %v5016_v62  ;;  %v1262_v28 = vsel %vm1226_vm1, %v1189_v21, %v5016_v62  ;;  %3971 = vmatprep.mubr.msk.bf16.mxu0 %vm1393_vm3, %v3586_v43  ;;  %4005 = vmatprep.mubr.msk.bf16.mxu1 %vm1393_vm3, %v3621_v12  ;;  %v5026_v17 = vpop.permute.xlu0 %1004  ;;  %v6587_v62 = vld [vmem:[#allocation20_spill] sm:$0xff] }
  0xf2   : > { %6566 = vst [vmem:[#allocation61_spill] sm:$0xff] %v5026_v17  ;;  %v1260_v39 = vsel %vm1226_vm1, %v1187_v47, %v5026_v17  ;;  %1040 = vrot.lane.b32.xlu1 %v743_v37, %s4228_s27 }
  0xf3   : > { %v3587_v46 = vcombine.low %v1258_v20, %v1260_v39  ;;  %v3622_v52 = vcombine.low %v1260_v39, %v1262_v28  ;;  %1038 = vrot.lane.b32.xlu0 %v736_v10, %s4228_s27 }
  0xf4   : > { %v5032_v40 = vpop.permute.xlu1 %782 }
  0xf5   : > { %3972 = vmatmul.mubr.msk.bf16.gmra.mxu0 %vm1393_vm3, %v3587_v46  ;;  %4006 = vmatmul.mubr.msk.bf16.gmra.mxu1 %vm1393_vm3, %v3622_v52  ;;  %v5036_v23 = vpop.permute.xlu0 %780  ;;  %v1104_v12 = vsel %vm1044_vm0, %v4527_v18, %v5032_v40  ;;  %v6570_v52 = vld [vmem:[#allocation6_spill] sm:$0xff] }
  0xf6   : > { %1920 = vrot.lane.b32.xlu1 %v4366_v51, %s4226_s21  ;;  %v1101_v35 = vsel %vm1044_vm0, %v4534_v30, %v5036_v23 }
  0xf7   : > { %1042 = vrot.lane.b32.xlu0 %v971_v26, %s4228_s27 }
  0xf8   : > { %v5041_v57 = vpop.permute.xlu1 %786 }
  0xf9   : > { %v5043_v20 = vpop.permute.xlu0 %784  ;;  %v1110_v39 = vsel %vm1044_vm0, %v4543_v45, %v5041_v57 }
  0xfa   : > { %1924 = vrot.lane.b32.xlu1 %v4378_v58, %s4226_s21 }
  0xfb   : > { %1922 = vrot.lane.b32.xlu0 %v4362_v50, %s4226_s21 }
  0xfc   : > { %v897_v10 = vpop.permute.xlu1 %896 }
  0xfd   : > { %v5049_v37 = vpop.permute.xlu0 %788  ;;  %v1191_v47 = vsel %vm1153_vm2, %v1101_v35, %v897_v10  ;;  %v6573_v10 = vld [vmem:[#allocation10_spill] sm:$0xff] }
  0xfe   : > { %6567 = vst [vmem:[#allocation62_spill] sm:$0xff] %v5049_v37  ;;  %1928 = vrot.lane.b32.xlu1 %v4429_v36, %s4226_s21 }
  0xff   : > { %1926 = vrot.lane.b32.xlu0 %v4411_v27, %s4226_s21 }
 0x100   : > { %v901_v42 = vpop.permute.xlu1 %900 }
 0x101   : > { %v899_v33 = vpop.permute.xlu0 %898 }
 0x102   : > { %1932 = vrot.lane.b32.xlu1 %v4445_v49, %s4226_s21  ;;  %v1193_v14 = vsel %vm1153_vm2, %v1104_v12, %v899_v33  ;;  %v6571_v33 = vld [vmem:[#allocation4_spill] sm:$0xff] }
 0x103   : > { %1930 = vrot.lane.b32.xlu0 %v4420_v31, %s4226_s21 }
 0x104   : > { %v905_v21 = vpop.permute.xlu1 %904 }
 0x105   : > { %v903_v43 = vpop.permute.xlu0 %902 }
 0x106   : > { %1936 = vrot.lane.b32.xlu1 %v4473_v25, %s4226_s21  ;;  %v1197_v26 = vsel %vm1153_vm2, %v1110_v39, %v903_v43  ;;  %v6575_v39 = vld [vmem:[#allocation7_spill] sm:$0xff] }
 0x107   : > { %1934 = vrot.lane.b32.xlu0 %v4439_v44, %s4226_s21 }
 0x108   : > { %v5067_v27 = vpop.permute.xlu1 %1010 }
 0x109   : > { %6568 = vst [vmem:[#allocation63_spill] sm:$0xff] %v5067_v27  ;;  %v1266_v28 = vsel %vm1226_vm1, %v1193_v14, %v5067_v27  ;;  %v5075_v18 = vpop.permute.xlu0 %1008  ;;  %v1107_v14 = vsel %vm1044_vm0, %v6573_v10, %v5043_v20  ;;  %v6576_v27 = vld [vmem:[#allocation5_spill] sm:$0xff] }
 0x10a   : > { %6569 = vst [vmem:[#allocation64_spill] sm:$0xff] %v5075_v18  ;;  %v1264_v46 = vsel %vm1226_vm1, %v1191_v47, %v5075_v18  ;;  %1940 = vrot.lane.b32.xlu1 %v6570_v52, %s4226_s21  ;;  %v1195_v35 = vsel %vm1153_vm2, %v1107_v14, %v901_v42 }
 0x10b   : > { %v3588_v30 = vcombine.low %v1264_v46, %v1266_v28  ;;  %1938 = vrot.lane.b32.xlu0 %v6571_v33, %s4226_s21 }
 0x10c   : > { %v5087_v12 = vpop.permute.xlu1 %1014 }
 0x10d   : > { %6572 = vst [vmem:[#allocation6_spill] sm:$0xff] %v5087_v12  ;;  %v1270_v45 = vsel %vm1226_vm1, %v1197_v26, %v5087_v12  ;;  %3975 = vmatprep.mubr.msk.bf16.mxu0 %vm1393_vm3, %v3588_v30  ;;  %v5096_v47 = vpop.permute.xlu0 %1012  ;;  %v6578_v26 = vld [vmem:[#allocation13_spill] sm:$0xff]  ;;  %v6586_v12 = vld [vmem:[#allocation15_spill] sm:$0xff] }
 0x10e   : > { %6574 = vst [vmem:[#allocation4_spill] sm:$0xff] %v5096_v47  ;;  %v1268_v43 = vsel %vm1226_vm1, %v1195_v35, %v5096_v47  ;;  %1944 = vrot.lane.b32.xlu1 %v6575_v39, %s4226_s21  ;;  %v1113_v42 = vsel %vm1044_vm0, %v6578_v26, %v5049_v37  ;;  %v6580_v35 = vld [vmem:[#allocation12_spill] sm:$0xff]  ;;  %v6589_v37 = vld [vmem:[#allocation37_spill] sm:$0xff] }
 0x10f   : > { %v3589_v46 = vcombine.low %v1268_v43, %v1270_v45  ;;  %v3623_v18 = vcombine.low %v1266_v28, %v1268_v43  ;;  %1942 = vrot.lane.b32.xlu0 %v6576_v27, %s4226_s21  ;;  %v1199_v30 = vsel %vm1153_vm2, %v1113_v42, %v905_v21  ;;  %v6581_v39 = vld [vmem:[#allocation8_spill] sm:$0xff] }
 0x110   : > { %v5104_v10 = vpop.permute.xlu1 %790 }
 0x111   : > { %6577 = vst [vmem:[#allocation10_spill] sm:$0xff] %v5104_v10  ;;  %3976 = vmatmul.mubr.msk.bf16.gmra.mxu0 %vm1393_vm3, %v3589_v46  ;;  %4009 = vmatprep.mubr.msk.bf16.mxu1 %vm1393_vm3, %v3623_v18  ;;  %v5112_v14 = vpop.permute.xlu0 %1016  ;;  %v6582_v18 = vld [vmem:[#allocation14_spill] sm:$0xff]  ;;  %v6583_v46 = vld [vmem:[#allocation11_spill] sm:$0xff]  ;;  %v1116_v17 = vsel %vm1044_vm0, %v6586_v12, %v5104_v10 }
 0x112   : > { %6579 = vst [vmem:[#allocation7_spill] sm:$0xff] %v5112_v14  ;;  %v1272_v28 = vsel %vm1226_vm1, %v1199_v30, %v5112_v14  ;;  %1948 = vrot.lane.b32.xlu1 %v6580_v35, %s4226_s21  ;;  %v6591_v12 = vld [vmem:[#allocation35_spill] sm:$0xff] }
 0x113   : > { %v3624_v43 = vcombine.low %v1270_v45, %v1272_v28  ;;  %1946 = vrot.lane.b32.xlu0 %v6581_v39, %s4226_s21  ;;  %v6584_v45 = vld [vmem:[#allocation16_spill] sm:$0xff] }
 0x114   : > { %v5120_v47 = vpop.permute.xlu1 %794 }
 0x115   : > { %4010 = vmatmul.mubr.msk.bf16.gmra.mxu1 %vm1393_vm3, %v3624_v43  ;;  %v5123_v21 = vpop.permute.xlu0 %792  ;;  %v6585_v43 = vld [vmem:[#allocation26_spill] sm:$0xff] }
 0x116   : > { %1952 = vrot.lane.b32.xlu1 %v6582_v18, %s4226_s21 }
 0x117   : > { %1950 = vrot.lane.b32.xlu0 %v6583_v46, %s4226_s21 }
 0x118   : > { %v907_v26 = vpop.permute.xlu1 %906 }
 0x119   : > { %v5129_v42 = vpop.permute.xlu0 %796  ;;  %v1201_v2 = vsel %vm1153_vm2, %v1116_v17, %v907_v26 }
 0x11a   : > { %1956 = vrot.lane.b32.xlu1 %v4634_v48, %s4226_s21 }
 0x11b   : > { %1954 = vrot.lane.b32.xlu0 %v6584_v45, %s4226_s21 }
 0x11c   : > { %v911_v30 = vpop.permute.xlu1 %910 }
 0x11d   : > { %v909_v14 = vpop.permute.xlu0 %908 }
 0x11e   : > { %1960 = vrot.lane.b32.xlu1 %v6585_v43, %s4226_s21  ;;  %v6590_v43 = vld [vmem:[#allocation17_spill] sm:$0xff] }
 0x11f   : > { %1958 = vrot.lane.b32.xlu0 %v6587_v62, %s4226_s21  ;;  %v1122_v35 = vsel %vm1044_vm0, %v6590_v43, %v5120_v47  ;;  %v6592_v62 = vld [vmem:[#allocation18_spill] sm:$0xff] }
 0x120   : > { %v5143_v7 = vpop.permute.xlu1 %1018  ;;  %v1119_v17 = vsel %vm1044_vm0, %v6592_v62, %v5123_v21  ;;  %v1205_v26 = vsel %vm1153_vm2, %v1122_v35, %v911_v30  ;;  %v6595_v35 = vld [vmem:[#allocation36_spill] sm:$0xff] }
 0x121   : > { %6588 = vst [vmem:[#allocation5_spill] sm:$0xff] %v5143_v7  ;;  %v1274_v48 = vsel %vm1226_vm1, %v1201_v2, %v5143_v7  ;;  %v913_v45 = vpop.permute.xlu0 %912  ;;  %v1203_v2 = vsel %vm1153_vm2, %v1119_v17, %v909_v14 }
 0x122   : > { %v3590_v18 = vcombine.low %v1272_v28, %v1274_v48  ;;  %1964 = vrot.lane.b32.xlu1 %v6589_v37, %s4226_s21 }
 0x123   : > { %1962 = vrot.lane.b32.xlu0 %v6591_v12, %s4226_s21 }
 0x124   : > { %v5158_v10 = vpop.permute.xlu1 %1022  ;;  %3979 = vmatprep.mubr.msk.bf16.mxu0 %vm1393_vm3, %v3590_v18  ;;  %v6596_v18 = vld [vmem:[#allocation23_spill] sm:$0xff] }
 0x125   : > { %6593 = vst [vmem:[#allocation13_spill] sm:$0xff] %v5158_v10  ;;  %v1278_v28 = vsel %vm1226_vm1, %v1205_v26, %v5158_v10  ;;  %v5164_v7 = vpop.permute.xlu0 %1020  ;;  %v1125_v14 = vsel %vm1044_vm0, %v6596_v18, %v5129_v42 }
 0x126   : > { %6594 = vst [vmem:[#allocation8_spill] sm:$0xff] %v5164_v7  ;;  %v1276_v43 = vsel %vm1226_vm1, %v1203_v2, %v5164_v7  ;;  %1968 = vrot.lane.b32.xlu1 %v4779_v29, %s4226_s21  ;;  %v1207_v17 = vsel %vm1153_vm2, %v1125_v14, %v913_v45  ;;  %v6598_v7 = vld [vmem:[#allocation32_spill] sm:$0xff] }
 0x127   : > { %v3591_v62 = vcombine.low %v1276_v43, %v1278_v28  ;;  %v3625_v12 = vcombine.low %v1274_v48, %v1276_v43  ;;  %1966 = vrot.lane.b32.xlu0 %v6595_v35, %s4226_s21 }
 0x128   : > { %v5175_v30 = vpop.permute.xlu1 %798 }
 0x129   : > { %3980 = vmatmul.mubr.msk.bf16.gmra.mxu0 %vm1393_vm3, %v3591_v62  ;;  %4013 = vmatprep.mubr.msk.bf16.mxu1 %vm1393_vm3, %v3625_v12  ;;  %v5180_v26 = vpop.permute.xlu0 %1024  ;;  %v1128_v10 = vsel %vm1044_vm0, %v6598_v7, %v5175_v30 }
 0x12a   : > { %6597 = vst [vmem:[#allocation11_spill] sm:$0xff] %v5180_v26  ;;  %v1280_v48 = vsel %vm1226_vm1, %v1207_v17, %v5180_v26  ;;  %1972 = vrot.lane.b32.xlu1 %v4860_v1, %s4226_s21 }
 0x12b   : > { %v3626_v2 = vcombine.low %v1278_v28, %v1280_v48  ;;  %1970 = vrot.lane.b32.xlu0 %v4773_v59, %s4226_s21 }
 0x12c   : > { %v5188_v43 = vpop.permute.xlu1 %802 }
 0x12d   : > { %4014 = vmatmul.mubr.msk.bf16.gmra.mxu1 %vm1393_vm3, %v3626_v2  ;;  %v5191_v45 = vpop.permute.xlu0 %800  ;;  %v1134_v26 = vsel %vm1044_vm0, %v4739_v60, %v5188_v43 }
 0x12e   : > { %1976 = vrot.lane.b32.xlu1 %v4891_v5, %s4226_s21 }
 0x12f   : > { %1974 = vrot.lane.b32.xlu0 %v4898_v53, %s4226_s21 }
 0x130   : > { %v5197_v62 = vpop.permute.xlu1 %806 }
 0x131   : > { %v5199_v12 = vpop.permute.xlu0 %804 }
 0x132   : > { %1980 = vrot.lane.b32.xlu1 %v4987_v56, %s4226_s21  ;;  %v1131_v56 = vsel %vm1044_vm0, %v4743_v3, %v5191_v45  ;;  %v1140_v3 = vsel %vm1044_vm0, %v4760_v61, %v5197_v62 }
 0x133   : > { %1978 = vrot.lane.b32.xlu0 %v4937_v32, %s4226_s21 }
 0x134   : > { %v917_v28 = vpop.permute.xlu1 %916 }
 0x135   : > { %v915_v18 = vpop.permute.xlu0 %914  ;;  %v1211_v5 = vsel %vm1153_vm2, %v1131_v56, %v917_v28  ;;  %v6602_v56 = vld [vmem:[#allocation24_spill] sm:$0xff] }
 0x136   : > { %v1209_v1 = vsel %vm1153_vm2, %v1128_v10, %v915_v18  ;;  %v1137_v10 = vsel %vm1044_vm0, %v4764_v16, %v5199_v12 }
 0x138   : > { %v921_v14 = vpop.permute.xlu1 %920 }
 0x139   : > { %v919_v17 = vpop.permute.xlu0 %918  ;;  %v1215_v18 = vsel %vm1153_vm2, %v1137_v10, %v921_v14  ;;  %v1983_v14 = vsel %vm1044_vm0, %v4294_v8, %v6602_v56  ;;  %v6607_v56 = vld [vmem:[#allocation29_spill] sm:$0xff] }
 0x13a   : > { %v1213_v32 = vsel %vm1153_vm2, %v1134_v26, %v919_v17 }
 0x13c   : > { %v5205_v48 = vpop.permute.xlu1 %1026 }
 0x13d   : > { %v923_v2 = vpop.permute.xlu0 %922  ;;  %v1282_v7 = vsel %vm1226_vm1, %v1209_v1, %v5205_v48 }
 0x140   : > { %v5217_v53 = vpop.permute.xlu1 %1030 }
 0x141   : > { %v1286_v29 = vsel %vm1226_vm1, %v1213_v32, %v5217_v53  ;;  %v5223_v60 = vpop.permute.xlu0 %1028  ;;  %v1217_v32 = vsel %vm1153_vm2, %v1140_v3, %v923_v2  ;;  %v6603_v3 = vld [vmem:[#allocation19_spill] sm:$0xff] }
 0x142   : > { %6599 = vst [vmem:[#allocation15_spill] sm:$0xff] %v5223_v60  ;;  %v1284_v59 = vsel %vm1226_vm1, %v1211_v5, %v5223_v60  ;;  %v6626_v60 = vld [vmem:[#allocation44_spill] sm:$0xff] }
 0x143   : > { %v3592_v26 = vcombine.low %v1282_v7, %v1284_v59  ;;  %v3627_v17 = vcombine.low %v1284_v59, %v1286_v29 }
 0x144   : > { %v5236_v28 = vpop.permute.xlu1 %1034 }
 0x145   : > { %6600 = vst [vmem:[#allocation37_spill] sm:$0xff] %v5236_v28  ;;  %v5241_v1 = vsel %vm1226_vm1, %v1217_v32, %v5236_v28  ;;  %3983 = vmatprep.mubr.msk.bf16.mxu0 %vm1393_vm3, %v3592_v26  ;;  %4017 = vmatprep.mubr.msk.bf16.mxu1 %vm1393_vm3, %v3627_v17  ;;  %v5245_v61 = vpop.permute.xlu0 %1032  ;;  %v6604_v26 = vld [vmem:[#allocation2_spill] sm:$0xff]  ;;  %v6605_v32 = vld [vmem:[#allocation25_spill] sm:$0xff] }
 0x146   : > { %6601 = vst [vmem:[#allocation17_spill] sm:$0xff] %v5245_v61  ;;  %v1288_v59 = vsel %vm1226_vm1, %v1215_v18, %v5245_v61  ;;  %v1982_v17 = vsel %vm1044_vm0, %v6604_v26, %v6603_v3  ;;  %v1985_v18 = vsel %vm1044_vm0, %v4306_v13, %v6605_v32  ;;  %v6606_v61 = vld [vmem:[#allocation28_spill] sm:$0xff]  ;;  %v6608_v3 = vld [vmem:[#allocation21_spill] sm:$0xff]  ;;  %v5291_v26 = vsel %vm1044_vm0, %v4366_v51, %v4747_v0 }
 0x147   : > { %v3593_v16 = vcombine.low %v1286_v29, %v1288_v59  ;;  %v3628_v5 = vcombine.low %v1288_v59, %v5241_v1  ;;  %v5314_v51 = vsel %vm1044_vm0, %v4420_v31, %v4845_v11  ;;  %v5332_v31 = vsel %vm1044_vm0, %v4445_v49, %v4867_v9  ;;  %v6612_v11 = vld [vmem:[#allocation31_spill] sm:$0xff]  ;;  %v6613_v32 = vld [vmem:[#allocation57_spill] sm:$0xff] }
 0x148   : > { %v1913_v2 = vpop.permute.xlu1 %1912 }
 0x149   : > { %3984 = vmatmul.mubr.msk.bf16.gmra.mxu0 %vm1393_vm3, %v3593_v16  ;;  %4018 = vmatmul.mubr.msk.bf16.gmra.mxu1 %vm1393_vm3, %v3628_v5  ;;  %v1911_v7 = vpop.permute.xlu0 %1910  ;;  %v2021_v10 = vsel %vm1153_vm2, %v1983_v14, %v1913_v2  ;;  %v1984_v2 = vsel %vm1044_vm0, %v4285_v4, %v6608_v3  ;;  %v6609_v14 = vld [vmem:[#allocation27_spill] sm:$0xff]  ;;  %v5296_v4 = vsel %vm1044_vm0, %v4378_v58, %v4767_v22 }
 0x14a   : > { %v2019_v29 = vsel %vm1153_vm2, %v1982_v17, %v1911_v7  ;;  %v5265_v8 = vsel %vm1226_vm1, %v2021_v10, %v6606_v61  ;;  %v1986_v13 = vsel %vm1044_vm0, %v4319_v19, %v6609_v14  ;;  %v5281_v61 = vsel %vm1044_vm0, %v4344_v41, %v4706_v63  ;;  %v6610_v41 = vld [vmem:[#allocation30_spill] sm:$0xff] }
 0x14b   : > { %v5270_v28 = vsel %vm1226_vm1, %v2019_v29, %v6607_v56  ;;  %v5286_v7 = vsel %vm1044_vm0, %v4362_v50, %v4732_v55  ;;  %v3682_v19 = vcombine.low %v5265_v8, %v5265_v8  ;;  %v6611_v50 = vld [vmem:[#allocation3_spill] sm:$0xff]  ;;  %v5322_v10 = vsel %vm1044_vm0, %v4429_v36, %v4851_v6  ;;  %v6616_v56 = vld [vmem:[#allocation33_spill] sm:$0xff]  ;;  %v6618_v14 = vld [vmem:[#allocation14_spill] sm:$0xff] }
 0x14c   : > { %v1917_v59 = vpop.permute.xlu1 %1916  ;;  %v5309_v55 = vsel %vm1044_vm0, %v6611_v50, %v4829_v34  ;;  %v3680_v58 = vcombine.low %v5270_v28, %v5270_v28  ;;  %v5327_v34 = vsel %vm1044_vm0, %v4439_v44, %v4863_v38  ;;  %v5346_v36 = vsel %vm1044_vm0, %v4473_v25, %v4965_v15 }
 0x14d   : > { %v2025_v16 = vsel %vm1153_vm2, %v1985_v18, %v1917_v59  ;;  %v1915_v5 = vpop.permute.xlu0 %1914  ;;  %v5341_v18 = vsel %vm1044_vm0, %v6571_v33, %v6613_v32  ;;  %v5351_v44 = vsel %vm1044_vm0, %v6576_v27, %v4970_v24  ;;  %v5358_v6 = vsel %vm1044_vm0, %v6570_v52, %v4973_v54  ;;  %v6614_v54 = vld [vmem:[#allocation9_spill] sm:$0xff] }
 0x14e   : > { %v5302_v63 = vsel %vm1226_vm1, %v2025_v16, %v6610_v41  ;;  %v2023_v22 = vsel %vm1153_vm2, %v1984_v2, %v1915_v5  ;;  %v5363_v38 = vsel %vm1044_vm0, %v6581_v39, %v5032_v40  ;;  %v2304_v25 = vshrl.u32 %v3682_v19, 16  ;;  %v6615_v39 = vld [vmem:[#allocation12_spill] sm:$0xff]  ;;  %v6617_v2 = vld [vmem:[#allocation62_spill] sm:$0xff] }
 0x14f   : > { %v5336_v29 = vsel %vm1226_vm1, %v2023_v22, %v6612_v11  ;;  %v3686_v49 = vcombine.low %v5302_v63, %v5302_v63  ;;  %v2307_v24 = vshll.u32 %v3682_v19, 16  ;;  %v2290_v27 = vshrl.u32 %v3680_v58, 16  ;;  %v6620_v19 = vld [vmem:[#allocation16_spill] sm:$0xff] }
 0x150   : > { %v5304_v17 = vpop.permute.xlu1 %808  ;;  %v3684_v9 = vcombine.low %v5336_v29, %v5336_v29  ;;  %v2293_v33 = vshll.u32 %v3680_v58, 16  ;;  %v5375_v52 = vsel %vm1044_vm0, %v6614_v54, %v5036_v23  ;;  %v5380_v40 = vsel %vm1044_vm0, %v6583_v46, %v5041_v57  ;;  %v6619_v23 = vld [vmem:[#allocation10_spill] sm:$0xff] }
 0x151   : > { %v1919_v0 = vpop.permute.xlu0 %1918  ;;  %v5385_v5 = vsel %vm1044_vm0, %v6615_v39, %v5043_v20  ;;  %v5399_v41 = vsel %vm1044_vm0, %v6620_v19, %v6619_v23  ;;  %v2332_v57 = vshrl.u32 %v3686_v49, 16  ;;  %v2335_v46 = vshll.u32 %v3686_v49, 16  ;;  %v6621_v20 = vld [vmem:[#allocation20_spill] sm:$0xff]  ;;  %v6622_v49 = vld [vmem:[#allocation22_spill] sm:$0xff] }
 0x152   : > { %v2027_v59 = vsel %vm1153_vm2, %v1986_v13, %v1919_v0  ;;  %v5394_v13 = vsel %vm1044_vm0, %v6618_v14, %v6617_v2  ;;  %v5404_v50 = vsel %vm1044_vm0, %v6621_v20, %v5120_v47  ;;  %v2318_v58 = vshrl.u32 %v3684_v9, 16  ;;  %v6623_v47 = vld [vmem:[#allocation26_spill] sm:$0xff] }
 0x153   : > { %v5389_v3 = vsel %vm1226_vm1, %v2027_v59, %v6616_v56  ;;  %v2321_v22 = vshll.u32 %v3684_v9, 16  ;;  %v2306_v32 = vrot.slane %v2304_v25, 4  ;;  %v2309_v59 = vrot.slane %v2307_v24, 5  ;;  %v6624_v24 = vld [vmem:[#allocation34_spill] sm:$0xff] }
 0x154   : > { %v5367_v15 = vpop.permute.xlu1 %812  ;;  %v3688_v0 = vcombine.low %v5389_v3, %v5389_v3  ;;  %v2292_v54 = vrot.slane %v2290_v27, 4  ;;  %v2295_v39 = vrot.slane %v2293_v33, 5  ;;  %v5413_v2 = vsel %vm1044_vm0, %v6622_v49, %v5123_v21 }
 0x155   : > { %v5370_v16 = vpop.permute.xlu0 %810  ;;  %v5418_v14 = vsel %vm1044_vm0, %v6623_v47, %v5129_v42  ;;  %v3683_v9 = vcombine.high %v5265_v8, %v5265_v8  ;;  %v3681_v25 = vcombine.high %v5270_v28, %v5270_v28  ;;  %v5427_v27 = vsel %vm1044_vm0, %v6624_v24, %v5175_v30 }
 0x156   : > { %v3687_v21 = vcombine.high %v5302_v63, %v5302_v63  ;;  %v2334_v33 = vrot.slane %v2332_v57, 4  ;;  %v2337_v23 = vrot.slane %v2335_v46, 5  ;;  %v2320_v19 = vrot.slane %v2318_v58, 4  ;;  %v6625_v57 = vld [vmem:[#allocation38_spill] sm:$0xff] }
 0x157   : > { %v2323_v20 = vrot.slane %v2321_v22, 5  ;;  %v2346_v42 = vshrl.u32 %v3688_v0, 16  ;;  %v2349_v49 = vshll.u32 %v3688_v0, 16  ;;  %v5434_v8 = vsel %vm1044_vm0, %v6595_v35, %v5188_v43 }
 0x158   : > { %v925_v11 = vpop.permute.xlu1 %924  ;;  %v5439_v30 = vsel %vm1044_vm0, %v6589_v37, %v5191_v45  ;;  %v2310_v28 = vor.u32 %v2309_v59, %v2306_v32  ;;  %v2296_v24 = vor.u32 %v2295_v39, %v2292_v54  ;;  %v5444_v46 = vsel %vm1044_vm0, %v6625_v57, %v5197_v62 }
 0x159   : > { %v5408_v56 = vpop.permute.xlu0 %814  ;;  %v2313_v58 = vshll.u32 %v3683_v9, 16  ;;  %v2299_v22 = vshll.u32 %v3681_v25, 16  ;;  %v3685_v35 = vcombine.high %v5336_v29, %v5336_v29  ;;  %v2338_v43 = vor.u32 %v2337_v23, %v2334_v33  ;;  %v6627_v9 = vld [vmem:[#allocation39_spill] sm:$0xff] }
 0x15a   : > { %v2341_v0 = vshll.u32 %v3687_v21, 16  ;;  %v1143_v37 = vsel %vm1044_vm0, %v6626_v60, %v5304_v17  ;;  %v3689_v45 = vcombine.high %v5389_v3, %v5389_v3  ;;  %v2324_v32 = vor.u32 %v2323_v20, %v2320_v19 }
 0x15b   : > { %v2348_v59 = vrot.slane %v2346_v42, 4  ;;  %v2351_v54 = vrot.slane %v2349_v49, 5  ;;  %v1219_v62 = vsel %vm1153_vm2, %v1143_v37, %v925_v11  ;;  %v5459_v29 = vsel %vm1044_vm0, %v6627_v9, %v5199_v12  ;;  %v6630_v49 = vld [vmem:[#allocation46_spill] sm:$0xff]  ;;  %v6632_v9 = vld [vmem:[#allocation45_spill] sm:$0xff] }
 0x15c   : > { %v929_v47 = vpop.permute.xlu1 %928  ;;  %v2311_v25 = vrot.slane %v2310_v28, 4  ;;  %v2297_v21 = vrot.slane %v2296_v24, 4  ;;  %v2315_v3 = vrot.slane %v2313_v58, 5  ;;  %v2301_v23 = vrot.slane %v2299_v22, 5  ;;  %v6631_v24 = vld [vmem:[#allocation48_spill] sm:$0xff] }
 0x15d   : > { %v927_v63 = vpop.permute.xlu0 %926  ;;  %v2327_v19 = vshll.u32 %v3685_v35, 16  ;;  %v2339_v12 = vrot.slane %v2338_v43, 4  ;;  %v2343_v42 = vrot.slane %v2341_v0, 5  ;;  %v1149_v28 = vsel %vm1044_vm0, %v6630_v49, %v5367_v15  ;;  %v5480_v58 = vld [vmem:[%s6419_s2] ss:$0 sm:$0xff] }
 0x15e   : > { %v1146_v57 = vsel %vm1044_vm0, %v6631_v24, %v5370_v16  ;;  %v2325_v22 = vrot.slane %v2324_v32, 4  ;;  %v2352_v35 = vor.u32 %v2351_v54, %v2348_v59  ;;  %v2355_v37 = vshll.u32 %v3689_v45, 16 }
 0x15f   : > { %v1221_v0 = vsel %vm1153_vm2, %v1146_v57, %v927_v63  ;;  %v2316_v45 = vsel %vm5466_vm6, %v2311_v25, %v2315_v3  ;;  %v2329_v54 = vrot.slane %v2327_v19, 5 }
 0x160   : > { %v5454_v39 = vpop.permute.xlu1 %1036 }
 0x161   : > { %v1292_v60 = vsel %vm1226_vm1, %v1219_v62, %v5454_v39  ;;  %v931_v33 = vpop.permute.xlu0 %930 }
 0x162   : > { %v3594_v20 = vcombine.low %v5241_v1, %v1292_v60  ;;  %v1223_v1 = vsel %vm1153_vm2, %v1149_v28, %v929_v47  ;;  %v2302_v47 = vsel %vm5466_vm6, %v2297_v21, %v2301_v23  ;;  %v6633_v28 = vld [vmem:[#allocation49_spill] sm:$0xff]  ;;  %v6634_v21 = vld [vmem:[#allocation50_spill] sm:$0xff] }
 0x163   : > { %v5511_v24 = vsel %vm1044_vm0, %v6633_v28, %v5367_v15  ;;  %v5516_v25 = vsel %vm1044_vm0, %v6634_v21, %v5370_v16  ;;  %v2330_v15 = vsel %vm5466_vm6, %v2325_v22, %v2329_v54 }
 0x164   : > { %v5483_v43 = vpop.permute.xlu1 %1040  ;;  %3987 = vmatprep.mubr.msk.bf16.mxu0 %vm1393_vm3, %v3594_v20  ;;  %v5503_v20 = vsel %vm1044_vm0, %v6632_v9, %v5304_v17  ;;  %v2353_v17 = vrot.slane %v2352_v35, 4  ;;  %v6635_v9 = vld [vmem:[#allocation52_spill] sm:$0xff] }
 0x165   : > { %v1296_v62 = vsel %vm1226_vm1, %v1223_v1, %v5483_v43  ;;  %v3961_v32 = vpop.f32.mrf.mxu0  ;;  %v5494_v59 = vpop.permute.xlu0 %1038  ;;  %v1152_v16 = vsel %vm1044_vm0, %v6635_v9, %v5408_v56 }
 0x166   : > { %v1485_v63 = vadd.f32 %v3961_v32, %v5480_v58  ;;  %v1294_v49 = vsel %vm1226_vm1, %v1221_v0, %v5494_v59  ;;  %v3746_v0 = vcombine.low %v2302_v47, %v2316_v45  ;;  %v2357_v32 = vrot.slane %v2355_v37, 5  ;;  %v6636_v37 = vld [vmem:[#allocation40_spill] sm:$0xff] }
 0x167   : > { %v3595_v3 = vcombine.low %v1294_v49, %v1296_v62  ;;  %v3629_v23 = vcombine.low %v1292_v60, %v1294_v49  ;;  %v1476_v19 = vpop.f32.mrf.mxu0  ;;  %v5532_v47 = vsel %vm5466_vm6, %v2339_v12, %v2343_v42  ;;  %v1225_v22 = vsel %vm1153_vm2, %v1152_v16, %v931_v33 }
 0x168   : > { %1605 = vst.msk [vmem:[%s5489_s10 + $0x10] sm:$0xff] %vm1153_vm2, %v1485_v63  ;;  %v1477_v57 = vadd.f32 %v5480_v58, %v1476_v19  ;;  %v1921_v1 = vpop.permute.xlu1 %1920  ;;  %v5548_v19 = vsel %vm5466_vm6, %v2353_v17, %v2357_v32  ;;  %v6637_v17 = vld [vmem:[#allocation55_spill] sm:$0xff] }
 0x169   : > { %v2029_v60 = vsel %vm1153_vm2, %v5281_v61, %v1921_v1  ;;  %v3962_v49 = vpop.f32.mrf.mxu0  ;;  %3988 = vmatmul.mubr.msk.bf16.gmra.mxu0 %vm1393_vm3, %v3595_v3  ;;  %v3995_v35 = vpop.f32.mrf.mxu1  ;;  %4021 = vmatprep.mubr.msk.bf16.mxu1 %vm1393_vm3, %v3629_v23  ;;  %v3821_v23 = vcombine.low %v2316_v45, %v2330_v15  ;;  %v5563_v32 = vsel %vm1044_vm0, %v6637_v17, %v5408_v56 }
 0x16a   : > { %1603 = vst.msk [vmem:[%s5489_s10] sm:$0xff] %vm1153_vm2, %v1477_v57  ;;  %v2095_v54 = vsel %vm1226_vm1, %v2029_v60, %v6636_v37  ;;  %v1488_v61 = vadd.f32 %v3962_v49, %v5480_v58  ;;  %v1759_v63 = vadd.f32 %v3995_v35, %v5480_v58  ;;  %v5541_v28 = vpop.permute.xlu0 %1042  ;;  %4027 = vmatprep.mubr.msk.bf16.mxu0 %vm1393_vm3, %v3746_v0 }
 0x16b   : > { %v3690_v21 = vcombine.low %v2095_v54, %v2095_v54  ;;  %v3691_v3 = vcombine.high %v2095_v54, %v2095_v54  ;;  %v1298_v12 = vsel %vm1226_vm1, %v1225_v22, %v5541_v28  ;;  %v1479_v42 = vpop.f32.mrf.mxu0  ;;  %v1750_v33 = vpop.f32.mrf.mxu1  ;;  %v3822_v56 = vcombine.low %v5532_v47, %v5548_v19 }
 0x16c   : > { %1606 = vst.msk [vmem:[%s5489_s10 + $0x18] sm:$0xff] %vm1153_vm2, %v1488_v61  ;;  %3650 = vst.msk [vmem:[%s5489_s10 + $0x90] sm:$0xff] %vm1153_vm2, %v1759_v63  ;;  %v3630_v57 = vcombine.low %v1296_v62, %v1298_v12  ;;  %v1480_v1 = vadd.f32 %v5480_v58, %v1479_v42  ;;  %v1751_v0 = vadd.f32 %v5480_v58, %v1750_v33  ;;  %v1925_v9 = vpop.permute.xlu1 %1924  ;;  %v6638_v62 = vld [vmem:[#allocation41_spill] sm:$0xff] }
 0x16d   : > { %v2360_v16 = vshrl.u32 %v3690_v21, 16  ;;  %v2363_v60 = vshll.u32 %v3690_v21, 16  ;;  %v5556_v49 = vshll.u32 %v3691_v3, 16  ;;  %v2033_v45 = vsel %vm1153_vm2, %v5286_v7, %v1925_v9  ;;  %v3996_v35 = vpop.f32.mrf.mxu1 }
 0x16e   : > { %1604 = vst.msk [vmem:[%s5489_s10 + $0x8] sm:$0xff] %vm1153_vm2, %v1480_v1  ;;  %3648 = vst.msk [vmem:[%s5489_s10 + $0x80] sm:$0xff] %vm1153_vm2, %v1751_v0  ;;  %v2097_v22 = vsel %vm1226_vm1, %v2033_v45, %v6638_v62  ;;  %v1762_v37 = vadd.f32 %v3996_v35, %v5480_v58  ;;  %4022 = vmatmul.mubr.msk.bf16.gmra.mxu1 %vm1393_vm3, %v3630_v57  ;;  %v1923_v54 = vpop.permute.xlu0 %1922  ;;  %v3747_v7 = vcombine.low %v2330_v15, %v5532_v47 }
 0x16f   : > { %v2362_v61 = vrot.slane %v2360_v16, 4  ;;  %v2365_v63 = vrot.slane %v2363_v60, 5  ;;  %v3694_v21 = vcombine.low %v2097_v22, %v2097_v22  ;;  %4061 = vmatprep.mubr.msk.bf16.mxu1 %vm1393_vm3, %v3821_v23  ;;  %v1753_v3 = vpop.f32.mrf.mxu1  ;;  %v2371_v12 = vrot.slane %v5556_v49, 5  ;;  %v6639_v16 = vld [vmem:[#allocation42_spill] sm:$0xff] }
 0x170   : > { %v3695_v42 = vcombine.high %v2097_v22, %v2097_v22  ;;  %3651 = vst.msk [vmem:[%s5489_s10 + $0x98] sm:$0xff] %vm1153_vm2, %v1762_v37  ;;  %v2031_v33 = vsel %vm1153_vm2, %v5291_v26, %v1923_v54  ;;  %v1754_v15 = vadd.f32 %v5480_v58, %v1753_v3  ;;  %v1929_v57 = vpop.permute.xlu1 %1928  ;;  %v6640_v37 = vld [vmem:[#allocation47_spill] sm:$0xff] }
 0x171   : > { %v2366_v1 = vor.u32 %v2365_v63, %v2362_v61  ;;  %v2388_v0 = vshrl.u32 %v3694_v21, 16  ;;  %v2391_v9 = vshll.u32 %v3694_v21, 16  ;;  %v2096_v47 = vsel %vm1226_vm1, %v2031_v33, %v6639_v16  ;;  %4028 = vmatmul.mubr.msk.bf16.vlgmr.msra.gmra.mxu0 %vm1393_vm3, %v3747_v7  ;;  %v6643_v61 = vld [vmem:[#allocation53_spill] sm:$0xff] }
 0x172   : > { %v5586_v23 = vshll.u32 %v3695_v42, 16  ;;  %v3692_v60 = vcombine.low %v2096_v47, %v2096_v47  ;;  %v3693_v45 = vcombine.high %v2096_v47, %v2096_v47  ;;  %3649 = vst.msk [vmem:[%s5489_s10 + $0x88] sm:$0xff] %vm1153_vm2, %v1754_v15  ;;  %v2037_v26 = vsel %vm1153_vm2, %v5309_v55, %v1929_v57  ;;  %v1927_v35 = vpop.permute.xlu0 %1926 }
 0x173   : > { %v5592_v17 = vrot.slane %v2366_v1, 4  ;;  %v2390_v62 = vrot.slane %v2388_v0, 4  ;;  %v2393_v22 = vrot.slane %v2391_v9, 5  ;;  %v2099_v54 = vsel %vm1226_vm1, %v2037_v26, %v6640_v37  ;;  %v6641_v9 = vld [vmem:[#allocation43_spill] sm:$0xff] }
 0x174   : > { %v2374_v7 = vshrl.u32 %v3692_v60, 16  ;;  %v2377_v63 = vshll.u32 %v3692_v60, 16  ;;  %v5597_v21 = vshll.u32 %v3693_v45, 16  ;;  %v3696_v42 = vcombine.low %v2099_v54, %v2099_v54  ;;  %v1933_v15 = vpop.permute.xlu1 %1932 }
 0x175   : > { %v2394_v3 = vor.u32 %v2393_v22, %v2390_v62  ;;  %v3697_v33 = vcombine.high %v2099_v54, %v2099_v54  ;;  %v2035_v55 = vsel %vm1153_vm2, %v5296_v4, %v1927_v35  ;;  %v2041_v4 = vsel %vm1153_vm2, %v5314_v51, %v1933_v15 }
 0x176   : > { %v2376_v57 = vrot.slane %v2374_v7, 4  ;;  %v2379_v1 = vrot.slane %v2377_v63, 5  ;;  %v2098_v16 = vsel %vm1226_vm1, %v2035_v55, %v6641_v9  ;;  %4062 = vmatmul.mubr.msk.bf16.vlgmr.msra.gmra.mxu1 %vm1393_vm3, %v3822_v56  ;;  %v2402_v60 = vshrl.u32 %v3696_v42, 16  ;;  %v1931_v35 = vpop.permute.xlu0 %1930  ;;  %v6642_v55 = vld [vmem:[#allocation51_spill] sm:$0xff]  ;;  %v6644_v63 = vld [vmem:[#allocation54_spill] sm:$0xff] }
 0x177   : > { %v5605_v47 = vrot.slane %v2394_v3, 4  ;;  %v2405_v45 = vshll.u32 %v3696_v42, 16  ;;  %v5607_v26 = vshll.u32 %v3697_v33, 16  ;;  %v3811_v22 = vcombine.low %v2098_v16, %v2098_v16 }
 0x178   : > { %v2380_v62 = vor.u32 %v2379_v1, %v2376_v57  ;;  %v3812_v37 = vcombine.high %v2098_v16, %v2098_v16  ;;  %v2404_v54 = vrot.slane %v2402_v60, 4  ;;  %v2101_v56 = vsel %vm1226_vm1, %v2041_v4, %v6642_v55  ;;  %v1937_v15 = vpop.permute.xlu1 %1936 }
 0x179   : > { %v2407_v7 = vrot.slane %v2405_v45, 5  ;;  %v3057_v9 = vshrl.u32 %v3811_v22, 16  ;;  %v3060_v42 = vshll.u32 %v3811_v22, 16  ;;  %v3700_v1 = vcombine.low %v2101_v56, %v2101_v56 }
 0x17a   : > { %v5614_v3 = vrot.slane %v2380_v62, 4  ;;  %v5616_v33 = vshll.u32 %v3812_v37, 16  ;;  %v3701_v16 = vcombine.high %v2101_v56, %v2101_v56  ;;  %v2039_v51 = vsel %vm1153_vm2, %v5322_v10, %v1931_v35 }
 0x17b   : > { %v2408_v57 = vor.u32 %v2407_v7, %v2404_v54  ;;  %v3059_v60 = vrot.slane %v3057_v9, 4  ;;  %v3062_v45 = vrot.slane %v3060_v42, 5  ;;  %v2100_v4 = vsel %vm1226_vm1, %v2039_v51, %v6643_v61 }
 0x17c   : > { %v2430_v55 = vshrl.u32 %v3700_v1, 16  ;;  %v2433_v22 = vshll.u32 %v3700_v1, 16  ;;  %v5625_v37 = vshll.u32 %v3701_v16, 16  ;;  %v3698_v7 = vcombine.low %v2100_v4, %v2100_v4  ;;  %v1935_v16 = vpop.permute.xlu0 %1934 }
 0x17d   : > { %v5623_v62 = vrot.slane %v2408_v57, 4  ;;  %v3063_v54 = vor.u32 %v3062_v45, %v3059_v60  ;;  %v3699_v56 = vcombine.high %v2100_v4, %v2100_v4  ;;  %v2045_v10 = vsel %vm1153_vm2, %v5327_v34, %v1937_v15  ;;  %v1941_v15 = vpop.permute.xlu1 %1940 }
 0x17e   : > { %v2432_v35 = vrot.slane %v2430_v55, 4  ;;  %v2435_v9 = vrot.slane %v2433_v22, 5  ;;  %v2103_v0 = vsel %vm1226_vm1, %v2045_v10, %v6644_v63  ;;  %v2416_v57 = vshrl.u32 %v3698_v7, 16  ;;  %v3965_v55 = vpop.f32.mrf.mxu0 }
 0x17f   : > { %v5632_v61 = vrot.slane %v3063_v54, 4  ;;  %v2419_v51 = vshll.u32 %v3698_v7, 16  ;;  %v5634_v1 = vshll.u32 %v3699_v56, 16  ;;  %v3704_v45 = vcombine.low %v2103_v0, %v2103_v0 }
 0x180   : > { %v2436_v60 = vor.u32 %v2435_v9, %v2432_v35  ;;  %v3705_v4 = vcombine.high %v2103_v0, %v2103_v0  ;;  %v2372_v34 = vsel %vm5466_vm6, %v5592_v17, %v2371_v12  ;;  %v2418_v22 = vrot.slane %v2416_v57, 4 }
 0x181   : > { %v2421_v63 = vrot.slane %v2419_v51, 5  ;;  %v3748_v7 = vcombine.low %v5548_v19, %v2372_v34  ;;  %v2458_v10 = vshrl.u32 %v3704_v45, 16  ;;  %v2461_v35 = vshll.u32 %v3704_v45, 16  ;;  %v3999_v51 = vpop.f32.mrf.mxu1 }
 0x182   : > { %v5643_v56 = vrot.slane %v2436_v60, 4  ;;  %v5645_v0 = vshll.u32 %v3705_v4, 16  ;;  %v2043_v12 = vsel %vm1153_vm2, %v5332_v31, %v1935_v16  ;;  %v2049_v17 = vsel %vm1153_vm2, %v5341_v18, %v1941_v15  ;;  %v6645_v60 = vld [vmem:[#allocation56_spill] sm:$0xff]  ;;  %v1492_v31 = vpop.f32.mrf.mxu0 }
 0x183   : > { %v2422_v49 = vor.u32 %v2421_v63, %v2418_v22  ;;  %4031 = vmatprep.mubr.msk.bf16.mxu0 %vm1393_vm3, %v3748_v7  ;;  %v1501_v9 = vadd.f32 %v3965_v55, %v5480_v58  ;;  %v2460_v57 = vrot.slane %v2458_v10, 4  ;;  %v2463_v19 = vrot.slane %v2461_v35, 5  ;;  %v6646_v7 = vld [vmem:[#allocation58_spill] sm:$0xff] }
 0x184   : > { %v2102_v45 = vsel %vm1226_vm1, %v2043_v12, %v6645_v60  ;;  %v2105_v42 = vsel %vm1226_vm1, %v2049_v17, %v6646_v7  ;;  %v6647_v55 = vrot.slane %v5597_v21, 5  ;;  %v6648_v60 = vrot.slane %v5586_v23, 5 }
 0x185   : > { %v5656_v4 = vrot.slane %v2422_v49, 4  ;;  %v3702_v22 = vcombine.low %v2102_v45, %v2102_v45  ;;  %v3703_v63 = vcombine.high %v2102_v45, %v2102_v45  ;;  %1609 = vst.msk [vmem:[%s5489_s10 + $0x30] sm:$0xff] %vm1153_vm2, %v1501_v9  ;;  %v2464_v18 = vor.u32 %v2463_v19, %v2460_v57  ;;  %v1939_v9 = vpop.permute.xlu0 %1938  ;;  %v1945_v45 = vpop.permute.xlu1 %1944 }
 0x186   : > { %v3708_v16 = vcombine.low %v2105_v42, %v2105_v42  ;;  %v3709_v15 = vcombine.high %v2105_v42, %v2105_v42  ;;  %v2386_v10 = vsel %vm5466_vm6, %v5614_v3, %v6647_v55  ;;  %v2400_v17 = vsel %vm5466_vm6, %v5605_v47, %v6648_v60  ;;  %v3966_v55 = vpop.f32.mrf.mxu0  ;;  %v6650_v47 = vld [vmem:[#allocation60_spill] sm:$0xff] }
 0x187   : > { %v2444_v35 = vshrl.u32 %v3702_v22, 16  ;;  %v2447_v49 = vshll.u32 %v3702_v22, 16  ;;  %v5667_v12 = vshll.u32 %v3703_v63, 16  ;;  %v5674_v57 = vrot.slane %v2464_v18, 4 }
 0x188   : > { %v2486_v42 = vshrl.u32 %v3708_v16, 16  ;;  %v2489_v19 = vshll.u32 %v3708_v16, 16  ;;  %v5676_v21 = vshll.u32 %v3709_v15, 16  ;;  %v3749_v63 = vcombine.low %v2386_v10, %v2400_v17 }
 0x189   : > { %v2446_v7 = vrot.slane %v2444_v35, 4  ;;  %v2449_v3 = vrot.slane %v2447_v49, 5  ;;  %v2455_v22 = vrot.slane %v5667_v12, 5  ;;  %v3823_v60 = vcombine.low %v2372_v34, %v2386_v10 }
 0x18a   : > { %v2488_v23 = vrot.slane %v2486_v42, 4  ;;  %v2491_v54 = vrot.slane %v2489_v19, 5  ;;  %4032 = vmatmul.mubr.msk.bf16.gmra.mxu0 %vm1393_vm3, %v3749_v63  ;;  %v2047_v16 = vsel %vm1153_vm2, %v5346_v36, %v1939_v9  ;;  %v1493_v15 = vadd.f32 %v5480_v58, %v1492_v31  ;;  %v6649_v42 = vld [vmem:[#allocation59_spill] sm:$0xff] }
 0x18b   : > { %v2450_v18 = vor.u32 %v2449_v3, %v2446_v7  ;;  %v2053_v35 = vsel %vm1153_vm2, %v5351_v44, %v1945_v45  ;;  %4065 = vmatprep.mubr.msk.bf16.mxu1 %vm1393_vm3, %v3823_v60  ;;  %v2104_v19 = vsel %vm1226_vm1, %v2047_v16, %v6649_v42  ;;  %v1504_v10 = vadd.f32 %v3966_v55, %v5480_v58  ;;  %v1943_v44 = vpop.permute.xlu0 %1942 }
 0x18c   : > { %v2492_v49 = vor.u32 %v2491_v54, %v2488_v23  ;;  %v2107_v34 = vsel %vm1226_vm1, %v2053_v35, %v6650_v47  ;;  %v3706_v36 = vcombine.low %v2104_v19, %v2104_v19  ;;  %v3707_v9 = vcombine.high %v2104_v19, %v2104_v19  ;;  %1607 = vst.msk [vmem:[%s5489_s10 + $0x20] sm:$0xff] %vm1153_vm2, %v1493_v15  ;;  %v1766_v54 = vpop.f32.mrf.mxu1  ;;  %v1495_v15 = vpop.f32.mrf.mxu0 }
 0x18d   : > { %v5692_v7 = vrot.slane %v2450_v18, 4  ;;  %v3813_v31 = vcombine.low %v2107_v34, %v2107_v34  ;;  %v3814_v3 = vcombine.high %v2107_v34, %v2107_v34  ;;  %1610 = vst.msk [vmem:[%s5489_s10 + $0x38] sm:$0xff] %vm1153_vm2, %v1504_v10  ;;  %v1775_v63 = vadd.f32 %v3999_v51, %v5480_v58  ;;  %v1949_v10 = vpop.permute.xlu1 %1948 }
 0x18e   : > { %v5696_v45 = vrot.slane %v2492_v49, 4  ;;  %v6651_v23 = vrot.slane %v5616_v33, 5  ;;  %v2472_v47 = vshrl.u32 %v3706_v36, 16  ;;  %v2475_v60 = vshll.u32 %v3706_v36, 16  ;;  %v4000_v36 = vpop.f32.mrf.mxu1 }
 0x18f   : > { %v5706_v18 = vshll.u32 %v3707_v9, 16  ;;  %v3071_v16 = vshrl.u32 %v3813_v31, 16  ;;  %v3074_v35 = vshll.u32 %v3813_v31, 16  ;;  %v5708_v49 = vshll.u32 %v3814_v3, 16  ;;  %3654 = vst.msk [vmem:[%s5489_s10 + $0xb0] sm:$0xff] %vm1153_vm2, %v1775_v63  ;;  %v6652_v31 = vld [vmem:[#allocation61_spill] sm:$0xff] }
 0x190   : > { %v3069_v55 = vsel %vm5466_vm6, %v5632_v61, %v6651_v23  ;;  %v2051_v51 = vsel %vm1153_vm2, %v5358_v6, %v1943_v44  ;;  %v2474_v33 = vrot.slane %v2472_v47, 4  ;;  %v2477_v19 = vrot.slane %v2475_v60, 5 }
 0x191   : > { %v3824_v42 = vcombine.low %v2400_v17, %v3069_v55  ;;  %v2483_v61 = vrot.slane %v5706_v18, 5  ;;  %v3073_v34 = vrot.slane %v3071_v16, 4  ;;  %v3076_v9 = vrot.slane %v3074_v35, 5 }
 0x192   : > { %v3082_v23 = vrot.slane %v5708_v49, 5  ;;  %v2106_v17 = vsel %vm1226_vm1, %v2051_v51, %v6652_v31  ;;  %v1496_v3 = vadd.f32 %v5480_v58, %v1495_v15  ;;  %v2478_v6 = vor.u32 %v2477_v19, %v2474_v33 }
 0x193   : > { %4066 = vmatmul.mubr.msk.bf16.gmra.mxu1 %vm1393_vm3, %v3824_v42  ;;  %v3710_v44 = vcombine.low %v2106_v17, %v2106_v17  ;;  %v3711_v63 = vcombine.high %v2106_v17, %v2106_v17  ;;  %v1767_v55 = vadd.f32 %v5480_v58, %v1766_v54  ;;  %v3077_v47 = vor.u32 %v3076_v9, %v3073_v34  ;;  %v1947_v54 = vpop.permute.xlu0 %1946 }
 0x194   : > { %1608 = vst.msk [vmem:[%s5489_s10 + $0x28] sm:$0xff] %vm1153_vm2, %v1496_v3  ;;  %v2057_v60 = vsel %vm1153_vm2, %v5363_v38, %v1949_v10  ;;  %v1778_v16 = vadd.f32 %v4000_v36, %v5480_v58  ;;  %v6653_v35 = vrot.slane %v5607_v26, 5  ;;  %v5731_v42 = vrot.slane %v2478_v6, 4  ;;  %v6654_v38 = vld [vmem:[#allocation63_spill] sm:$0xff] }
 0x195   : > { %v2500_v51 = vshrl.u32 %v3710_v44, 16  ;;  %v2503_v33 = vshll.u32 %v3710_v44, 16  ;;  %v5733_v19 = vshll.u32 %v3711_v63, 16  ;;  %3652 = vst.msk [vmem:[%s5489_s10 + $0xa0] sm:$0xff] %vm1153_vm2, %v1767_v55  ;;  %v5737_v34 = vrot.slane %v3077_v47, 4  ;;  %v1769_v44 = vpop.f32.mrf.mxu1 }
 0x196   : > { %v2414_v15 = vsel %vm5466_vm6, %v5623_v62, %v6653_v35  ;;  %v2109_v10 = vsel %vm1226_vm1, %v2057_v60, %v6654_v38  ;;  %3655 = vst.msk [vmem:[%s5489_s10 + $0xb8] sm:$0xff] %vm1153_vm2, %v1778_v16  ;;  %v6655_v26 = vrot.slane %v5634_v1, 5  ;;  %v6656_v36 = vrot.slane %v5625_v37, 5  ;;  %v1953_v60 = vpop.permute.xlu1 %1952  ;;  %v6657_v35 = vld [vmem:[#allocation64_spill] sm:$0xff] }
 0x197   : > { %v2502_v31 = vrot.slane %v2500_v51, 4  ;;  %v2505_v17 = vrot.slane %v2503_v33, 5  ;;  %v2511_v3 = vrot.slane %v5733_v19, 5  ;;  %v3714_v6 = vcombine.low %v2109_v10, %v2109_v10 }
 0x198   : > { %v2428_v62 = vsel %vm5466_vm6, %v5656_v4, %v6655_v26  ;;  %v2442_v9 = vsel %vm5466_vm6, %v5643_v56, %v6656_v36  ;;  %v3715_v63 = vcombine.high %v2109_v10, %v2109_v10  ;;  %v2055_v1 = vsel %vm1153_vm2, %v5375_v52, %v1947_v54 }
 0x199   : > { %v3750_v55 = vcombine.low %v2414_v15, %v2428_v62  ;;  %v3825_v47 = vcombine.low %v2428_v62, %v2442_v9  ;;  %v2506_v4 = vor.u32 %v2505_v17, %v2502_v31  ;;  %v2528_v16 = vshrl.u32 %v3714_v6, 16 }
 0x19a   : > { %v2531_v37 = vshll.u32 %v3714_v6, 16  ;;  %v2108_v56 = vsel %vm1226_vm1, %v2055_v1, %v6657_v35  ;;  %v5758_v51 = vshll.u32 %v3715_v63, 16  ;;  %v1770_v38 = vadd.f32 %v5480_v58, %v1769_v44  ;;  %v1951_v6 = vpop.permute.xlu0 %1950  ;;  %v1957_v35 = vpop.permute.xlu1 %1956 }
 0x19b   : > { %4035 = vmatprep.mubr.msk.bf16.mxu0 %vm1393_vm3, %v3750_v55  ;;  %4069 = vmatprep.mubr.msk.bf16.mxu1 %vm1393_vm3, %v3825_v47  ;;  %v3712_v33 = vcombine.low %v2108_v56, %v2108_v56  ;;  %v3713_v15 = vcombine.high %v2108_v56, %v2108_v56  ;;  %v5763_v10 = vrot.slane %v2506_v4, 4  ;;  %v2530_v52 = vrot.slane %v2528_v16, 4  ;;  %v6658_v55 = vld [vmem:[#allocation6_spill] sm:$0xff] }
 0x19c   : > { %v2533_v54 = vrot.slane %v2531_v37, 5  ;;  %v2061_v26 = vsel %vm1153_vm2, %v5380_v40, %v1953_v60  ;;  %v2539_v62 = vrot.slane %v5758_v51, 5  ;;  %3653 = vst.msk [vmem:[%s5489_s10 + $0xa8] sm:$0xff] %vm1153_vm2, %v1770_v38  ;;  %v2456_v47 = vsel %vm5466_vm6, %v5692_v7, %v2455_v22 }
 0x19d   : > { %v2514_v36 = vshrl.u32 %v3712_v33, 16  ;;  %v2517_v31 = vshll.u32 %v3712_v33, 16  ;;  %v5768_v17 = vshll.u32 %v3713_v15, 16  ;;  %v2111_v44 = vsel %vm1226_vm1, %v2061_v26, %v6658_v55 }
 0x19e   : > { %v2534_v63 = vor.u32 %v2533_v54, %v2530_v52  ;;  %v6659_v40 = vrot.slane %v5645_v0, 5  ;;  %v3718_v37 = vcombine.low %v2111_v44, %v2111_v44  ;;  %v3719_v33 = vcombine.high %v2111_v44, %v2111_v44 }
 0x19f   : > { %v2516_v60 = vrot.slane %v2514_v36, 4  ;;  %v2519_v4 = vrot.slane %v2517_v31, 5  ;;  %v2525_v16 = vrot.slane %v5768_v17, 5  ;;  %v3751_v12 = vcombine.low %v2442_v9, %v2456_v47 }
 0x1a0   : > { %v2470_v1 = vsel %vm5466_vm6, %v5674_v57, %v6659_v40  ;;  %v5785_v56 = vrot.slane %v2534_v63, 4  ;;  %v2556_v52 = vshrl.u32 %v3718_v37, 16  ;;  %v2559_v22 = vshll.u32 %v3718_v37, 16  ;;  %v6660_v57 = vld [vmem:[#allocation4_spill] sm:$0xff]  ;;  %v1955_v63 = vpop.permute.xlu0 %1954 }
 0x1a1   : > { %v3826_v15 = vcombine.low %v2456_v47, %v2470_v1  ;;  %v2520_v38 = vor.u32 %v2519_v4, %v2516_v60  ;;  %v2059_v0 = vsel %vm1153_vm2, %v5385_v5, %v1951_v6  ;;  %v5789_v7 = vshll.u32 %v3719_v33, 16  ;;  %4036 = vmatmul.mubr.msk.bf16.gmra.mxu0 %vm1393_vm3, %v3751_v12  ;;  %v6661_v47 = vld [vmem:[#allocation5_spill] sm:$0xff] }
 0x1a2   : > { %v2110_v54 = vsel %vm1226_vm1, %v2059_v0, %v6660_v57  ;;  %v2065_v26 = vsel %vm1153_vm2, %v5399_v41, %v1957_v35  ;;  %v2484_v9 = vsel %vm5466_vm6, %v5731_v42, %v2483_v61  ;;  %v2558_v5 = vrot.slane %v2556_v52, 4 }
 0x1a3   : > { %4070 = vmatmul.mubr.msk.bf16.gmra.mxu1 %vm1393_vm3, %v3826_v15  ;;  %v5802_v36 = vrot.slane %v2520_v38, 4  ;;  %v2561_v31 = vrot.slane %v2559_v22, 5  ;;  %v3716_v6 = vcombine.low %v2110_v54, %v2110_v54  ;;  %v2567_v55 = vrot.slane %v5789_v7, 5  ;;  %v1961_v15 = vpop.permute.xlu1 %1960 }
 0x1a4   : > { %v3717_v44 = vcombine.high %v2110_v54, %v2110_v54  ;;  %v2113_v40 = vsel %vm1226_vm1, %v2065_v26, %v6661_v47  ;;  %v3752_v60 = vcombine.low %v2470_v1, %v2484_v9  ;;  %v6662_v42 = vrot.slane %v5676_v21, 5 }
 0x1a5   : > { %v2562_v41 = vor.u32 %v2561_v31, %v2558_v5  ;;  %v2542_v4 = vshrl.u32 %v3716_v6, 16  ;;  %v2545_v18 = vshll.u32 %v3716_v6, 16  ;;  %v3722_v37 = vcombine.low %v2113_v40, %v2113_v40  ;;  %v6663_v31 = vld [vmem:[#allocation7_spill] sm:$0xff] }
 0x1a6   : > { %v5807_v35 = vshll.u32 %v3717_v44, 16  ;;  %v3723_v61 = vcombine.high %v2113_v40, %v2113_v40  ;;  %4039 = vmatprep.mubr.msk.bf16.mxu0 %vm1393_vm3, %v3752_v60  ;;  %v2498_v33 = vsel %vm5466_vm6, %v5696_v45, %v6662_v42  ;;  %v2063_v12 = vsel %vm1153_vm2, %v5394_v13, %v1955_v63  ;;  %v6664_v60 = vld [vmem:[#allocation13_spill] sm:$0xff] }
 0x1a7   : > { %v5817_v1 = vrot.slane %v2562_v41, 4  ;;  %v2544_v38 = vrot.slane %v2542_v4, 4  ;;  %v2547_v52 = vrot.slane %v2545_v18, 5  ;;  %v2584_v22 = vshrl.u32 %v3722_v37, 16  ;;  %v1959_v4 = vpop.permute.xlu0 %1958 }
 0x1a8   : > { %v2553_v0 = vrot.slane %v5807_v35, 5  ;;  %v2587_v57 = vshll.u32 %v3722_v37, 16  ;;  %v5820_v54 = vshll.u32 %v3723_v61, 16  ;;  %v3827_v26 = vcombine.low %v2484_v9, %v2498_v33 }
 0x1a9   : > { %v2548_v21 = vor.u32 %v2547_v52, %v2544_v38  ;;  %v2586_v5 = vrot.slane %v2584_v22, 4  ;;  %v2112_v45 = vsel %vm1226_vm1, %v2063_v12, %v6663_v31  ;;  %v2069_v13 = vsel %vm1153_vm2, %v5404_v50, %v1961_v15  ;;  %v1965_v52 = vpop.permute.xlu1 %1964 }
 0x1aa   : > { %v2589_v6 = vrot.slane %v2587_v57, 5  ;;  %v2595_v63 = vrot.slane %v5820_v54, 5  ;;  %4073 = vmatprep.mubr.msk.bf16.mxu1 %vm1393_vm3, %v3827_v26  ;;  %v3720_v44 = vcombine.low %v2112_v45, %v2112_v45  ;;  %v3721_v47 = vcombine.high %v2112_v45, %v2112_v45  ;;  %v6669_v54 = vld [vmem:[#allocation17_spill] sm:$0xff] }
 0x1ab   : > { %v5828_v40 = vrot.slane %v2548_v21, 4  ;;  %v2115_v9 = vsel %vm1226_vm1, %v2069_v13, %v6664_v60  ;;  %v2512_v41 = vsel %vm5466_vm6, %v5763_v10, %v2511_v3  ;;  %v3083_v50 = vsel %vm5466_vm6, %v5737_v34, %v3082_v23  ;;  %v6665_v21 = vld [vmem:[#allocation8_spill] sm:$0xff]  ;;  %v1963_v60 = vpop.permute.xlu0 %1962 }
 0x1ac   : > { %v2590_v18 = vor.u32 %v2589_v6, %v2586_v5  ;;  %v2570_v37 = vshrl.u32 %v3720_v44, 16  ;;  %v2573_v61 = vshll.u32 %v3720_v44, 16  ;;  %v5842_v42 = vshll.u32 %v3721_v47, 16 }
 0x1ad   : > { %v3726_v12 = vcombine.low %v2115_v9, %v2115_v9  ;;  %v3727_v15 = vcombine.high %v2115_v9, %v2115_v9  ;;  %v3753_v38 = vcombine.low %v2498_v33, %v2512_v41  ;;  %v3828_v19 = vcombine.low %v2512_v41, %v3083_v50 }
 0x1ae   : > { %v5844_v22 = vrot.slane %v2590_v18, 4  ;;  %v2572_v3 = vrot.slane %v2570_v37, 4  ;;  %v2575_v10 = vrot.slane %v2573_v61, 5  ;;  %v2581_v49 = vrot.slane %v5842_v42, 5 }
 0x1af   : > { %v2612_v57 = vshrl.u32 %v3726_v12, 16  ;;  %v2615_v26 = vshll.u32 %v3726_v12, 16  ;;  %v5847_v23 = vshll.u32 %v3727_v15, 16  ;;  %4040 = vmatmul.mubr.msk.bf16.gmra.mxu0 %vm1393_vm3, %v3753_v38  ;;  %4074 = vmatmul.mubr.msk.bf16.gmra.mxu1 %vm1393_vm3, %v3828_v19  ;;  %v2067_v34 = vsel %vm1153_vm2, %v5413_v2, %v1959_v4  ;;  %v1969_v38 = vpop.permute.xlu1 %1968  ;;  %v3969_v19 = vpop.f32.mrf.mxu0 }
 0x1b0   : > { %v2576_v33 = vor.u32 %v2575_v10, %v2572_v3  ;;  %v2114_v5 = vsel %vm1226_vm1, %v2067_v34, %v6665_v21  ;;  %v2073_v31 = vsel %vm1153_vm2, %v5427_v27, %v1965_v52  ;;  %v2526_v45 = vsel %vm5466_vm6, %v5802_v36, %v2525_v16  ;;  %v6666_v3 = vld [vmem:[#allocation11_spill] sm:$0xff] }
 0x1b1   : > { %v2614_v13 = vrot.slane %v2612_v57, 4  ;;  %v2617_v6 = vrot.slane %v2615_v26, 5  ;;  %v2623_v44 = vrot.slane %v5847_v23, 5  ;;  %v3724_v47 = vcombine.low %v2114_v5, %v2114_v5 }
 0x1b2   : > { %v5863_v2 = vrot.slane %v2576_v33, 4  ;;  %v3725_v9 = vcombine.high %v2114_v5, %v2114_v5  ;;  %v2117_v41 = vsel %vm1226_vm1, %v2073_v31, %v5205_v48  ;;  %v2540_v27 = vsel %vm5466_vm6, %v5785_v56, %v2539_v62 }
 0x1b3   : > { %v2618_v17 = vor.u32 %v2617_v6, %v2614_v13  ;;  %v2598_v16 = vshrl.u32 %v3724_v47, 16  ;;  %v2601_v36 = vshll.u32 %v3724_v47, 16  ;;  %v3728_v50 = vcombine.low %v2117_v41, %v2117_v41 }
 0x1b4   : > { %v5872_v4 = vshll.u32 %v3725_v9, 16  ;;  %v3729_v18 = vcombine.high %v2117_v41, %v2117_v41  ;;  %v3754_v37 = vcombine.low %v2526_v45, %v2540_v27  ;;  %v2071_v61 = vsel %vm1153_vm2, %v5418_v14, %v1963_v60  ;;  %v1967_v45 = vpop.permute.xlu0 %1966  ;;  %v4003_v9 = vpop.f32.mrf.mxu1 }
 0x1b5   : > { %v5876_v12 = vrot.slane %v2618_v17, 4  ;;  %v2600_v48 = vrot.slane %v2598_v16, 4  ;;  %v2603_v15 = vrot.slane %v2601_v36, 5  ;;  %v2626_v51 = vshrl.u32 %v3728_v50, 16  ;;  %v5896_v41 = vpop.f32.mrf.mxu0 }
 0x1b6   : > { %v2609_v62 = vrot.slane %v5872_v4, 5  ;;  %v2629_v56 = vshll.u32 %v3728_v50, 16  ;;  %v5879_v52 = vshll.u32 %v3729_v18, 16  ;;  %4043 = vmatprep.mubr.msk.bf16.mxu0 %vm1393_vm3, %v3754_v37  ;;  %v2116_v10 = vsel %vm1226_vm1, %v2071_v61, %v6666_v3  ;;  %v1973_v18 = vpop.permute.xlu1 %1972 }
 0x1b7   : > { %v2604_v57 = vor.u32 %v2603_v15, %v2600_v48  ;;  %v2628_v26 = vrot.slane %v2626_v51, 4  ;;  %v3815_v14 = vcombine.low %v2116_v10, %v2116_v10  ;;  %v3816_v34 = vcombine.high %v2116_v10, %v2116_v10  ;;  %v1782_v51 = vpop.f32.mrf.mxu1 }
 0x1b8   : > { %v2631_v33 = vrot.slane %v2629_v56, 5  ;;  %v2637_v21 = vrot.slane %v5879_v52, 5  ;;  %v2077_v5 = vsel %vm1153_vm2, %v5434_v8, %v1969_v38  ;;  %v2554_v31 = vsel %vm5466_vm6, %v5828_v40, %v2553_v0  ;;  %v3970_v38 = vpop.f32.mrf.mxu0 }
 0x1b9   : > { %v5892_v13 = vrot.slane %v2604_v57, 4  ;;  %v3085_v6 = vshrl.u32 %v3815_v14, 16  ;;  %v3088_v47 = vshll.u32 %v3815_v14, 16  ;;  %v5894_v60 = vshll.u32 %v3816_v34, 16  ;;  %v6668_v34 = vld [vmem:[#allocation37_spill] sm:$0xff] }
 0x1ba   : > { %v2632_v17 = vor.u32 %v2631_v33, %v2628_v26  ;;  %v2119_v8 = vsel %vm1226_vm1, %v2077_v5, %v5217_v53  ;;  %v5905_v35 = vsel %vm5466_vm6, %v5817_v1, %v2567_v55  ;;  %v3829_v0 = vcombine.low %v2540_v27, %v2554_v31  ;;  %v6667_v27 = vld [vmem:[#allocation15_spill] sm:$0xff] }
 0x1bb   : > { %v3087_v40 = vrot.slane %v3085_v6, 4  ;;  %v3090_v16 = vrot.slane %v3088_v47, 5  ;;  %v3096_v36 = vrot.slane %v5894_v60, 5  ;;  %v3732_v50 = vcombine.low %v2119_v8, %v2119_v8  ;;  %v1971_v47 = vpop.permute.xlu0 %1970 }
 0x1bc   : > { %v5908_v37 = vrot.slane %v2632_v17, 4  ;;  %v3733_v61 = vcombine.high %v2119_v8, %v2119_v8  ;;  %v3755_v48 = vcombine.low %v2554_v31, %v5905_v35  ;;  %4077 = vmatprep.mubr.msk.bf16.mxu1 %vm1393_vm3, %v3829_v0  ;;  %v2075_v53 = vsel %vm1153_vm2, %v5439_v30, %v1967_v45 }
 0x1bd   : > { %v3091_v7 = vor.u32 %v3090_v16, %v3087_v40  ;;  %v2654_v55 = vshrl.u32 %v3732_v50, 16  ;;  %v2657_v1 = vshll.u32 %v3732_v50, 16  ;;  %v2118_v15 = vsel %vm1226_vm1, %v2075_v53, %v6667_v27  ;;  %v4004_v40 = vpop.f32.mrf.mxu1  ;;  %v5929_v16 = vpop.f32.mrf.mxu0 }
 0x1be   : > { %v5916_v56 = vshll.u32 %v3733_v61, 16  ;;  %4044 = vmatmul.mubr.msk.bf16.gmra.mxu0 %vm1393_vm3, %v3755_v48  ;;  %v3730_v3 = vcombine.low %v2118_v15, %v2118_v15  ;;  %v3731_v10 = vcombine.high %v2118_v15, %v2118_v15  ;;  %v2081_v57 = vsel %vm1153_vm2, %v5444_v46, %v1973_v18 }
 0x1bf   : > { %v5921_v26 = vrot.slane %v3091_v7, 4  ;;  %v2656_v30 = vrot.slane %v2654_v55, 4  ;;  %v2659_v14 = vrot.slane %v2657_v1, 5  ;;  %v2121_v33 = vsel %vm1226_vm1, %v2081_v57, %v6668_v34  ;;  %v5939_v27 = vpop.f32.mrf.mxu0  ;;  %v1785_v34 = vpop.f32.mrf.mxu1 }
 0x1c0   : > { %v2665_v5 = vrot.slane %v5916_v56, 5  ;;  %v2640_v31 = vshrl.u32 %v3730_v3, 16  ;;  %v2643_v45 = vshll.u32 %v3730_v3, 16  ;;  %v5926_v6 = vshll.u32 %v3731_v10, 16  ;;  %v1977_v10 = vpop.permute.xlu1 %1976 }
 0x1c1   : > { %v2660_v17 = vor.u32 %v2659_v14, %v2656_v30  ;;  %v3736_v8 = vcombine.low %v2121_v33, %v2121_v33  ;;  %v3737_v0 = vcombine.high %v2121_v33, %v2121_v33  ;;  %v1517_v46 = vadd.f32 %v3969_v19, %v5480_v58 }
 0x1c2   : > { %v2642_v50 = vrot.slane %v2640_v31, 4  ;;  %v2645_v18 = vrot.slane %v2643_v45, 5  ;;  %v2651_v61 = vrot.slane %v5926_v6, 5  ;;  %v1791_v48 = vadd.f32 %v4003_v9, %v5480_v58 }
 0x1c3   : > { %v5933_v53 = vrot.slane %v2660_v17, 4  ;;  %v2682_v7 = vshrl.u32 %v3736_v8, 16  ;;  %v2685_v55 = vshll.u32 %v3736_v8, 16  ;;  %v5935_v1 = vshll.u32 %v3737_v0, 16  ;;  %1613 = vst.msk [vmem:[%s5489_s10 + $0x110] sm:$0xff] %vm1153_vm2, %v1517_v46  ;;  %v5965_v17 = vpop.f32.mrf.mxu1 }
 0x1c4   : > { %v2646_v19 = vor.u32 %v2645_v18, %v2642_v50  ;;  %3658 = vst.msk [vmem:[%s5489_s10 + $0x190] sm:$0xff] %vm1153_vm2, %v1791_v48  ;;  %v2582_v15 = vsel %vm5466_vm6, %v5863_v2, %v2581_v49  ;;  %v2596_v9 = vsel %vm5466_vm6, %v5844_v22, %v2595_v63  ;;  %v2079_v3 = vsel %vm1153_vm2, %v5459_v29, %v1971_v47  ;;  %v1975_v22 = vpop.permute.xlu0 %1974 }
 0x1c5   : > { %v2684_v57 = vrot.slane %v2682_v7, 4  ;;  %v2687_v30 = vrot.slane %v2685_v55, 5  ;;  %v2693_v14 = vrot.slane %v5935_v1, 5  ;;  %v3756_v42 = vcombine.low %v2582_v15, %v2596_v9  ;;  %v6003_v55 = vpop.f32.mrf.mxu1 }
 0x1c6   : > { %v5956_v33 = vrot.slane %v2646_v19, 4  ;;  %v3830_v49 = vcombine.low %v5905_v35, %v2582_v15  ;;  %v2120_v2 = vsel %vm1226_vm1, %v2079_v3, %v6669_v54  ;;  %v1509_v63 = vadd.f32 %v5480_v58, %v5896_v41  ;;  %v5967_v35 = vpop.f32.mrf.mxu0 }
 0x1c7   : > { %v2688_v29 = vor.u32 %v2687_v30, %v2684_v57  ;;  %4047 = vmatprep.mubr.msk.bf16.mxu0 %vm1393_vm3, %v3756_v42  ;;  %v3734_v31 = vcombine.low %v2120_v2, %v2120_v2  ;;  %v3735_v45 = vcombine.high %v2120_v2, %v2120_v2  ;;  %v1783_v47 = vadd.f32 %v5480_v58, %v1782_v51 }
 0x1c8   : > { %4078 = vmatmul.mubr.msk.bf16.gmra.mxu1 %vm1393_vm3, %v3830_v49  ;;  %1611 = vst.msk [vmem:[%s5489_s10 + $0x100] sm:$0xff] %vm1153_vm2, %v1509_v63  ;;  %v2085_v41 = vsel %vm1153_vm2, %v5516_v25, %v1977_v10  ;;  %v1520_v8 = vadd.f32 %v3970_v38, %v5480_v58  ;;  %v1794_v0 = vadd.f32 %v4004_v40, %v5480_v58  ;;  %v6005_v19 = vpop.f32.mrf.mxu0  ;;  %v1979_v54 = vpop.permute.xlu0 %1978 }
 0x1c9   : > { %v2610_v51 = vsel %vm5466_vm6, %v5892_v13, %v2609_v62  ;;  %v5981_v46 = vrot.slane %v2688_v29, 4  ;;  %v2668_v50 = vshrl.u32 %v3734_v31, 16  ;;  %v2671_v18 = vshll.u32 %v3734_v31, 16  ;;  %3656 = vst.msk [vmem:[%s5489_s10 + $0x180] sm:$0xff] %vm1153_vm2, %v1783_v47  ;;  %v1981_v13 = vpop.permute.xlu1 %1980  ;;  %v6026_v29 = vpop.f32.mrf.mxu1 }
 0x1ca   : > { %v5983_v48 = vshll.u32 %v3735_v45, 16  ;;  %v2123_v25 = vsel %vm1226_vm1, %v2085_v41, %v5494_v59  ;;  %1614 = vst.msk [vmem:[%s5489_s10 + $0x118] sm:$0xff] %vm1153_vm2, %v1520_v8  ;;  %3659 = vst.msk [vmem:[%s5489_s10 + $0x198] sm:$0xff] %vm1153_vm2, %v1794_v0  ;;  %v5998_v58 = vsel %vm5466_vm6, %v5876_v12, %v2623_v44  ;;  %v3831_v4 = vcombine.low %v2596_v9, %v2610_v51  ;;  %v6028_v31 = vpop.f32.mrf.mxu0 }
 0x1cb   : > { %v2083_v62 = vsel %vm1153_vm2, %v5503_v20, %v1975_v22  ;;  %v2670_v38 = vrot.slane %v2668_v50, 4  ;;  %v2673_v40 = vrot.slane %v2671_v18, 5  ;;  %v3740_v7 = vcombine.low %v2123_v25, %v2123_v25  ;;  %v6014_v20 = vld [vmem:[%s6419_s2] ss:$0 sm:$0xff] }
 0x1cc   : > { %v2679_v59 = vrot.slane %v5983_v48, 5  ;;  %v3741_v23 = vcombine.high %v2123_v25, %v2123_v25  ;;  %v3757_v15 = vcombine.low %v2610_v51, %v5998_v58  ;;  %4081 = vmatprep.mubr.msk.bf16.mxu1 %vm1393_vm3, %v3831_v4  ;;  %v2122_v44 = vsel %vm1226_vm1, %v2083_v62, %v5454_v39 }
 0x1cd   : > { %v1512_v12 = vadd.f32 %v6014_v20, %v5929_v16  ;;  %v2674_v9 = vor.u32 %v2673_v40, %v2670_v38  ;;  %v2710_v3 = vshrl.u32 %v3740_v7, 16  ;;  %v2713_v10 = vshll.u32 %v3740_v7, 16  ;;  %v1801_v7 = vpop.f32.mrf.mxu1 }
 0x1ce   : > { %v3738_v57 = vcombine.low %v2122_v44, %v2122_v44  ;;  %v6018_v30 = vshll.u32 %v3741_v23, 16  ;;  %4048 = vmatmul.mubr.msk.bf16.gmra.mxu0 %vm1393_vm3, %v3757_v15  ;;  %v3739_v42 = vcombine.high %v2122_v44, %v2122_v44  ;;  %v1786_v39 = vadd.f32 %v6014_v20, %v1785_v34 }
 0x1cf   : > { %1612 = vst.msk [vmem:[%s5489_s10 + $0x108] sm:$0xff] %vm1153_vm2, %v1512_v12  ;;  %v2089_v49 = vsel %vm1153_vm2, %v5563_v32, %v1981_v13  ;;  %v2675_v2 = vrot.slane %v2674_v9, 4  ;;  %v2712_v16 = vrot.slane %v2710_v3, 4  ;;  %v2715_v63 = vrot.slane %v2713_v10, 5 }
 0x1d0   : > { %v2696_v22 = vshrl.u32 %v3738_v57, 16  ;;  %v2721_v45 = vrot.slane %v6018_v30, 5  ;;  %v2699_v47 = vshll.u32 %v3738_v57, 16  ;;  %v2705_v41 = vshll.u32 %v3739_v42, 16  ;;  %3657 = vst.msk [vmem:[%s5489_s10 + $0x188] sm:$0xff] %vm1153_vm2, %v1786_v39 }
 0x1d1   : > { %v2125_v34 = vsel %vm1226_vm1, %v2089_v49, %v5541_v28  ;;  %v2716_v8 = vor.u32 %v2715_v63, %v2712_v16  ;;  %v6035_v50 = vpop.f32.mrf.mxu0  ;;  %v3097_v4 = vsel %vm5466_vm6, %v5921_v26, %v3096_v36  ;;  %v2087_v62 = vsel %vm1153_vm2, %v5511_v24, %v1979_v54 }
 0x1d2   : > { %v2698_v32 = vrot.slane %v2696_v22, 4  ;;  %v3817_v0 = vcombine.low %v2125_v34, %v2125_v34  ;;  %v3818_v51 = vcombine.high %v2125_v34, %v2125_v34  ;;  %v2701_v18 = vrot.slane %v2699_v47, 5 }
 0x1d3   : > { %v2707_v25 = vrot.slane %v2705_v41, 5  ;;  %v2717_v13 = vrot.slane %v2716_v8, 4  ;;  %v3832_v15 = vcombine.low %v5998_v58, %v3097_v4  ;;  %v2124_v44 = vsel %vm1226_vm1, %v2087_v62, %v5483_v43  ;;  %v1540_v36 = vpop.f32.mrf.mxu0 }
 0x1d4   : > { %v3099_v38 = vshrl.u32 %v3817_v0, 16  ;;  %v3102_v28 = vshll.u32 %v3817_v0, 16  ;;  %v3108_v40 = vshll.u32 %v3818_v51, 16  ;;  %v2702_v23 = vor.u32 %v2701_v18, %v2698_v32 }
 0x1d5   : > { %v2638_v60 = vsel %vm5466_vm6, %v5908_v37, %v2637_v21  ;;  %v3742_v9 = vcombine.low %v2124_v44, %v2124_v44  ;;  %v4011_v3 = vpop.f32.mrf.mxu1  ;;  %4082 = vmatmul.mubr.msk.bf16.gmra.mxu1 %vm1393_vm3, %v3832_v15  ;;  %v3743_v57 = vcombine.high %v2124_v44, %v2124_v44  ;;  %v2652_v43 = vsel %vm5466_vm6, %v5956_v33, %v2651_v61  ;;  %v3978_v61 = vpop.f32.mrf.mxu0 }
 0x1d6   : > { %v3101_v26 = vrot.slane %v3099_v38, 4  ;;  %v3104_v24 = vrot.slane %v3102_v28, 5  ;;  %v3110_v12 = vrot.slane %v3108_v40, 5  ;;  %v2703_v10 = vrot.slane %v2702_v23, 4 }
 0x1d7   : > { %v2666_v52 = vsel %vm5466_vm6, %v5933_v53, %v2665_v5  ;;  %v2724_v37 = vshrl.u32 %v3742_v9, 16  ;;  %v2727_v58 = vshll.u32 %v3742_v9, 16  ;;  %v3758_v30 = vcombine.low %v2638_v60, %v2652_v43  ;;  %v1814_v42 = vpop.f32.mrf.mxu1  ;;  %v1543_v8 = vpop.f32.mrf.mxu0 }
 0x1d8   : > { %v3105_v21 = vor.u32 %v3104_v24, %v3101_v26  ;;  %v2733_v39 = vshll.u32 %v3743_v57, 16  ;;  %v3833_v49 = vcombine.low %v2652_v43, %v2666_v52  ;;  %v2680_v6 = vsel %vm5466_vm6, %v2675_v2, %v2679_v59 }
 0x1d9   : > { %v2694_v56 = vsel %vm5466_vm6, %v5981_v46, %v2693_v14  ;;  %v2726_v53 = vrot.slane %v2724_v37, 4  ;;  %v2729_v33 = vrot.slane %v2727_v58, 5  ;;  %4051 = vmatprep.mubr.msk.bf16.mxu0 %vm1393_vm3, %v3758_v30  ;;  %v3759_v54 = vcombine.low %v2666_v52, %v2680_v6  ;;  %v4012_v16 = vpop.f32.mrf.mxu1 }
 0x1da   : > { %v3106_v5 = vrot.slane %v3105_v21, 4  ;;  %v2735_v63 = vrot.slane %v2733_v39, 5  ;;  %4085 = vmatprep.mubr.msk.bf16.mxu1 %vm1393_vm3, %v3833_v49  ;;  %v3834_v48 = vcombine.low %v2680_v6, %v2694_v56  ;;  %v2708_v1 = vsel %vm5466_vm6, %v2703_v10, %v2707_v25 }
 0x1db   : > { %v2722_v59 = vsel %vm5466_vm6, %v2717_v13, %v2721_v45  ;;  %v2730_v14 = vor.u32 %v2729_v33, %v2726_v53  ;;  %4052 = vmatmul.mubr.msk.bf16.gmra.mxu0 %vm1393_vm3, %v3759_v54  ;;  %v3760_v46 = vcombine.low %v2694_v56, %v2708_v1  ;;  %v1533_v22 = vadd.f32 %v6014_v20, %v5939_v27  ;;  %v1817_v0 = vpop.f32.mrf.mxu1 }
 0x1dc   : > { %v3835_v2 = vcombine.low %v2708_v1, %v2722_v59  ;;  %v1807_v47 = vadd.f32 %v6014_v20, %v5965_v17  ;;  %v3111_v41 = vsel %vm5466_vm6, %v3106_v5, %v3110_v12  ;;  %v1525_v45 = vadd.f32 %v6014_v20, %v5967_v35 }
 0x1dd   : > { %v1799_v34 = vadd.f32 %v6014_v20, %v6003_v55  ;;  %v2731_v32 = vrot.slane %v2730_v14, 4  ;;  %4055 = vmatprep.mubr.msk.bf16.mxu0 %vm1393_vm3, %v3760_v46  ;;  %1617 = vst.msk [vmem:[%s5489_s10 + $0x130] sm:$0xff] %vm1153_vm2, %v1533_v22  ;;  %v1536_v27 = vadd.f32 %v6014_v20, %v6005_v19  ;;  %v1810_v17 = vadd.f32 %v6014_v20, %v6026_v29 }
 0x1de   : > { %v1528_v35 = vadd.f32 %v6014_v20, %v6028_v31  ;;  %4086 = vmatmul.mubr.msk.bf16.gmra.mxu1 %vm1393_vm3, %v3834_v48  ;;  %3662 = vst.msk [vmem:[%s5489_s10 + $0x1b0] sm:$0xff] %vm1153_vm2, %v1807_v47  ;;  %1615 = vst.msk [vmem:[%s5489_s10 + $0x120] sm:$0xff] %vm1153_vm2, %v1525_v45  ;;  %v1802_v55 = vadd.f32 %v6014_v20, %v1801_v7  ;;  %v1549_v19 = vadd.f32 %v6014_v20, %v6035_v50 }
 0x1df   : > { %3660 = vst.msk [vmem:[%s5489_s10 + $0x1a0] sm:$0xff] %vm1153_vm2, %v1799_v34  ;;  %v1541_v29 = vadd.f32 %v6014_v20, %v1540_v36  ;;  %v1552_v31 = vadd.f32 %v6014_v20, %v3978_v61  ;;  %4089 = vmatprep.mubr.msk.bf16.mxu1 %vm1393_vm3, %v3835_v2  ;;  %v2736_v51 = vsel %vm5466_vm6, %v2731_v32, %v2735_v63  ;;  %1618 = vst.msk [vmem:[%s5489_s10 + $0x138] sm:$0xff] %vm1153_vm2, %v1536_v27 }
 0x1e0   : > { %3663 = vst.msk [vmem:[%s5489_s10 + $0x1b8] sm:$0xff] %vm1153_vm2, %v1810_v17  ;;  %1616 = vst.msk [vmem:[%s5489_s10 + $0x128] sm:$0xff] %vm1153_vm2, %v1528_v35  ;;  %v1823_v50 = vadd.f32 %v6014_v20, %v4011_v3  ;;  %v1544_v18 = vadd.f32 %v6014_v20, %v1543_v8  ;;  %v1815_v25 = vadd.f32 %v6014_v20, %v1814_v42 }
 0x1e1   : > { %v3761_v4 = vcombine.low %v2722_v59, %v2736_v51  ;;  %v3836_v11 = vcombine.low %v2736_v51, %v3111_v41  ;;  %3661 = vst.msk [vmem:[%s5489_s10 + $0x1a8] sm:$0xff] %vm1153_vm2, %v1802_v55  ;;  %1621 = vst.msk [vmem:[%s5489_s10 + $0x210] sm:$0xff] %vm1153_vm2, %v1549_v19  ;;  %v1826_v62 = vadd.f32 %v6014_v20, %v4012_v16 }
 0x1e2   : > { %1619 = vst.msk [vmem:[%s5489_s10 + $0x200] sm:$0xff] %vm1153_vm2, %v1541_v29  ;;  %1622 = vst.msk [vmem:[%s5489_s10 + $0x218] sm:$0xff] %vm1153_vm2, %v1552_v31  ;;  %v1818_v13 = vadd.f32 %v6014_v20, %v1817_v0 }
 0x1e3   : > { %3666 = vst.msk [vmem:[%s5489_s10 + $0x290] sm:$0xff] %vm1153_vm2, %v1823_v50  ;;  %1620 = vst.msk [vmem:[%s5489_s10 + $0x208] sm:$0xff] %vm1153_vm2, %v1544_v18  ;;  %4056 = vmatmul.mubr.msk.bf16.gmra.mxu0 %vm1393_vm3, %v3761_v4 }
 0x1e4   : > { %3664 = vst.msk [vmem:[%s5489_s10 + $0x280] sm:$0xff] %vm1153_vm2, %v1815_v25  ;;  %3667 = vst.msk [vmem:[%s5489_s10 + $0x298] sm:$0xff] %vm1153_vm2, %v1826_v62 }
 0x1e5   : > { %3665 = vst.msk [vmem:[%s5489_s10 + $0x288] sm:$0xff] %vm1153_vm2, %v1818_v13 }
 0x1e6   : > { %4090 = vmatmul.mubr.msk.bf16.gmra.mxu1 %vm1393_vm3, %v3836_v11 }
 0x1e9   : > { %v3981_v38 = vpop.f32.mrf.mxu0 }
 0x1ea   : > { %v1565_v28 = vadd.f32 %v6014_v20, %v3981_v38 }
 0x1eb   : > { %v1556_v40 = vpop.f32.mrf.mxu0 }
 0x1ec   : > { %1625 = vst.msk [vmem:[%s5489_s10 + $0x230] sm:$0xff] %vm1153_vm2, %v1565_v28  ;;  %v1557_v7 = vadd.f32 %v6014_v20, %v1556_v40 }
 0x1ed   : > { %v3982_v23 = vpop.f32.mrf.mxu0  ;;  %v4015_v15 = vpop.f32.mrf.mxu1 }
 0x1ee   : > { %1623 = vst.msk [vmem:[%s5489_s10 + $0x220] sm:$0xff] %vm1153_vm2, %v1557_v7  ;;  %v1568_v44 = vadd.f32 %v6014_v20, %v3982_v23  ;;  %v1839_v60 = vadd.f32 %v6014_v20, %v4015_v15 }
 0x1ef   : > { %v1559_v36 = vpop.f32.mrf.mxu0  ;;  %v1830_v26 = vpop.f32.mrf.mxu1 }
 0x1f0   : > { %1626 = vst.msk [vmem:[%s5489_s10 + $0x238] sm:$0xff] %vm1153_vm2, %v1568_v44  ;;  %3670 = vst.msk [vmem:[%s5489_s10 + $0x2b0] sm:$0xff] %vm1153_vm2, %v1839_v60  ;;  %v1560_v24 = vadd.f32 %v6014_v20, %v1559_v36  ;;  %v1831_v12 = vadd.f32 %v6014_v20, %v1830_v26 }
 0x1f1   : > { %v4016_v9 = vpop.f32.mrf.mxu1 }
 0x1f2   : > { %1624 = vst.msk [vmem:[%s5489_s10 + $0x228] sm:$0xff] %vm1153_vm2, %v1560_v24  ;;  %3668 = vst.msk [vmem:[%s5489_s10 + $0x2a0] sm:$0xff] %vm1153_vm2, %v1831_v12  ;;  %v1842_v3 = vadd.f32 %v6014_v20, %v4016_v9 }
 0x1f3   : > { %v1833_v10 = vpop.f32.mrf.mxu1 }
 0x1f4   : > { %3671 = vst.msk [vmem:[%s5489_s10 + $0x2b8] sm:$0xff] %vm1153_vm2, %v1842_v3  ;;  %v1834_v57 = vadd.f32 %v6014_v20, %v1833_v10 }
 0x1f6   : > { %3669 = vst.msk [vmem:[%s5489_s10 + $0x2a8] sm:$0xff] %vm1153_vm2, %v1834_v57 }
 0x209   : > { %v3985_v43 = vpop.f32.mrf.mxu0  ;;  %v4019_v52 = vpop.f32.mrf.mxu1 }
 0x20a   : > { %v1581_v21 = vadd.f32 %v6014_v20, %v3985_v43  ;;  %v1855_v37 = vadd.f32 %v6014_v20, %v4019_v52 }
 0x20b   : > { %v1572_v58 = vpop.f32.mrf.mxu0  ;;  %v1846_v30 = vpop.f32.mrf.mxu1 }
 0x20c   : > { %1629 = vst.msk [vmem:[%s5489_s10 + $0x310] sm:$0xff] %vm1153_vm2, %v1581_v21  ;;  %3674 = vst.msk [vmem:[%s5489_s10 + $0x390] sm:$0xff] %vm1153_vm2, %v1855_v37  ;;  %v1573_v42 = vadd.f32 %v6014_v20, %v1572_v58  ;;  %v1847_v39 = vadd.f32 %v6014_v20, %v1846_v30 }
 0x20d   : > { %v3986_v49 = vpop.f32.mrf.mxu0  ;;  %v4020_v6 = vpop.f32.mrf.mxu1 }
 0x20e   : > { %1627 = vst.msk [vmem:[%s5489_s10 + $0x300] sm:$0xff] %vm1153_vm2, %v1573_v42  ;;  %3672 = vst.msk [vmem:[%s5489_s10 + $0x380] sm:$0xff] %vm1153_vm2, %v1847_v39  ;;  %v1584_v56 = vadd.f32 %v6014_v20, %v3986_v49  ;;  %v1858_v61 = vadd.f32 %v6014_v20, %v4020_v6 }
 0x20f   : > { %v1575_v5 = vpop.f32.mrf.mxu0  ;;  %v1849_v53 = vpop.f32.mrf.mxu1 }
 0x210   : > { %1630 = vst.msk [vmem:[%s5489_s10 + $0x318] sm:$0xff] %vm1153_vm2, %v1584_v56  ;;  %3675 = vst.msk [vmem:[%s5489_s10 + $0x398] sm:$0xff] %vm1153_vm2, %v1858_v61  ;;  %v1576_v33 = vadd.f32 %v6014_v20, %v1575_v5  ;;  %v1850_v54 = vadd.f32 %v6014_v20, %v1849_v53 }
 0x212   : > { %1628 = vst.msk [vmem:[%s5489_s10 + $0x308] sm:$0xff] %vm1153_vm2, %v1576_v33  ;;  %3673 = vst.msk [vmem:[%s5489_s10 + $0x388] sm:$0xff] %vm1153_vm2, %v1850_v54 }
 0x229   : > { %v3989_v16 = vpop.f32.mrf.mxu0 }
 0x22a   : > { %v1597_v63 = vadd.f32 %v6014_v20, %v3989_v16 }
 0x22b   : > { %v1588_v48 = vpop.f32.mrf.mxu0 }
 0x22c   : > { %1633 = vst.msk [vmem:[%s5489_s10 + $0x330] sm:$0xff] %vm1153_vm2, %v1597_v63  ;;  %v1589_v1 = vadd.f32 %v6014_v20, %v1588_v48 }
 0x22d   : > { %v3990_v59 = vpop.f32.mrf.mxu0 }
 0x22e   : > { %1631 = vst.msk [vmem:[%s5489_s10 + $0x320] sm:$0xff] %vm1153_vm2, %v1589_v1  ;;  %v1600_v14 = vadd.f32 %v6014_v20, %v3990_v59  ;;  %v4023_v46 = vpop.f32.mrf.mxu1 }
 0x22f   : > { %v1871_v2 = vadd.f32 %v6014_v20, %v4023_v46  ;;  %v1591_v22 = vpop.f32.mrf.mxu0 }
 0x230   : > { %1634 = vst.msk [vmem:[%s5489_s10 + $0x338] sm:$0xff] %vm1153_vm2, %v1600_v14  ;;  %v1592_v47 = vadd.f32 %v6014_v20, %v1591_v22  ;;  %v1862_v41 = vpop.f32.mrf.mxu1 }
 0x231   : > { %3678 = vst.msk [vmem:[%s5489_s10 + $0x3b0] sm:$0xff] %vm1153_vm2, %v1871_v2  ;;  %v1863_v45 = vadd.f32 %v6014_v20, %v1862_v41  ;;  %v4029_v34 = vpop.f32.mrf.mxu0 }
 0x232   : > { %1632 = vst.msk [vmem:[%s5489_s10 + $0x328] sm:$0xff] %vm1153_vm2, %v1592_v47  ;;  %v4024_v8 = vpop.f32.mrf.mxu1  ;;  %v2885_v32 = vadd.f32 %v6014_v20, %v4029_v34 }
 0x233   : > { %3676 = vst.msk [vmem:[%s5489_s10 + $0x3a0] sm:$0xff] %vm1153_vm2, %v1863_v45  ;;  %v1874_v27 = vadd.f32 %v6014_v20, %v4024_v8  ;;  %v2876_v17 = vpop.f32.mrf.mxu0 }
 0x234   : > { %3781 = vst.msk [vmem:[%s5489_s10 + $0x50] sm:$0xff] %vm1153_vm2, %v2885_v32  ;;  %v1865_v35 = vpop.f32.mrf.mxu1  ;;  %v2877_v0 = vadd.f32 %v6014_v20, %v2876_v17 }
 0x235   : > { %3679 = vst.msk [vmem:[%s5489_s10 + $0x3b8] sm:$0xff] %vm1153_vm2, %v1874_v27  ;;  %v1866_v55 = vadd.f32 %v6014_v20, %v1865_v35  ;;  %v4030_v19 = vpop.f32.mrf.mxu0 }
 0x236   : > { %3779 = vst.msk [vmem:[%s5489_s10 + $0x40] sm:$0xff] %vm1153_vm2, %v2877_v0  ;;  %v2888_v29 = vadd.f32 %v6014_v20, %v4030_v19  ;;  %v4063_v31 = vpop.f32.mrf.mxu1 }
 0x237   : > { %3677 = vst.msk [vmem:[%s5489_s10 + $0x3a8] sm:$0xff] %vm1153_vm2, %v1866_v55  ;;  %v3232_v51 = vadd.f32 %v6014_v20, %v4063_v31  ;;  %v2879_v50 = vpop.f32.mrf.mxu0 }
 0x238   : > { %3782 = vst.msk [vmem:[%s5489_s10 + $0x58] sm:$0xff] %vm1153_vm2, %v2888_v29  ;;  %v2880_v18 = vadd.f32 %v6014_v20, %v2879_v50  ;;  %v3223_v25 = vpop.f32.mrf.mxu1 }
 0x239   : > { %3856 = vst.msk [vmem:[%s5489_s10 + $0xd0] sm:$0xff] %vm1153_vm2, %v3232_v51  ;;  %v3224_v4 = vadd.f32 %v6014_v20, %v3223_v25 }
 0x23a   : > { %3780 = vst.msk [vmem:[%s5489_s10 + $0x48] sm:$0xff] %vm1153_vm2, %v2880_v18  ;;  %v4064_v11 = vpop.f32.mrf.mxu1 }
 0x23b   : > { %3854 = vst.msk [vmem:[%s5489_s10 + $0xc0] sm:$0xff] %vm1153_vm2, %v3224_v4  ;;  %v3235_v62 = vadd.f32 %v6014_v20, %v4064_v11 }
 0x23c   : > { %v3226_v13 = vpop.f32.mrf.mxu1 }
 0x23d   : > { %3857 = vst.msk [vmem:[%s5489_s10 + $0xd8] sm:$0xff] %vm1153_vm2, %v3235_v62  ;;  %v3227_v38 = vadd.f32 %v6014_v20, %v3226_v13 }
 0x23f   : > { %3855 = vst.msk [vmem:[%s5489_s10 + $0xc8] sm:$0xff] %vm1153_vm2, %v3227_v38 }
 0x24a   : > { %v4033_v28 = vpop.f32.mrf.mxu0 }
 0x24b   : > { %v2901_v40 = vadd.f32 %v6014_v20, %v4033_v28 }
 0x24c   : > { %v2892_v7 = vpop.f32.mrf.mxu0 }
 0x24d   : > { %3785 = vst.msk [vmem:[%s5489_s10 + $0x70] sm:$0xff] %vm1153_vm2, %v2901_v40  ;;  %v2893_v23 = vadd.f32 %v6014_v20, %v2892_v7 }
 0x24e   : > { %v4034_v15 = vpop.f32.mrf.mxu0 }
 0x24f   : > { %3783 = vst.msk [vmem:[%s5489_s10 + $0x60] sm:$0xff] %vm1153_vm2, %v2893_v23  ;;  %v2904_v44 = vadd.f32 %v6014_v20, %v4034_v15 }
 0x250   : > { %v2895_v60 = vpop.f32.mrf.mxu0 }
 0x251   : > { %3786 = vst.msk [vmem:[%s5489_s10 + $0x78] sm:$0xff] %vm1153_vm2, %v2904_v44  ;;  %v2896_v26 = vadd.f32 %v6014_v20, %v2895_v60 }
 0x253   : > { %v4067_v36 = vpop.f32.mrf.mxu1  ;;  %3784 = vst.msk [vmem:[%s5489_s10 + $0x68] sm:$0xff] %vm1153_vm2, %v2896_v26 }
 0x254   : > { %v3248_v24 = vadd.f32 %v6014_v20, %v4067_v36 }
 0x255   : > { %v3239_v12 = vpop.f32.mrf.mxu1 }
 0x256   : > { %3860 = vst.msk [vmem:[%s5489_s10 + $0xf0] sm:$0xff] %vm1153_vm2, %v3248_v24  ;;  %v3240_v9 = vadd.f32 %v6014_v20, %v3239_v12 }
 0x257   : > { %v4068_v3 = vpop.f32.mrf.mxu1 }
 0x258   : > { %3858 = vst.msk [vmem:[%s5489_s10 + $0xe0] sm:$0xff] %vm1153_vm2, %v3240_v9  ;;  %v3251_v10 = vadd.f32 %v6014_v20, %v4068_v3 }
 0x259   : > { %v3242_v57 = vpop.f32.mrf.mxu1 }
 0x25a   : > { %3861 = vst.msk [vmem:[%s5489_s10 + $0xf8] sm:$0xff] %vm1153_vm2, %v3251_v10  ;;  %v3243_v43 = vadd.f32 %v6014_v20, %v3242_v57 }
 0x25c   : > { %3859 = vst.msk [vmem:[%s5489_s10 + $0xe8] sm:$0xff] %vm1153_vm2, %v3243_v43 }
 0x261   : > { %v4037_v52 = vpop.f32.mrf.mxu0 }
 0x262   : > { %v2917_v37 = vadd.f32 %v6014_v20, %v4037_v52 }
 0x263   : > { %v4071_v21 = vpop.f32.mrf.mxu1  ;;  %v2908_v30 = vpop.f32.mrf.mxu0 }
 0x264   : > { %v3264_v58 = vadd.f32 %v6014_v20, %v4071_v21  ;;  %3789 = vst.msk [vmem:[%s5489_s10 + $0x150] sm:$0xff] %vm1153_vm2, %v2917_v37  ;;  %v2909_v39 = vadd.f32 %v6014_v20, %v2908_v30 }
 0x265   : > { %v3255_v42 = vpop.f32.mrf.mxu1  ;;  %v4038_v6 = vpop.f32.mrf.mxu0 }
 0x266   : > { %3864 = vst.msk [vmem:[%s5489_s10 + $0x1d0] sm:$0xff] %vm1153_vm2, %v3264_v58  ;;  %v3256_v49 = vadd.f32 %v6014_v20, %v3255_v42  ;;  %3787 = vst.msk [vmem:[%s5489_s10 + $0x140] sm:$0xff] %vm1153_vm2, %v2909_v39  ;;  %v2920_v61 = vadd.f32 %v6014_v20, %v4038_v6 }
 0x267   : > { %v4072_v56 = vpop.f32.mrf.mxu1  ;;  %v2911_v53 = vpop.f32.mrf.mxu0 }
 0x268   : > { %3862 = vst.msk [vmem:[%s5489_s10 + $0x1c0] sm:$0xff] %vm1153_vm2, %v3256_v49  ;;  %v3267_v5 = vadd.f32 %v6014_v20, %v4072_v56  ;;  %3790 = vst.msk [vmem:[%s5489_s10 + $0x158] sm:$0xff] %vm1153_vm2, %v2920_v61  ;;  %v2912_v54 = vadd.f32 %v6014_v20, %v2911_v53 }
 0x269   : > { %v3258_v33 = vpop.f32.mrf.mxu1 }
 0x26a   : > { %3865 = vst.msk [vmem:[%s5489_s10 + $0x1d8] sm:$0xff] %vm1153_vm2, %v3267_v5  ;;  %v3259_v16 = vadd.f32 %v6014_v20, %v3258_v33  ;;  %3788 = vst.msk [vmem:[%s5489_s10 + $0x148] sm:$0xff] %vm1153_vm2, %v2912_v54 }
 0x26c   : > { %3863 = vst.msk [vmem:[%s5489_s10 + $0x1c8] sm:$0xff] %vm1153_vm2, %v3259_v16 }
 0x26f   : > { %v4041_v63 = vpop.f32.mrf.mxu0  ;;  %v4075_v48 = vpop.f32.mrf.mxu1 }
 0x270   : > { %v2933_v1 = vadd.f32 %v6014_v20, %v4041_v63  ;;  %v3280_v59 = vadd.f32 %v6014_v20, %v4075_v48 }
 0x271   : > { %v2924_v14 = vpop.f32.mrf.mxu0  ;;  %v3271_v46 = vpop.f32.mrf.mxu1 }
 0x272   : > { %3793 = vst.msk [vmem:[%s5489_s10 + $0x170] sm:$0xff] %vm1153_vm2, %v2933_v1  ;;  %3868 = vst.msk [vmem:[%s5489_s10 + $0x1f0] sm:$0xff] %vm1153_vm2, %v3280_v59  ;;  %v2925_v2 = vadd.f32 %v6014_v20, %v2924_v14  ;;  %v3272_v22 = vadd.f32 %v6014_v20, %v3271_v46 }
 0x273   : > { %v4042_v47 = vpop.f32.mrf.mxu0  ;;  %v4076_v41 = vpop.f32.mrf.mxu1 }
 0x274   : > { %3791 = vst.msk [vmem:[%s5489_s10 + $0x160] sm:$0xff] %vm1153_vm2, %v2925_v2  ;;  %3866 = vst.msk [vmem:[%s5489_s10 + $0x1e0] sm:$0xff] %vm1153_vm2, %v3272_v22  ;;  %v2936_v45 = vadd.f32 %v6014_v20, %v4042_v47  ;;  %v3283_v34 = vadd.f32 %v6014_v20, %v4076_v41 }
 0x275   : > { %v2927_v8 = vpop.f32.mrf.mxu0  ;;  %v3274_v32 = vpop.f32.mrf.mxu1 }
 0x276   : > { %3794 = vst.msk [vmem:[%s5489_s10 + $0x178] sm:$0xff] %vm1153_vm2, %v2936_v45  ;;  %3869 = vst.msk [vmem:[%s5489_s10 + $0x1f8] sm:$0xff] %vm1153_vm2, %v3283_v34  ;;  %v2928_v27 = vadd.f32 %v6014_v20, %v2927_v8  ;;  %v3275_v17 = vadd.f32 %v6014_v20, %v3274_v32 }
 0x278   : > { %3792 = vst.msk [vmem:[%s5489_s10 + $0x168] sm:$0xff] %vm1153_vm2, %v2928_v27  ;;  %3867 = vst.msk [vmem:[%s5489_s10 + $0x1e8] sm:$0xff] %vm1153_vm2, %v3275_v17 }
 0x27e   : > { %v4045_v35 = vpop.f32.mrf.mxu0 }
 0x27f   : > { %v2949_v0 = vadd.f32 %v6014_v20, %v4045_v35 }
 0x280   : > { %v2940_v55 = vpop.f32.mrf.mxu0 }
 0x281   : > { %3797 = vst.msk [vmem:[%s5489_s10 + $0x250] sm:$0xff] %vm1153_vm2, %v2949_v0  ;;  %v2941_v19 = vadd.f32 %v6014_v20, %v2940_v55 }
 0x282   : > { %v4046_v29 = vpop.f32.mrf.mxu0 }
 0x283   : > { %3795 = vst.msk [vmem:[%s5489_s10 + $0x240] sm:$0xff] %vm1153_vm2, %v2941_v19  ;;  %v2952_v31 = vadd.f32 %v6014_v20, %v4046_v29 }
 0x284   : > { %v2943_v51 = vpop.f32.mrf.mxu0 }
 0x285   : > { %3798 = vst.msk [vmem:[%s5489_s10 + $0x258] sm:$0xff] %vm1153_vm2, %v2952_v31  ;;  %v2944_v50 = vadd.f32 %v6014_v20, %v2943_v51 }
 0x287   : > { %3796 = vst.msk [vmem:[%s5489_s10 + $0x248] sm:$0xff] %vm1153_vm2, %v2944_v50 }
 0x288   : > { %v4079_v18 = vpop.f32.mrf.mxu1 }
 0x289   : > { %v3296_v25 = vadd.f32 %v6014_v20, %v4079_v18 }
 0x28a   : > { %v3287_v4 = vpop.f32.mrf.mxu1 }
 0x28b   : > { %3872 = vst.msk [vmem:[%s5489_s10 + $0x2d0] sm:$0xff] %vm1153_vm2, %v3296_v25  ;;  %v3288_v11 = vadd.f32 %v6014_v20, %v3287_v4 }
 0x28c   : > { %v4080_v62 = vpop.f32.mrf.mxu1 }
 0x28d   : > { %3870 = vst.msk [vmem:[%s5489_s10 + $0x2c0] sm:$0xff] %vm1153_vm2, %v3288_v11  ;;  %v3299_v13 = vadd.f32 %v6014_v20, %v4080_v62 }
 0x28e   : > { %v4049_v38 = vpop.f32.mrf.mxu0  ;;  %v3290_v28 = vpop.f32.mrf.mxu1 }
 0x28f   : > { %v2965_v40 = vadd.f32 %v6014_v20, %v4049_v38  ;;  %3873 = vst.msk [vmem:[%s5489_s10 + $0x2d8] sm:$0xff] %vm1153_vm2, %v3299_v13  ;;  %v3291_v7 = vadd.f32 %v6014_v20, %v3290_v28 }
 0x290   : > { %v2956_v23 = vpop.f32.mrf.mxu0 }
 0x291   : > { %3801 = vst.msk [vmem:[%s5489_s10 + $0x270] sm:$0xff] %vm1153_vm2, %v2965_v40  ;;  %v2957_v15 = vadd.f32 %v6014_v20, %v2956_v23  ;;  %3871 = vst.msk [vmem:[%s5489_s10 + $0x2c8] sm:$0xff] %vm1153_vm2, %v3291_v7 }
 0x292   : > { %v4050_v44 = vpop.f32.mrf.mxu0 }
 0x293   : > { %3799 = vst.msk [vmem:[%s5489_s10 + $0x260] sm:$0xff] %vm1153_vm2, %v2957_v15  ;;  %v2968_v60 = vadd.f32 %v6014_v20, %v4050_v44 }
 0x294   : > { %v2959_v36 = vpop.f32.mrf.mxu0 }
 0x295   : > { %3802 = vst.msk [vmem:[%s5489_s10 + $0x278] sm:$0xff] %vm1153_vm2, %v2968_v60  ;;  %v2960_v26 = vadd.f32 %v6014_v20, %v2959_v36  ;;  %v4083_v24 = vpop.f32.mrf.mxu1 }
 0x296   : > { %v3312_v12 = vadd.f32 %v6014_v20, %v4083_v24 }
 0x297   : > { %3800 = vst.msk [vmem:[%s5489_s10 + $0x268] sm:$0xff] %vm1153_vm2, %v2960_v26  ;;  %v3303_v9 = vpop.f32.mrf.mxu1 }
 0x298   : > { %3876 = vst.msk [vmem:[%s5489_s10 + $0x2f0] sm:$0xff] %vm1153_vm2, %v3312_v12  ;;  %v3304_v3 = vadd.f32 %v6014_v20, %v3303_v9 }
 0x299   : > { %v4084_v10 = vpop.f32.mrf.mxu1 }
 0x29a   : > { %3874 = vst.msk [vmem:[%s5489_s10 + $0x2e0] sm:$0xff] %vm1153_vm2, %v3304_v3  ;;  %v3315_v57 = vadd.f32 %v6014_v20, %v4084_v10 }
 0x29b   : > { %v4053_v43 = vpop.f32.mrf.mxu0  ;;  %v3306_v52 = vpop.f32.mrf.mxu1 }
 0x29c   : > { %v2981_v21 = vadd.f32 %v6014_v20, %v4053_v43  ;;  %3877 = vst.msk [vmem:[%s5489_s10 + $0x2f8] sm:$0xff] %vm1153_vm2, %v3315_v57  ;;  %v3307_v37 = vadd.f32 %v6014_v20, %v3306_v52 }
 0x29d   : > { %v2972_v58 = vpop.f32.mrf.mxu0 }
 0x29e   : > { %3805 = vst.msk [vmem:[%s5489_s10 + $0x350] sm:$0xff] %vm1153_vm2, %v2981_v21  ;;  %v4087_v30 = vpop.f32.mrf.mxu1  ;;  %v2973_v42 = vadd.f32 %v6014_v20, %v2972_v58  ;;  %3875 = vst.msk [vmem:[%s5489_s10 + $0x2e8] sm:$0xff] %vm1153_vm2, %v3307_v37 }
 0x29f   : > { %v3328_v39 = vadd.f32 %v6014_v20, %v4087_v30  ;;  %v4054_v49 = vpop.f32.mrf.mxu0 }
 0x2a0   : > { %3803 = vst.msk [vmem:[%s5489_s10 + $0x340] sm:$0xff] %vm1153_vm2, %v2973_v42  ;;  %v3319_v6 = vpop.f32.mrf.mxu1  ;;  %v2984_v56 = vadd.f32 %v6014_v20, %v4054_v49 }
 0x2a1   : > { %3880 = vst.msk [vmem:[%s5489_s10 + $0x3d0] sm:$0xff] %vm1153_vm2, %v3328_v39  ;;  %v3320_v61 = vadd.f32 %v6014_v20, %v3319_v6  ;;  %v2975_v5 = vpop.f32.mrf.mxu0 }
 0x2a2   : > { %3806 = vst.msk [vmem:[%s5489_s10 + $0x358] sm:$0xff] %vm1153_vm2, %v2984_v56  ;;  %v4088_v53 = vpop.f32.mrf.mxu1  ;;  %v2976_v33 = vadd.f32 %v6014_v20, %v2975_v5 }
 0x2a3   : > { %3878 = vst.msk [vmem:[%s5489_s10 + $0x3c0] sm:$0xff] %vm1153_vm2, %v3320_v61  ;;  %v3331_v54 = vadd.f32 %v6014_v20, %v4088_v53  ;;  %v4057_v16 = vpop.f32.mrf.mxu0 }
 0x2a4   : > { %3804 = vst.msk [vmem:[%s5489_s10 + $0x348] sm:$0xff] %vm1153_vm2, %v2976_v33  ;;  %v3322_v63 = vpop.f32.mrf.mxu1  ;;  %v2997_v48 = vadd.f32 %v6014_v20, %v4057_v16 }
 0x2a5   : > { %3881 = vst.msk [vmem:[%s5489_s10 + $0x3d8] sm:$0xff] %vm1153_vm2, %v3331_v54  ;;  %v3323_v1 = vadd.f32 %v6014_v20, %v3322_v63  ;;  %v2988_v59 = vpop.f32.mrf.mxu0 }
 0x2a6   : > { %3809 = vst.msk [vmem:[%s5489_s10 + $0x370] sm:$0xff] %vm1153_vm2, %v2997_v48  ;;  %v4091_v14 = vpop.f32.mrf.mxu1  ;;  %v2989_v46 = vadd.f32 %v6014_v20, %v2988_v59 }
 0x2a7   : > { %3879 = vst.msk [vmem:[%s5489_s10 + $0x3c8] sm:$0xff] %vm1153_vm2, %v3323_v1  ;;  %v3344_v2 = vadd.f32 %v6014_v20, %v4091_v14  ;;  %v4058_v22 = vpop.f32.mrf.mxu0 }
 0x2a8   : > { %3807 = vst.msk [vmem:[%s5489_s10 + $0x360] sm:$0xff] %vm1153_vm2, %v2989_v46  ;;  %v3335_v47 = vpop.f32.mrf.mxu1  ;;  %v3000_v41 = vadd.f32 %v6014_v20, %v4058_v22 }
 0x2a9   : > { %3884 = vst.msk [vmem:[%s5489_s10 + $0x3f0] sm:$0xff] %vm1153_vm2, %v3344_v2  ;;  %v3336_v45 = vadd.f32 %v6014_v20, %v3335_v47  ;;  %v2991_v34 = vpop.f32.mrf.mxu0 }
 0x2aa   : > { %3810 = vst.msk [vmem:[%s5489_s10 + $0x378] sm:$0xff] %vm1153_vm2, %v3000_v41  ;;  %v4092_v8 = vpop.f32.mrf.mxu1  ;;  %v2992_v32 = vadd.f32 %v6014_v20, %v2991_v34 }
 0x2ab   : > { %3882 = vst.msk [vmem:[%s5489_s10 + $0x3e0] sm:$0xff] %vm1153_vm2, %v3336_v45  ;;  %v3347_v27 = vadd.f32 %v6014_v20, %v4092_v8 }
 0x2ac   : > { %3808 = vst.msk [vmem:[%s5489_s10 + $0x368] sm:$0xff] %vm1153_vm2, %v2992_v32  ;;  %v3338_v17 = vpop.f32.mrf.mxu1 }
 0x2ad   : > { %3885 = vst.msk [vmem:[%s5489_s10 + $0x3f8] sm:$0xff] %vm1153_vm2, %v3347_v27  ;;  %v3339_v35 = vadd.f32 %v6014_v20, %v3338_v17 }
 0x2af   : > { %3883 = vst.msk [vmem:[%s5489_s10 + $0x3e8] sm:$0xff] %vm1153_vm2, %v3339_v35 }
 0x2b0 PF: > { %s13_s14 = sadd.s32 1, %s4224_s14   ;;  %s6670_s12 = smov %s4220_s13 }
 0x2b1   : > { %p10_p5 = scmp.ge.s32.totalorder %s13_s14, 4   ;;  %s6671_s13 = smov %s6673_s15 }
 0x2b3   :  { %12 = sbr.rel (!%p10_p5) target bundleno = 2 (0x2), region = 74 }

</bundles_post_ra>
